<compile_context>
chip_gen: v7x
topology: tpu7x:2x2x1
jax: 0.10.0
libtpu: 0.0.40
codegen_flags: <defaults>
</compile_context>

<pallas_src>
import math
import functools

import jax
import jax.numpy as jnp
from jax.experimental import pallas as pl
from jax.experimental.pallas import tpu as pltpu


def _round_up(a, b):
    return ((a + b - 1) // b) * b


def _pick_channel_tile(p4c, target=512):
    """Largest 128-aligned divisor of p4c that is <= target, else p4c."""
    if p4c <= target:
        return p4c
    for tn in range(target - target % 128, 127, -128):
        if p4c % tn == 0:
            return tn
    return p4c


def transposed_upsample(x_nchw, weight, bias, *, stride=2, row_block=32,
                        channel_tile=512, compute_dtype=jnp.bfloat16):
    """Equivalent of nn.ConvTranspose2d(C_in, C_out, ks, stride=2)(x).

    x_nchw : (N, C_in, H, W)        float32
    weight : (C_in, C_out, ks, ks)  float32   (PyTorch ConvTranspose2d layout)
    bias   : (C_out,)               float32
    returns: (N, C_out, H_out, W_out) with H_out = (H-1)*stride + ks
    """
    N, C_in, H, W = x_nchw.shape
    C_in_w, C_out, KH, KW = weight.shape
    assert C_in_w == C_in and KH == KW
    ks = KH
    assert stride == 2, "polyphase decomposition implemented for stride=2"
    assert ks % 2 == 1, "odd kernel size expected (module default ks=5)"
    # TODO(synk): other strides / even kernel sizes need a different phase split.

    PAD = (ks - 1) // 2            # input zero-pad per side; also halo rows
    KT = PAD + 1                   # taps per phase along each spatial dim (3)
    H_out = (H - 1) * stride + ks
    W_out = (W - 1) * stride + ks

    Ro = H + PAD                   # valid phase rows per phase
    Cs = W + PAD                   # valid phase cols per phase
    P4C = 4 * C_out                # 4 phases stacked in the channel dim

    # ---- tiling --------------------------------------------------------------
    # Rows: TR phase rows per grid step; multiple of PAD so the halo block is a
    # plain Blocked spec; sized to minimize row-padding waste.
    n_rb = pl.cdiv(Ro, row_block)
    TR = _round_up(pl.cdiv(Ro, n_rb), PAD)
    Ro_pad = n_rb * TR
    # Cols: 8-aligned so reshapes are layout-preserving and stores are dense.
    Cs_pad = _round_up(Cs, 8)
    # Channels: tile 4*C_out so weight slice + f32 accumulator stay small.
    TN = _pick_channel_tile(P4C, channel_tile)
    n_ct = P4C // TN

    Hp = Ro_pad + PAD              # padded input rows (incl. bottom halo)
    Wp = Cs_pad + PAD              # padded input cols

    fold_kw = C_in < 128           # fold KW into the contraction only when C_in
                                   # alone does not fill the MXU depth
    KD = KT * C_in if fold_kw else C_in

    cdt = jnp.dtype(compute_dtype)
    out_dtype = x_nchw.dtype

    # ---- wrapper glue: layout + padding + weight packing ---------------------
    x = jnp.transpose(x_nchw, (0, 2, 3, 1)).astype(cdt)            # NHWC
    x_pad = jnp.pad(x, ((0, 0),
                        (PAD, Hp - PAD - H),
                        (PAD, Wp - PAD - W),
                        (0, 0)))

    # w block[tr][tc][:, (2*pr + pc)*C_out + co] = w[ci, co, kh, kw] with
    # kh = ks-1-2*tr (pr=0) / ks-2*tr (pr=1), likewise kw (zero if out of range).
    blocks = []
    for tr in range(KT):
        row = []
        for tc in range(KT):
            phase_blocks = []
            for pr in range(2):
                kh = (ks - 1 - 2 * tr) if pr == 0 else (ks - 2 * tr)
                for pc in range(2):
                    kw = (ks - 1 - 2 * tc) if pc == 0 else (ks - 2 * tc)
                    if 0 <= kh < ks and 0 <= kw < ks:
                        phase_blocks.append(weight[:, :, kh, kw])    # (C_in, C_out)
                    else:
                        phase_blocks.append(jnp.zeros((C_in, C_out), weight.dtype))
            row.append(jnp.concatenate(phase_blocks, axis=1))       # (C_in, 4*C_out)
        blocks.append(row)
    if fold_kw:
        w_pack = jnp.stack([jnp.concatenate(blocks[tr], axis=0)
                            for tr in range(KT)], axis=0)           # (KT, KT*C_in, P4C)
    else:
        w_pack = jnp.stack([jnp.stack(blocks[tr], axis=0)
                            for tr in range(KT)], axis=0)           # (KT, KT, C_in, P4C)
    w_pack = w_pack.astype(cdt)
    b_pack = jnp.tile(bias, 4).reshape(1, P4C).astype(jnp.float32)

    MQ = TR * Cs_pad               # matmul M dim per step

    # ---- Pallas kernel --------------------------------------------------------
    def kernel(xm_ref, xh_ref, w_ref, b_ref, o_ref, xw_ref):
        # xm_ref : (1, TR, Wp, C_in)      main input row window
        # xh_ref : (1, PAD, Wp, C_in)     bottom halo rows of the window
        # w_ref  : (KT, KT*C_in, TN)  or  (KT, KT, C_in, TN) packed phase weights
        # b_ref  : (1, TN)
        # o_ref  : (1, TR, Cs_pad, TN)    TR phase rows x 4-phase channel tile
        # xw_ref : (TR+PAD, Wp, C_in)     assembled halo'd window (VMEM scratch)
        xw_ref[0:TR] = xm_ref[0]
        xw_ref[TR:TR + PAD] = xh_ref[0]

        acc = None
        for tr in range(KT):                                     # unrolled KH taps
            if fold_kw:
                lhs = jnp.concatenate(
                    [xw_ref[tr:tr + TR, tc:tc + Cs_pad, :] for tc in range(KT)],
                    axis=-1).reshape(MQ, KD)
                part = jnp.dot(lhs, w_ref[tr],
                               preferred_element_type=jnp.float32)
                acc = part if acc is None else acc + part
            else:
                for tc in range(KT):                             # KT*KT dots, no concat
                    lhs = xw_ref[tr:tr + TR, tc:tc + Cs_pad, :].reshape(MQ, KD)
                    part = jnp.dot(lhs, w_ref[tr, tc],
                                   preferred_element_type=jnp.float32)
                    acc = part if acc is None else acc + part
        acc = acc + b_ref[...].astype(jnp.float32)
        o_ref[0] = acc.reshape(TR, Cs_pad, TN).astype(o_ref.dtype)

    if fold_kw:
        w_spec = pl.BlockSpec((KT, KT * C_in, TN), lambda n, ct, rb: (0, 0, ct))
    else:
        w_spec = pl.BlockSpec((KT, KT, C_in, TN), lambda n, ct, rb: (0, 0, 0, ct))

    halo_step = TR // PAD          # halo block-index stride (block size = PAD)

    in_specs = [
        pl.BlockSpec((1, TR, Wp, C_in), lambda n, ct, rb: (n, rb, 0, 0)),
        pl.BlockSpec((1, PAD, Wp, C_in),
                     lambda n, ct, rb: (n, (rb + 1) * halo_step, 0, 0)),
        w_spec,
        pl.BlockSpec((1, TN), lambda n, ct, rb: (0, ct)),
    ]
    out_spec = pl.BlockSpec((1, TR, Cs_pad, TN), lambda n, ct, rb: (n, rb, 0, ct))

    # ---- VMEM budget / cost hints --------------------------------------------
    cb = cdt.itemsize
    ob = jnp.dtype(out_dtype).itemsize
    vmem_need = (2 * TR * Wp * C_in * cb           # main input block (x2 buf)
                 + 2 * PAD * Wp * C_in * cb        # halo block (x2 buf)
                 + (TR + PAD) * Wp * C_in * cb     # assembled window scratch
                 + 2 * KT * KT * C_in * TN * cb    # packed weight tile (x2 buf)
                 + 2 * TN * 4                      # bias tile
                 + 2 * TR * Cs_pad * TN * ob       # output block (x2 buf)
                 + TR * Cs_pad * TN * 4            # f32 accumulator
                 + 2 * MQ * KD * cb)               # im2col / slice temporaries
    vmem_need = int(vmem_need * 1.25)              # headroom for compiler temps
    try:
        vmem_cap = int(pltpu.get_tpu_info().vmem_capacity_bytes * 0.85)
    except Exception:
        vmem_cap = 64 * 1024 * 1024
    vmem_limit = int(min(max(vmem_need, 32 * 1024 * 1024), vmem_cap))

    flops = 2 * N * Ro_pad * Cs_pad * P4C * KT * KT * C_in
    bytes_accessed = int(n_ct * x_pad.size * cb + w_pack.size * cb
                         + b_pack.size * 4 + N * Ro_pad * Cs_pad * P4C * ob)

    yp = pl.pallas_call(
        kernel,
        out_shape=jax.ShapeDtypeStruct((N, Ro_pad, Cs_pad, P4C), out_dtype),
        grid_spec=pltpu.PrefetchScalarGridSpec(
            num_scalar_prefetch=0,
            grid=(N, n_ct, n_rb),                  # rb innermost: weights stay
            in_specs=in_specs,                     # resident, input rows stream
            out_specs=out_spec,
            scratch_shapes=[pltpu.VMEM((TR + PAD, Wp, C_in), cdt)]),
        compiler_params=pltpu.CompilerParams(
            dimension_semantics=("parallel", "parallel", "arbitrary"),
            vmem_limit_bytes=vmem_limit),
        cost_estimate=pl.CostEstimate(flops=flops, transcendentals=0,
                                      bytes_accessed=bytes_accessed),
    )(x_pad, x_pad, w_pack, b_pack)

    # ---- wrapper glue: interleave the 4 phases into the full-res output ------
    yp = yp[:, :Ro, :Cs]                               # drop row/col tile padding
    yp = yp.reshape(N, Ro, Cs, 2, 2, C_out)            # (..., pr, pc, co)
    yp = jnp.transpose(yp, (0, 1, 3, 2, 4, 5))         # (N, Ro, 2, Cs, 2, C_out)
    y = yp.reshape(N, 2 * Ro, 2 * Cs, C_out)[:, :H_out, :W_out]
    # TODO(synk): skip this final relayout (return NHWC) when the consumer
    # accepts channels-last; the PyTorch module contract is NCHW.
    return jnp.transpose(y, (0, 3, 1, 2))              # NHWC -> NCHW


if __name__ == "__main__":
    N, C, H, W = 2, 4, 16, 16
    KS, STRIDE = 5, 2
    C_OUT = C  # out_channels defaults to channels

    key = jax.random.PRNGKey(0)
    k_x, k_w, k_b = jax.random.split(key, 3)
    x = jax.random.normal(k_x, (N, C, H, W), jnp.float32)
    fan_in = C * KS * KS
    weight = jax.random.normal(k_w, (C, C_OUT, KS, KS), jnp.float32) / math.sqrt(fan_in)
    bias = 0.1 * jax.random.normal(k_b, (C_OUT,), jnp.float32)

    # Reference: scatter formulation of ConvTranspose2d (independent derivation).
    H_OUT = (H - 1) * STRIDE + KS
    W_OUT = (W - 1) * STRIDE + KS
    ref = jnp.zeros((N, C_OUT, H_OUT, W_OUT), jnp.float32)
    for kh in range(KS):
        for kw in range(KS):
            contrib = jnp.einsum("nchw,cd->ndhw", x, weight[:, :, kh, kw])
            ref = ref.at[:, :,
                         kh:kh + STRIDE * H:STRIDE,
                         kw:kw + STRIDE * W:STRIDE].add(contrib)
    ref = ref + bias[None, :, None, None]

    ok = True
    for cdtype, tol in ((jnp.float32, 1e-4), (jnp.bfloat16, 5e-2)):
        fn = jax.jit(functools.partial(transposed_upsample, stride=STRIDE,
                                       compute_dtype=cdtype))
        out = jax.block_until_ready(fn(x, weight, bias))
        assert out.shape == (N, C_OUT, H_OUT, W_OUT), out.shape
        err = float(jnp.max(jnp.abs(out - ref)))
        if not (err < tol):
            ok = False
            print("MISMATCH", jnp.dtype(cdtype).name, err)
    if ok:
        print("KERNEL_OK")
</pallas_src>

<mosaic_0001>
module attributes {stable_mosaic.version = 11 : i64} {
  func.func @kernel(%arg0: i32, %arg1: i32, %arg2: i32, %arg3: memref<1x18x26x4xf32, #tpu.memory_space<vmem>>, %arg4: memref<1x2x26x4xf32, #tpu.memory_space<vmem>>, %arg5: memref<3x12x16xf32, #tpu.memory_space<vmem>>, %arg6: memref<1x16xf32, #tpu.memory_space<vmem>>, %arg7: memref<1x18x24x16xf32, #tpu.memory_space<vmem>>, %arg8: memref<20x26x4xf32, #tpu.memory_space<vmem>>) attributes {dimension_semantics = [#tpu.dimension_semantics<parallel>, #tpu.dimension_semantics<parallel>, #tpu.dimension_semantics<arbitrary>], iteration_bounds = array<i64: 2, 1, 1>, scalar_prefetch = 0 : i64, scratch_operands = 1 : i64, tpu.core_type = #tpu.core_type<tc>, window_params = [{transform_indices = @transform_0, window_bounds = array<i64: 1, 18, 26, 4>}, {transform_indices = @transform_1, window_bounds = array<i64: 1, 2, 26, 4>}, {transform_indices = @transform_2, window_bounds = array<i64: 3, 12, 16>}, {transform_indices = @transform_3, window_bounds = array<i64: 1, 16>}, {transform_indices = @transform_4, window_bounds = array<i64: 1, 18, 24, 16>}]} {
    %c0 = arith.constant 0 : index
    %c0_0 = arith.constant 0 : index
    %c0_1 = arith.constant 0 : index
    %c0_2 = arith.constant 0 : index
    %0 = vector.load %arg3[%c0, %c0_0, %c0_1, %c0_2] : memref<1x18x26x4xf32, #tpu.memory_space<vmem>>, vector<1x18x26x4xf32>
    %1 = vector.shape_cast %0 : vector<1x18x26x4xf32> to vector<18x26x4xf32>
    %c0_3 = arith.constant 0 : index
    %c0_4 = arith.constant 0 : index
    %c0_5 = arith.constant 0 : index
    %2 = vector.load %arg8[%c0_3, %c0_4, %c0_5] : memref<20x26x4xf32, #tpu.memory_space<vmem>>, vector<18x26x4xf32>
    tpu.vector_store %arg8[%c0_3, %c0_4, %c0_5], %1 {strides = array<i32>} : memref<20x26x4xf32, #tpu.memory_space<vmem>>, vector<18x26x4xf32>,
    %c0_6 = arith.constant 0 : index
    %c0_7 = arith.constant 0 : index
    %c0_8 = arith.constant 0 : index
    %c0_9 = arith.constant 0 : index
    %3 = vector.load %arg4[%c0_6, %c0_7, %c0_8, %c0_9] : memref<1x2x26x4xf32, #tpu.memory_space<vmem>>, vector<1x2x26x4xf32>
    %4 = vector.shape_cast %3 : vector<1x2x26x4xf32> to vector<2x26x4xf32>
    %c18 = arith.constant 18 : index
    %c0_10 = arith.constant 0 : index
    %c0_11 = arith.constant 0 : index
    %5 = vector.load %arg8[%c18, %c0_10, %c0_11] : memref<20x26x4xf32, #tpu.memory_space<vmem>>, vector<2x26x4xf32>
    tpu.vector_store %arg8[%c18, %c0_10, %c0_11], %4 {strides = array<i32>} : memref<20x26x4xf32, #tpu.memory_space<vmem>>, vector<2x26x4xf32>,
    %c0_12 = arith.constant 0 : index
    %c0_13 = arith.constant 0 : index
    %c0_14 = arith.constant 0 : index
    %6 = vector.load %arg8[%c0_12, %c0_13, %c0_14] : memref<20x26x4xf32, #tpu.memory_space<vmem>>, vector<18x24x4xf32>
    %c0_15 = arith.constant 0 : index
    %c1 = arith.constant 1 : index
    %c0_16 = arith.constant 0 : index
    %7 = vector.load %arg8[%c0_15, %c1, %c0_16] : memref<20x26x4xf32, #tpu.memory_space<vmem>>, vector<18x24x4xf32>
    %c0_17 = arith.constant 0 : index
    %c2 = arith.constant 2 : index
    %c0_18 = arith.constant 0 : index
    %8 = vector.load %arg8[%c0_17, %c2, %c0_18] : memref<20x26x4xf32, #tpu.memory_space<vmem>>, vector<18x24x4xf32>
    %9 = tpu.concatenate %6, %7, %8 in 2 : vector<18x24x4xf32>, vector<18x24x4xf32>, vector<18x24x4xf32> -> vector<18x24x12xf32>
    %10 = vector.shape_cast %9 : vector<18x24x12xf32> to vector<432x12xf32>
    %c0_19 = arith.constant 0 : index
    %c0_20 = arith.constant 0 : index
    %c0_21 = arith.constant 0 : index
    %11 = vector.load %arg5[%c0_19, %c0_20, %c0_21] : memref<3x12x16xf32, #tpu.memory_space<vmem>>, vector<1x12x16xf32>
    %12 = vector.shape_cast %11 : vector<1x12x16xf32> to vector<12x16xf32>
    %cst = arith.constant dense<0.000000e+00> : vector<432x16xf32>
    %13 = tpu.matmul %10, %12, %cst {dimension_numbers = #tpu.dot_dimension_numbers<[1], [0], [0], [1], [0, 0, 1, 1], [], []>} : vector<432x12xf32>, vector<12x16xf32>, vector<432x16xf32> -> vector<432x16xf32>
    %c1_22 = arith.constant 1 : index
    %c0_23 = arith.constant 0 : index
    %c0_24 = arith.constant 0 : index
    %14 = vector.load %arg8[%c1_22, %c0_23, %c0_24] : memref<20x26x4xf32, #tpu.memory_space<vmem>>, vector<18x24x4xf32>
    %c1_25 = arith.constant 1 : index
    %c1_26 = arith.constant 1 : index
    %c0_27 = arith.constant 0 : index
    %15 = vector.load %arg8[%c1_25, %c1_26, %c0_27] : memref<20x26x4xf32, #tpu.memory_space<vmem>>, vector<18x24x4xf32>
    %c1_28 = arith.constant 1 : index
    %c2_29 = arith.constant 2 : index
    %c0_30 = arith.constant 0 : index
    %16 = vector.load %arg8[%c1_28, %c2_29, %c0_30] : memref<20x26x4xf32, #tpu.memory_space<vmem>>, vector<18x24x4xf32>
    %17 = tpu.concatenate %14, %15, %16 in 2 : vector<18x24x4xf32>, vector<18x24x4xf32>, vector<18x24x4xf32> -> vector<18x24x12xf32>
    %18 = vector.shape_cast %17 : vector<18x24x12xf32> to vector<432x12xf32>
    %c1_31 = arith.constant 1 : index
    %c0_32 = arith.constant 0 : index
    %c0_33 = arith.constant 0 : index
    %19 = vector.load %arg5[%c1_31, %c0_32, %c0_33] : memref<3x12x16xf32, #tpu.memory_space<vmem>>, vector<1x12x16xf32>
    %20 = vector.shape_cast %19 : vector<1x12x16xf32> to vector<12x16xf32>
    %cst_34 = arith.constant dense<0.000000e+00> : vector<432x16xf32>
    %21 = tpu.matmul %18, %20, %cst_34 {dimension_numbers = #tpu.dot_dimension_numbers<[1], [0], [0], [1], [0, 0, 1, 1], [], []>} : vector<432x12xf32>, vector<12x16xf32>, vector<432x16xf32> -> vector<432x16xf32>
    %22 = arith.addf %13, %21 : vector<432x16xf32>
    %c2_35 = arith.constant 2 : index
    %c0_36 = arith.constant 0 : index
    %c0_37 = arith.constant 0 : index
    %23 = vector.load %arg8[%c2_35, %c0_36, %c0_37] : memref<20x26x4xf32, #tpu.memory_space<vmem>>, vector<18x24x4xf32>
    %c2_38 = arith.constant 2 : index
    %c1_39 = arith.constant 1 : index
    %c0_40 = arith.constant 0 : index
    %24 = vector.load %arg8[%c2_38, %c1_39, %c0_40] : memref<20x26x4xf32, #tpu.memory_space<vmem>>, vector<18x24x4xf32>
    %c2_41 = arith.constant 2 : index
    %c2_42 = arith.constant 2 : index
    %c0_43 = arith.constant 0 : index
    %25 = vector.load %arg8[%c2_41, %c2_42, %c0_43] : memref<20x26x4xf32, #tpu.memory_space<vmem>>, vector<18x24x4xf32>
    %26 = tpu.concatenate %23, %24, %25 in 2 : vector<18x24x4xf32>, vector<18x24x4xf32>, vector<18x24x4xf32> -> vector<18x24x12xf32>
    %27 = vector.shape_cast %26 : vector<18x24x12xf32> to vector<432x12xf32>
    %c2_44 = arith.constant 2 : index
    %c0_45 = arith.constant 0 : index
    %c0_46 = arith.constant 0 : index
    %28 = vector.load %arg5[%c2_44, %c0_45, %c0_46] : memref<3x12x16xf32, #tpu.memory_space<vmem>>, vector<1x12x16xf32>
    %29 = vector.shape_cast %28 : vector<1x12x16xf32> to vector<12x16xf32>
    %cst_47 = arith.constant dense<0.000000e+00> : vector<432x16xf32>
    %30 = tpu.matmul %27, %29, %cst_47 {dimension_numbers = #tpu.dot_dimension_numbers<[1], [0], [0], [1], [0, 0, 1, 1], [], []>} : vector<432x12xf32>, vector<12x16xf32>, vector<432x16xf32> -> vector<432x16xf32>
    %31 = arith.addf %22, %30 : vector<432x16xf32>
    %c0_48 = arith.constant 0 : index
    %c0_49 = arith.constant 0 : index
    %32 = vector.load %arg6[%c0_48, %c0_49] : memref<1x16xf32, #tpu.memory_space<vmem>>, vector<1x16xf32>
    %33 = vector.broadcast %32 : vector<1x16xf32> to vector<432x16xf32>
    %34 = arith.addf %31, %33 : vector<432x16xf32>
    %35 = vector.shape_cast %34 : vector<432x16xf32> to vector<18x24x16xf32>
    %c0_50 = arith.constant 0 : index
    %c0_51 = arith.constant 0 : index
    %c0_52 = arith.constant 0 : index
    %c0_53 = arith.constant 0 : index
    %36 = vector.load %arg7[%c0_50, %c0_51, %c0_52, %c0_53] : memref<1x18x24x16xf32, #tpu.memory_space<vmem>>, vector<1x18x24x16xf32>
    %37 = vector.shape_cast %36 : vector<1x18x24x16xf32> to vector<18x24x16xf32>
    %38 = vector.shape_cast %35 : vector<18x24x16xf32> to vector<1x18x24x16xf32>
    tpu.vector_store %arg7[%c0_50, %c0_51, %c0_52, %c0_53], %38 {strides = array<i32>} : memref<1x18x24x16xf32, #tpu.memory_space<vmem>>, vector<1x18x24x16xf32>,
    return
  }
  func.func @transform_0(%arg0: i32, %arg1: i32, %arg2: i32) -> (i32, i32, i32, i32) {
    %c0_i32 = arith.constant 0 : i32
    %c0_i32_0 = arith.constant 0 : i32
    %c0_i32_1 = arith.constant 0 : i32
    return %arg0, %arg2, %c0_i32, %c0_i32_0 : i32, i32, i32, i32
  }
  func.func @transform_1(%arg0: i32, %arg1: i32, %arg2: i32) -> (i32, i32, i32, i32) {
    %c1_i32 = arith.constant 1 : i32
    %0 = arith.addi %arg2, %c1_i32 : i32
    %c9_i32 = arith.constant 9 : i32
    %1 = arith.muli %0, %c9_i32 : i32
    %c0_i32 = arith.constant 0 : i32
    %c0_i32_0 = arith.constant 0 : i32
    %c0_i32_1 = arith.constant 0 : i32
    return %arg0, %1, %c0_i32, %c0_i32_0 : i32, i32, i32, i32
  }
  func.func @transform_2(%arg0: i32, %arg1: i32, %arg2: i32) -> (i32, i32, i32) {
    %c0_i32 = arith.constant 0 : i32
    %c0_i32_0 = arith.constant 0 : i32
    %c0_i32_1 = arith.constant 0 : i32
    return %c0_i32, %c0_i32_0, %arg1 : i32, i32, i32
  }
  func.func @transform_3(%arg0: i32, %arg1: i32, %arg2: i32) -> (i32, i32) {
    %c0_i32 = arith.constant 0 : i32
    %c0_i32_0 = arith.constant 0 : i32
    return %c0_i32, %arg1 : i32, i32
  }
  func.func @transform_4(%arg0: i32, %arg1: i32, %arg2: i32) -> (i32, i32, i32, i32) {
    %c0_i32 = arith.constant 0 : i32
    %c0_i32_0 = arith.constant 0 : i32
    return %arg0, %arg2, %c0_i32, %arg1 : i32, i32, i32, i32
  }
}

</mosaic_0001>

<bundles_post_ra>
// kernel: tile.9
= control target key start
LH: loop header
LB: loop body
LE: loop exit
PB: predicated region body
PF: predicated region fallthrough
CT: control target
= control target key end

     0   :  { %vm7_vm0 = vcmask 31744   ;;  %s37_s8 = smov 4   ;;  %s38_s9 = smov 8   ;;  %vm13_vm1 = vcmask 130144   ;;  %vm19_vm2 = vcmask 97344   ;;  %vm25_vm3 = vcmask 64544   ;;  %s55_s0 = inlined_call_operand.vmem [shape: f32[4,4], index: 0, kind: input, shape index: {}]   ;;  %s56_s1 = inlined_call_operand.vmem [shape: f32[1,16], index: 1, kind: output, shape index: {}]  }
   0x1   :  { %v4_v0 = vld [vmem:[%s55_s0] sm:$0xf]  ;;  %s36_s0 = smov 12  }
   0x2   :  { %5 = vst [vmem:[#allocation1] sm:$0xf] %v4_v0 }
   0x9   :  { %v10_v1 = vld [vmem:[#allocation1 + $0x3] sm:$0x1]   ;;  %v22_v2 = vld [vmem:[#allocation1 + $0x1] sm:$0x1]   ;;  %v6_v3 = vld [vmem:[#allocation1] sm:$0x1]  }
   0xa   :  { %11 = vrot.lane.b32.xlu0 %v10_v1, %s36_s0  ;;  %23 = vrot.lane.b32.xlu1 %v22_v2, %s37_s8  ;;  %v16_v4 = vld [vmem:[#allocation1 + $0x2] sm:$0x1]   ;;  %8 = vst.msk [vmem:[#allocation0] sm:$0x1] %vm7_vm0, %v6_v3  }
   0xe   :  { %17 = vrot.lane.b32.xlu0 %v16_v4, %s38_s9 }
  0x7c   :  { %v12_v5 = vpop.permute.xlu0 %11   ;;  %v24_v6 = vpop.permute.xlu1 %23  }
  0x7d   :  { %14 = vst.msk [vmem:[#allocation0] sm:$0x1] %vm13_vm1, %v12_v5  }
  0x80   :  { %v18_v7 = vpop.permute.xlu0 %17  }
  0x81   :  { %20 = vst.msk [vmem:[#allocation0] sm:$0x1] %vm19_vm2, %v18_v7  }
  0x82   :  { %26 = vst.msk [vmem:[#allocation0] sm:$0x1] %vm25_vm3, %v24_v6  }
  0x89   :  { %v30_v8 = vld [vmem:[#allocation0] sm:$0x1] }
  0x8a   :  { %32 = vst [vmem:[%s56_s1] sm:$0x1] %v30_v8 }

// kernel: tile.8
= control target key start
LH: loop header
LB: loop body
LE: loop exit
PB: predicated region body
PF: predicated region fallthrough
CT: control target
= control target key end

     0   :  { %2 = vsyncpa [#allocation1], 0  ;;  %s44_s6 = smov [#allocation0]   ;;  %s70_s0 = inlined_call_operand.hbm [shape: f32[4], index: 0, kind: input, shape index: {}]   ;;  %s71_s1 = inlined_call_operand.vmem [shape: f32[4,4], index: 1, kind: output, shape index: {}]  }
   0x1   :  { %s9_s7 = sshll.u32 %s44_s6, 4  ;;  %s20_s10 = scalar_lea.hbm %s70_s0, 16  ;;  %s10_s7 = int_to_ptr.vmem [resolvable:$true] %s9_s7 }
   0x2   :  { %p21_p0 = scmp.ne.s32.totalorder %s70_s0, %s20_s10  ;;  %p24_p1 = scmp.lt.u32.totalorder %s20_s10, %s70_s0 }
   0x4   :  { %p26_p2 = pnand %p24_p1, %p21_p0 }
   0x6   :  { %29 = shalt.err (!%p26_p2)
}
   0x7   :  { %s30_s15 = scalar_lea.vmem %s10_s7, 16  ;;  %s34_s16 = scalar_lea.vmem %s10_s7, 32 }
   0x8   :  { %p31_p3 = scmp.ne.s32.totalorder %s10_s7, %s30_s15  ;;  %p35_p4 = scmp.lt.s32.totalorder %s10_s7, %s10_s7 }
   0x9   :  { %p36_p5 = scmp.lt.s32.totalorder %s34_s16, %s30_s15 }
   0xb   :  { %p37_p6 = por %p36_p5, %p35_p4 }
   0xd   :  { %p38_p7 = pnand %p37_p6, %p31_p3 }
   0xf   :  { %41 = shalt.err (!%p38_p7)
}
  0x10   :  { %12 = dma.hbm_to_vmem [thread:$0]  %s70_s0, 16, %s10_s7, [#allocation1]  }
  0x11   :  { %42 = dma.done.wait [#allocation1], 16  }
  0x12   :  { %43 = vsyncadd [#allocation1], 4294967280  ;;  %v16_v0 = vld [vmem:[#allocation0] ss:$0 sm:$0xff] }
  0x13   :  { %17 = vst [vmem:[%s71_s1] sm:$0xf] %v16_v0 }
  0x14   :  { %18 = vsyncpa [#allocation1], 1 }

// kernel: transposed_upsample.1
= control target key start
LH: loop header
LB: loop body
LE: loop exit
PB: predicated region body
PF: predicated region fallthrough
CT: control target
= control target key end

     0   :  { %s5293_s15 = smov 0   ;;  %s5295_s16 = smov 0   ;;  %s7483_s0 = inlined_call_operand.vmem [shape: f32[2,20,26,4], index: 0, kind: input, shape index: {}, may-alias: {0,1}]   ;;  %s7484_s1 = inlined_call_operand.vmem [shape: f32[2,20,26,4], index: 1, kind: input, shape index: {}, may-alias: {0,1}]   ;;  %s7485_s2 = inlined_call_operand.vmem [shape: f32[3,12,16], index: 2, kind: input, shape index: {}]   ;;  %s7486_s3 = inlined_call_operand.vmem [shape: f32[1,16], index: 3, kind: input, shape index: {}]   ;;  %s7487_s4 = inlined_call_operand.vmem [shape: f32[2,18,24,16], index: 4, kind: output, shape index: {}]  }
   0x1   :  { %s5297_s17 = smov 0  }
   0x2 LB: > { %s33_s18 = sadd.s32 1, %s5259_s16  ;;  %p4481_p0 = scmp.ge.s32.totalorder %s5263_s17, 1  ;;  %s5263_s17 = sphi %s5297_s17, %s14_s17   ;;  %s5259_s16 = sphi %s5295_s16, %s7683_s16   ;;  %s5255_s15 = sphi %s5293_s15, %s7682_s15  }
   0x3   : > { %p35_p1 = scmp.ge.s32.totalorder %s33_s18, 2  ;;  %p246_p2 = scmp.lt.s32.totalorder %s5263_s17, 3 }
   0x5   : > { %s7685_s18 = smov (%p35_p1, %s33_s18), 0  ;;  %p247_p3 = pnand %p4481_p0, %p246_p2 }
   0x7   : > { %250 = sbr.rel (%p247_p3) target bundleno = 1011 (0x3f3), region = 36 }
   0xe   : > { %p315_p4 = scmp.lt.s32.totalorder %s5255_s15, 1  ;;  %vm438_vm0 = vcmask 31744   ;;  %vm442_vm1 = vcmask 25600   ;;  %s5265_s23 = smov 4   ;;  %vm2103_vm2 = vcmask 1043456   ;;  %vm5266_vm3 = vmmov 1  }
   0xf   : > { %vm5533_vm4 = vmpackc.low %vm2103_vm2, %vm5266_vm3  ;;  %s5267_s28 = smov 8   ;;  %vm1177_vm5 = vcmask 64512   ;;  %vm1940_vm6 = vcmask 97280   ;;  %vm4263_vm7 = vcmask 130048  }
  0x10   : > { %s7687_s15 = smov (!%p315_p4, %s5255_s15), 1 }
  0x11   : > { %s5210_s19 = smul.u32 640, %s7687_s15 }
  0x13   : > { %s5319_s22 = scalar_lea.vmem %s7483_s0, %s5210_s19  ;;  %s4658_s11 = sadd.s32 576, %s5210_s19 }
  0x14   : > { %v368_v0 = vld [vmem:[%s5319_s22 + $0x10] sm:$0xff]  ;;  %v369_v1 = vld [vmem:[%s5319_s22 + $0x18] sm:$0x3]  ;;  %v366_v2 = vld [vmem:[%s5319_s22] sm:$0xff]  ;;  %s6298_s14 = scalar_lea.vmem %s7484_s1, %s4658_s11  ;;  %s5212_s19 = smul.u32 432, %s7687_s15 }
  0x15   : > { %441 = vst.msk [vmem:[#allocation2 + $0x10] sm:$0xff] %vm438_vm0, %v368_v0  ;;  %v367_v3 = vld [vmem:[%s5319_s22 + $0x8] sm:$0xff]  ;;  %439 = vst.msk [vmem:[#allocation2] sm:$0xff] %vm438_vm0, %v366_v2  ;;  %v370_v4 = vld [vmem:[%s5319_s22 + $0x20] sm:$0xff] }
  0x16   : > { %443 = vst.msk [vmem:[#allocation2 + $0x18] sm:$0x3] %vm442_vm1, %v369_v1  ;;  %v371_v5 = vld [vmem:[%s5319_s22 + $0x28] sm:$0xff]  ;;  %v372_v6 = vld [vmem:[%s5319_s22 + $0x30] sm:$0xff]  ;;  %v373_v7 = vld [vmem:[%s5319_s22 + $0x38] sm:$0x3] }
  0x17   : > { %440 = vst.msk [vmem:[#allocation2 + $0x8] sm:$0xff] %vm438_vm0, %v367_v3  ;;  %444 = vst.msk [vmem:[#allocation2 + $0x20] sm:$0xff] %vm438_vm0, %v370_v4  ;;  %v375_v8 = vld [vmem:[%s5319_s22 + $0x48] sm:$0xff]  ;;  %v376_v9 = vld [vmem:[%s5319_s22 + $0x50] sm:$0xff] }
  0x18   : > { %445 = vst.msk [vmem:[#allocation2 + $0x28] sm:$0xff] %vm438_vm0, %v371_v5  ;;  %446 = vst.msk [vmem:[#allocation2 + $0x30] sm:$0xff] %vm438_vm0, %v372_v6  ;;  %v374_v10 = vld [vmem:[%s5319_s22 + $0x40] sm:$0xff]  ;;  %v379_v12 = vld [vmem:[%s5319_s22 + $0x68] sm:$0xff] }
  0x19   : > { %447 = vst.msk [vmem:[#allocation2 + $0x38] sm:$0x3] %vm442_vm1, %v373_v7  ;;  %v378_v11 = vld [vmem:[%s5319_s22 + $0x60] sm:$0xff]  ;;  %v377_v13 = vld [vmem:[%s5319_s22 + $0x58] sm:$0x3]  ;;  %v380_v14 = vld [vmem:[%s5319_s22 + $0x70] sm:$0xff] }
  0x1a   : > { %449 = vst.msk [vmem:[#allocation2 + $0x48] sm:$0xff] %vm438_vm0, %v375_v8  ;;  %450 = vst.msk [vmem:[#allocation2 + $0x50] sm:$0xff] %vm438_vm0, %v376_v9  ;;  %v381_v15 = vld [vmem:[%s5319_s22 + $0x78] sm:$0x3]  ;;  %v383_v16 = vld [vmem:[%s5319_s22 + $0x88] sm:$0xff] }
  0x1b   : > { %448 = vst.msk [vmem:[#allocation2 + $0x40] sm:$0xff] %vm438_vm0, %v374_v10  ;;  %452 = vst.msk [vmem:[#allocation2 + $0x60] sm:$0xff] %vm438_vm0, %v378_v11  ;;  %v384_v17 = vld [vmem:[%s5319_s22 + $0x90] sm:$0xff]  ;;  %v382_v18 = vld [vmem:[%s5319_s22 + $0x80] sm:$0xff] }
  0x1c   : > { %453 = vst.msk [vmem:[#allocation2 + $0x68] sm:$0xff] %vm438_vm0, %v379_v12  ;;  %454 = vst.msk [vmem:[#allocation2 + $0x70] sm:$0xff] %vm438_vm0, %v380_v14  ;;  %v386_v19 = vld [vmem:[%s5319_s22 + $0xa0] sm:$0xff]  ;;  %v387_v20 = vld [vmem:[%s5319_s22 + $0xa8] sm:$0xff] }
  0x1d   : > { %451 = vst.msk [vmem:[#allocation2 + $0x58] sm:$0x3] %vm442_vm1, %v377_v13  ;;  %455 = vst.msk [vmem:[#allocation2 + $0x78] sm:$0x3] %vm442_vm1, %v381_v15  ;;  %v385_v21 = vld [vmem:[%s5319_s22 + $0x98] sm:$0x3] }
  0x1e   : > { %457 = vst.msk [vmem:[#allocation2 + $0x88] sm:$0xff] %vm438_vm0, %v383_v16  ;;  %458 = vst.msk [vmem:[#allocation2 + $0x90] sm:$0xff] %vm438_vm0, %v384_v17  ;;  %v388_v22 = vld [vmem:[%s5319_s22 + $0xb0] sm:$0xff]  ;;  %v389_v23 = vld [vmem:[%s5319_s22 + $0xb8] sm:$0x3] }
  0x1f   : > { %456 = vst.msk [vmem:[#allocation2 + $0x80] sm:$0xff] %vm438_vm0, %v382_v18  ;;  %460 = vst.msk [vmem:[#allocation2 + $0xa0] sm:$0xff] %vm438_vm0, %v386_v19  ;;  %v585_v24 = vld [vmem:[#allocation2 + $0x11] sm:$0xff]  ;;  %v391_v25 = vld [vmem:[%s5319_s22 + $0xc8] sm:$0xff] }
  0x20   : > { %461 = vst.msk [vmem:[#allocation2 + $0xa8] sm:$0xff] %vm438_vm0, %v387_v20  ;;  %462 = vst.msk [vmem:[#allocation2 + $0xb0] sm:$0xff] %vm438_vm0, %v388_v22  ;;  %v392_v26 = vld [vmem:[%s5319_s22 + $0xd0] sm:$0xff]  ;;  %749 = vrot.lane.b32.xlu1 %v585_v24, %s5265_s23  ;;  %v583_v27 = vld [vmem:[#allocation2 + $0x1] sm:$0xff] }
  0x21   : > { %459 = vst.msk [vmem:[#allocation2 + $0x98] sm:$0x3] %vm442_vm1, %v385_v21  ;;  %463 = vst.msk [vmem:[#allocation2 + $0xb8] sm:$0x3] %vm442_vm1, %v389_v23  ;;  %745 = vrot.lane.b32.xlu0 %v583_v27, %s5265_s23  ;;  %v5375_v28 = vld [vmem:[#allocation2 + $0x21] sm:$0xff]  ;;  %v584_v30 = vld [vmem:[#allocation2 + $0x9] sm:$0xff] }
  0x22   : > { %465 = vst.msk [vmem:[#allocation2 + $0xc8] sm:$0xff] %vm438_vm0, %v391_v25  ;;  %466 = vst.msk [vmem:[#allocation2 + $0xd0] sm:$0xff] %vm438_vm0, %v392_v26  ;;  %v390_v29 = vld [vmem:[%s5319_s22 + $0xc0] sm:$0xff]  ;;  %v395_v32 = vld [vmem:[%s5319_s22 + $0xe8] sm:$0xff] }
  0x23   : > { %464 = vst.msk [vmem:[#allocation2 + $0xc0] sm:$0xff] %vm438_vm0, %v390_v29  ;;  %v394_v31 = vld [vmem:[%s5319_s22 + $0xe0] sm:$0xff]  ;;  %v5385_v33 = vld [vmem:[#allocation2 + $0x31] sm:$0xff]  ;;  %469 = vst.msk [vmem:[#allocation2 + $0xe8] sm:$0xff] %vm438_vm0, %v395_v32 }
  0x24   : > { %468 = vst.msk [vmem:[#allocation2 + $0xe0] sm:$0xff] %vm438_vm0, %v394_v31  ;;  %751 = vrot.lane.b32.xlu1 %v5375_v28, %s5265_s23  ;;  %v393_v34 = vld [vmem:[%s5319_s22 + $0xd8] sm:$0x3]  ;;  %v5389_v35 = vld [vmem:[#allocation2 + $0x29] sm:$0xff]  ;;  %v398_v41 = vld [vmem:[%s5319_s22 + $0x100] sm:$0xff] }
  0x25   : > { %747 = vrot.lane.b32.xlu0 %v584_v30, %s5265_s23  ;;  %467 = vst.msk [vmem:[#allocation2 + $0xd8] sm:$0x3] %vm442_vm1, %v393_v34  ;;  %v590_v36 = vld [vmem:[#allocation2 + $0x49] sm:$0xff]  ;;  %v397_v38 = vld [vmem:[%s5319_s22 + $0xf8] sm:$0x3]  ;;  %v5403_v42 = vld [vmem:[#allocation2 + $0x41] sm:$0xff] }
  0x26   : > { %v396_v37 = vld [vmem:[%s5319_s22 + $0xf0] sm:$0xff]  ;;  %471 = vst.msk [vmem:[#allocation2 + $0xf8] sm:$0x3] %vm442_vm1, %v397_v38  ;;  %v399_v39 = vld [vmem:[%s5319_s22 + $0x108] sm:$0xff]  ;;  %v402_v43 = vld [vmem:[%s5319_s22 + $0x120] sm:$0xff] }
  0x27   : > { %470 = vst.msk [vmem:[#allocation2 + $0xf0] sm:$0xff] %vm438_vm0, %v396_v37  ;;  %v400_v40 = vld [vmem:[%s5319_s22 + $0x110] sm:$0xff]  ;;  %473 = vst.msk [vmem:[#allocation2 + $0x108] sm:$0xff] %vm438_vm0, %v399_v39  ;;  %v403_v44 = vld [vmem:[%s5319_s22 + $0x128] sm:$0xff] }
  0x28   : > { %755 = vrot.lane.b32.xlu1 %v5385_v33, %s5265_s23  ;;  %474 = vst.msk [vmem:[#allocation2 + $0x110] sm:$0xff] %vm438_vm0, %v400_v40  ;;  %472 = vst.msk [vmem:[#allocation2 + $0x100] sm:$0xff] %vm438_vm0, %v398_v41  ;;  %v401_v45 = vld [vmem:[%s5319_s22 + $0x118] sm:$0x3]  ;;  %v404_v46 = vld [vmem:[%s5319_s22 + $0x130] sm:$0xff] }
  0x29   : > { %753 = vrot.lane.b32.xlu0 %v5389_v35, %s5265_s23  ;;  %476 = vst.msk [vmem:[#allocation2 + $0x120] sm:$0xff] %vm438_vm0, %v402_v43  ;;  %477 = vst.msk [vmem:[#allocation2 + $0x128] sm:$0xff] %vm438_vm0, %v403_v44  ;;  %v405_v47 = vld [vmem:[%s5319_s22 + $0x138] sm:$0x3]  ;;  %v407_v48 = vld [vmem:[%s5319_s22 + $0x148] sm:$0xff] }
  0x2a   : > { %475 = vst.msk [vmem:[#allocation2 + $0x118] sm:$0x3] %vm442_vm1, %v401_v45  ;;  %479 = vst.msk [vmem:[#allocation2 + $0x138] sm:$0x3] %vm442_vm1, %v405_v47  ;;  %v408_v49 = vld [vmem:[%s5319_s22 + $0x150] sm:$0xff]  ;;  %v406_v50 = vld [vmem:[%s5319_s22 + $0x140] sm:$0xff] }
  0x2b   : > { %478 = vst.msk [vmem:[#allocation2 + $0x130] sm:$0xff] %vm438_vm0, %v404_v46  ;;  %v592_v51 = vld [vmem:[#allocation2 + $0x61] sm:$0xff]  ;;  %481 = vst.msk [vmem:[#allocation2 + $0x148] sm:$0xff] %vm438_vm0, %v407_v48  ;;  %v591_v54 = vld [vmem:[#allocation2 + $0x51] sm:$0xff] }
  0x2c   : > { %759 = vrot.lane.b32.xlu1 %v590_v36, %s5265_s23  ;;  %482 = vst.msk [vmem:[#allocation2 + $0x150] sm:$0xff] %vm438_vm0, %v408_v49  ;;  %480 = vst.msk [vmem:[#allocation2 + $0x140] sm:$0xff] %vm438_vm0, %v406_v50  ;;  %v410_v52 = vld [vmem:[%s5319_s22 + $0x160] sm:$0xff]  ;;  %v411_v53 = vld [vmem:[%s5319_s22 + $0x168] sm:$0xff] }
  0x2d   : > { %757 = vrot.lane.b32.xlu0 %v5403_v42, %s5265_s23  ;;  %484 = vst.msk [vmem:[#allocation2 + $0x160] sm:$0xff] %vm438_vm0, %v410_v52  ;;  %485 = vst.msk [vmem:[#allocation2 + $0x168] sm:$0xff] %vm438_vm0, %v411_v53  ;;  %v409_v55 = vld [vmem:[%s5319_s22 + $0x158] sm:$0x3]  ;;  %v412_v56 = vld [vmem:[%s5319_s22 + $0x170] sm:$0xff] }
  0x2e   : > { %483 = vst.msk [vmem:[#allocation2 + $0x158] sm:$0x3] %vm442_vm1, %v409_v55  ;;  %v413_v57 = vld [vmem:[%s5319_s22 + $0x178] sm:$0x3]  ;;  %v415_v58 = vld [vmem:[%s5319_s22 + $0x188] sm:$0xff]  ;;  %v416_v59 = vld [vmem:[%s5319_s22 + $0x190] sm:$0xff] }
  0x2f   : > { %486 = vst.msk [vmem:[#allocation2 + $0x170] sm:$0xff] %vm438_vm0, %v412_v56  ;;  %489 = vst.msk [vmem:[#allocation2 + $0x188] sm:$0xff] %vm438_vm0, %v415_v58  ;;  %v414_v60 = vld [vmem:[%s5319_s22 + $0x180] sm:$0xff]  ;;  %v594_v62 = vld [vmem:[#allocation2 + $0x71] sm:$0xff] }
  0x30   : > { %487 = vst.msk [vmem:[#allocation2 + $0x178] sm:$0x3] %vm442_vm1, %v413_v57  ;;  %763 = vrot.lane.b32.xlu1 %v592_v51, %s5265_s23  ;;  %v418_v61 = vld [vmem:[%s5319_s22 + $0x1a0] sm:$0xff]  ;;  %v419_v63 = vld [vmem:[%s5319_s22 + $0x1a8] sm:$0xff]  ;;  %v417_v0 = vld [vmem:[%s5319_s22 + $0x198] sm:$0x3] }
  0x31   : > { %490 = vst.msk [vmem:[#allocation2 + $0x190] sm:$0xff] %vm438_vm0, %v416_v59  ;;  %488 = vst.msk [vmem:[#allocation2 + $0x180] sm:$0xff] %vm438_vm0, %v414_v60  ;;  %761 = vrot.lane.b32.xlu0 %v591_v54, %s5265_s23  ;;  %v593_v1 = vld [vmem:[#allocation2 + $0x69] sm:$0xff]  ;;  %v421_v3 = vld [vmem:[%s5319_s22 + $0x1b8] sm:$0x3] }
  0x32   : > { %492 = vst.msk [vmem:[#allocation2 + $0x1a0] sm:$0xff] %vm438_vm0, %v418_v61  ;;  %493 = vst.msk [vmem:[#allocation2 + $0x1a8] sm:$0xff] %vm438_vm0, %v419_v63  ;;  %v420_v2 = vld [vmem:[%s5319_s22 + $0x1b0] sm:$0xff]  ;;  %v423_v4 = vld [vmem:[%s5319_s22 + $0x1c8] sm:$0xff] }
  0x33   : > { %491 = vst.msk [vmem:[#allocation2 + $0x198] sm:$0x3] %vm442_vm1, %v417_v0  ;;  %v596_v5 = vld [vmem:[#allocation2 + $0x89] sm:$0xff]  ;;  %495 = vst.msk [vmem:[#allocation2 + $0x1b8] sm:$0x3] %vm442_vm1, %v421_v3  ;;  %v595_v7 = vld [vmem:[#allocation2 + $0x81] sm:$0xff] }
  0x34   : > { %767 = vrot.lane.b32.xlu1 %v594_v62, %s5265_s23  ;;  %494 = vst.msk [vmem:[#allocation2 + $0x1b0] sm:$0xff] %vm438_vm0, %v420_v2  ;;  %v424_v6 = vld [vmem:[%s5319_s22 + $0x1d0] sm:$0xff]  ;;  %497 = vst.msk [vmem:[#allocation2 + $0x1c8] sm:$0xff] %vm438_vm0, %v423_v4  ;;  %v422_v8 = vld [vmem:[%s5319_s22 + $0x1c0] sm:$0xff] }
  0x35   : > { %765 = vrot.lane.b32.xlu0 %v593_v1, %s5265_s23  ;;  %498 = vst.msk [vmem:[#allocation2 + $0x1d0] sm:$0xff] %vm438_vm0, %v424_v6  ;;  %496 = vst.msk [vmem:[#allocation2 + $0x1c0] sm:$0xff] %vm438_vm0, %v422_v8  ;;  %v426_v9 = vld [vmem:[%s5319_s22 + $0x1e0] sm:$0xff]  ;;  %v427_v10 = vld [vmem:[%s5319_s22 + $0x1e8] sm:$0xff] }
  0x36   : > { %500 = vst.msk [vmem:[#allocation2 + $0x1e0] sm:$0xff] %vm438_vm0, %v426_v9  ;;  %501 = vst.msk [vmem:[#allocation2 + $0x1e8] sm:$0xff] %vm438_vm0, %v427_v10  ;;  %v425_v11 = vld [vmem:[%s5319_s22 + $0x1d8] sm:$0x3]  ;;  %v428_v12 = vld [vmem:[%s5319_s22 + $0x1f0] sm:$0xff] }
  0x37   : > { %v429_v13 = vld [vmem:[%s5319_s22 + $0x1f8] sm:$0x3]  ;;  %v598_v14 = vld [vmem:[#allocation2 + $0xa1] sm:$0xff]  ;;  %499 = vst.msk [vmem:[#allocation2 + $0x1d8] sm:$0x3] %vm442_vm1, %v425_v11  ;;  %v432_v17 = vld [vmem:[%s5319_s22 + $0x210] sm:$0xff] }
  0x38   : > { %771 = vrot.lane.b32.xlu1 %v596_v5, %s5265_s23  ;;  %v597_v15 = vld [vmem:[#allocation2 + $0x91] sm:$0xff]  ;;  %502 = vst.msk [vmem:[#allocation2 + $0x1f0] sm:$0xff] %vm438_vm0, %v428_v12  ;;  %v431_v16 = vld [vmem:[%s5319_s22 + $0x208] sm:$0xff]  ;;  %v430_v18 = vld [vmem:[%s5319_s22 + $0x200] sm:$0xff] }
  0x39   : > { %769 = vrot.lane.b32.xlu0 %v595_v7, %s5265_s23  ;;  %503 = vst.msk [vmem:[#allocation2 + $0x1f8] sm:$0x3] %vm442_vm1, %v429_v13  ;;  %v434_v19 = vld [vmem:[%s5319_s22 + $0x220] sm:$0xff]  ;;  %v435_v20 = vld [vmem:[%s5319_s22 + $0x228] sm:$0xff]  ;;  %v433_v21 = vld [vmem:[%s5319_s22 + $0x218] sm:$0x3] }
  0x3a   : > { %505 = vst.msk [vmem:[#allocation2 + $0x208] sm:$0xff] %vm438_vm0, %v431_v16  ;;  %506 = vst.msk [vmem:[#allocation2 + $0x210] sm:$0xff] %vm438_vm0, %v432_v17  ;;  %v436_v22 = vld [vmem:[%s5319_s22 + $0x230] sm:$0xff]  ;;  %v437_v23 = vld [vmem:[%s5319_s22 + $0x238] sm:$0x3] }
  0x3b   : > { %504 = vst.msk [vmem:[#allocation2 + $0x200] sm:$0xff] %vm438_vm0, %v430_v18  ;;  %508 = vst.msk [vmem:[#allocation2 + $0x220] sm:$0xff] %vm438_vm0, %v434_v19  ;;  %v600_v24 = vld [vmem:[#allocation2 + $0xb1] sm:$0xff]  ;;  %v599_v25 = vld [vmem:[#allocation2 + $0xa9] sm:$0xff] }
  0x3c   : > { %775 = vrot.lane.b32.xlu1 %v598_v14, %s5265_s23  ;;  %509 = vst.msk [vmem:[#allocation2 + $0x228] sm:$0xff] %vm438_vm0, %v435_v20  ;;  %510 = vst.msk [vmem:[#allocation2 + $0x230] sm:$0xff] %vm438_vm0, %v436_v22  ;;  %v602_v26 = vld [vmem:[#allocation2 + $0xc9] sm:$0xff]  ;;  %v601_v27 = vld [vmem:[#allocation2 + $0xc1] sm:$0xff] }
  0x3d   : > { %507 = vst.msk [vmem:[#allocation2 + $0x218] sm:$0x3] %vm442_vm1, %v433_v21  ;;  %773 = vrot.lane.b32.xlu0 %v597_v15, %s5265_s23  ;;  %511 = vst.msk [vmem:[#allocation2 + $0x238] sm:$0x3] %vm442_vm1, %v437_v23  ;;  %v604_v29 = vld [vmem:[#allocation2 + $0xe1] sm:$0xff]  ;;  %v603_v30 = vld [vmem:[#allocation2 + $0xd1] sm:$0xff] }
  0x3e   : > { %v606_v31 = vld [vmem:[#allocation2 + $0xf1] sm:$0xff]  ;;  %v605_v32 = vld [vmem:[#allocation2 + $0xe9] sm:$0xff]  ;;  %v607_v36 = vld [vmem:[#allocation2 + $0x101] sm:$0xff] }
  0x3f   : > { %v608_v34 = vld [vmem:[#allocation2 + $0x109] sm:$0xff]  ;;  %v610_v37 = vld [vmem:[#allocation2 + $0x121] sm:$0xff]  ;;  %v609_v38 = vld [vmem:[#allocation2 + $0x111] sm:$0xff] }
  0x40   : > { %779 = vrot.lane.b32.xlu1 %v600_v24, %s5265_s23  ;;  %v612_v39 = vld [vmem:[#allocation2 + $0x131] sm:$0xff]  ;;  %v611_v40 = vld [vmem:[#allocation2 + $0x129] sm:$0xff]  ;;  %v613_v43 = vld [vmem:[#allocation2 + $0x141] sm:$0xff] }
  0x41   : > { %777 = vrot.lane.b32.xlu0 %v599_v25, %s5265_s23  ;;  %v614_v41 = vld [vmem:[#allocation2 + $0x149] sm:$0xff]  ;;  %v616_v44 = vld [vmem:[#allocation2 + $0x161] sm:$0xff]  ;;  %v615_v45 = vld [vmem:[#allocation2 + $0x151] sm:$0xff] }
  0x42   : > { %v618_v46 = vld [vmem:[#allocation2 + $0x171] sm:$0xff]  ;;  %v617_v47 = vld [vmem:[#allocation2 + $0x169] sm:$0xff]  ;;  %v619_v49 = vld [vmem:[#allocation2 + $0x181] sm:$0xff] }
  0x43   : > { %v620_v48 = vld [vmem:[#allocation2 + $0x189] sm:$0xff]  ;;  %v622_v50 = vld [vmem:[#allocation2 + $0x1a1] sm:$0xff]  ;;  %v621_v51 = vld [vmem:[#allocation2 + $0x191] sm:$0xff] }
  0x44   : > { %783 = vrot.lane.b32.xlu1 %v602_v26, %s5265_s23  ;;  %v624_v52 = vld [vmem:[#allocation2 + $0x1b1] sm:$0xff]  ;;  %v623_v53 = vld [vmem:[#allocation2 + $0x1a9] sm:$0xff]  ;;  %v625_v55 = vld [vmem:[#allocation2 + $0x1c1] sm:$0xff] }
  0x45   : > { %781 = vrot.lane.b32.xlu0 %v601_v27, %s5265_s23  ;;  %v626_v54 = vld [vmem:[#allocation2 + $0x1c9] sm:$0xff]  ;;  %v628_v56 = vld [vmem:[#allocation2 + $0x1e1] sm:$0xff]  ;;  %v627_v57 = vld [vmem:[#allocation2 + $0x1d1] sm:$0xff] }
  0x46   : > { %v630_v58 = vld [vmem:[#allocation2 + $0x1f1] sm:$0xff]  ;;  %v629_v59 = vld [vmem:[#allocation2 + $0x1e9] sm:$0xff]  ;;  %v1232_v60 = vld [vmem:[%s7485_s2] sm:$0xff] }
  0x47   : > { %v1233_v61 = vld [vmem:[%s7485_s2 + $0x8] sm:$0xf]  ;;  %v633_v3 = vld [vmem:[#allocation2 + $0x211] sm:$0xff] }
  0x48   : > { %787 = vrot.lane.b32.xlu1 %v604_v29, %s5265_s23  ;;  %v5530_v62 = vpack.c.bf16 %v1233_v61, %v1232_v60  ;;  %v632_v63 = vld [vmem:[#allocation2 + $0x209] sm:$0xff]  ;;  %v631_v1 = vld [vmem:[#allocation2 + $0x201] sm:$0xff]  ;;  %v636_v4 = vld [vmem:[#allocation2 + $0x231] sm:$0xff] }
  0x49   : > { %785 = vrot.lane.b32.xlu0 %v603_v30, %s5265_s23  ;;  %v634_v2 = vld [vmem:[#allocation2 + $0x221] sm:$0xff]  ;;  %v635_v5 = vld [vmem:[#allocation2 + $0x229] sm:$0xff]  ;;  %v639_v9 = vld [vmem:[#allocation2 + $0x12] sm:$0xff] }
  0x4a   : > { %5090 = vmatprep.subr.msk.bf16.mxu0 %vm5533_vm4, %v5530_v62  ;;  %v638_v6 = vld [vmem:[#allocation2 + $0xa] sm:$0xff]  ;;  %v637_v7 = vld [vmem:[#allocation2 + $0x2] sm:$0xff]  ;;  %v5556_v10 = vld [vmem:[#allocation2 + $0x32] sm:$0xff] }
  0x4b   : > { %5093 = vmatpush3.bf16.msk.msra.mxu0 %vm5533_vm4, %v5530_v62  ;;  %v5551_v8 = vld [vmem:[#allocation2 + $0x22] sm:$0xff]  ;;  %v5560_v12 = vld [vmem:[#allocation2 + $0x2a] sm:$0xff]  ;;  %v5584_v20 = vld [vmem:[#allocation2 + $0x52] sm:$0xff] }
  0x4c   : > { %791 = vrot.lane.b32.xlu1 %v606_v31, %s5265_s23  ;;  %v5568_v14 = vld [vmem:[#allocation2 + $0x4a] sm:$0xff]  ;;  %v5572_v16 = vld [vmem:[#allocation2 + $0x42] sm:$0xff]  ;;  %v5592_v22 = vld [vmem:[#allocation2 + $0x72] sm:$0xff] }
  0x4d   : > { %789 = vrot.lane.b32.xlu0 %v605_v32, %s5265_s23  ;;  %v5580_v18 = vld [vmem:[#allocation2 + $0x62] sm:$0xff]  ;;  %v5596_v24 = vld [vmem:[#allocation2 + $0x6a] sm:$0xff]  ;;  %v5692_v60 = vld [vmem:[#allocation2 + $0x112] sm:$0xff] }
  0x4e   : > { %v5604_v26 = vld [vmem:[#allocation2 + $0x8a] sm:$0xff]  ;;  %v5608_v29 = vld [vmem:[#allocation2 + $0x82] sm:$0xff]  ;;  %7525 = vst [vmem:[#allocation8_spill] sm:$0xff] %v5692_v60 }
  0x4f   : > { %v5616_v31 = vld [vmem:[#allocation2 + $0xa2] sm:$0xff] }
  0x50   : > { %795 = vrot.lane.b32.xlu1 %v608_v34, %s5265_s23  ;;  %v5620_v34 = vld [vmem:[#allocation2 + $0x92] sm:$0xff]  ;;  %v6207_v0 = vld [vmem:[#allocation2 + $0x48] sm:$0xff] }
  0x51   : > { %793 = vrot.lane.b32.xlu0 %v607_v36, %s5265_s23 }
  0x54   : > { %799 = vrot.lane.b32.xlu1 %v610_v37, %s5265_s23  ;;  %v5628_v37 = vld [vmem:[#allocation2 + $0xb2] sm:$0xff] }
  0x55   : > { %797 = vrot.lane.b32.xlu0 %v609_v38, %s5265_s23 }
  0x58   : > { %803 = vrot.lane.b32.xlu1 %v612_v39, %s5265_s23  ;;  %v5632_v39 = vld [vmem:[#allocation2 + $0xaa] sm:$0xff] }
  0x59   : > { %801 = vrot.lane.b32.xlu0 %v611_v40, %s5265_s23 }
  0x5c   : > { %807 = vrot.lane.b32.xlu1 %v614_v41, %s5265_s23  ;;  %v5640_v41 = vld [vmem:[#allocation2 + $0xca] sm:$0xff] }
  0x5d   : > { %805 = vrot.lane.b32.xlu0 %v613_v43, %s5265_s23 }
  0x60   : > { %811 = vrot.lane.b32.xlu1 %v616_v44, %s5265_s23  ;;  %v5644_v44 = vld [vmem:[#allocation2 + $0xc2] sm:$0xff] }
  0x61   : > { %809 = vrot.lane.b32.xlu0 %v615_v45, %s5265_s23 }
  0x64   : > { %815 = vrot.lane.b32.xlu1 %v618_v46, %s5265_s23  ;;  %v5652_v46 = vld [vmem:[#allocation2 + $0xe2] sm:$0xff] }
  0x65   : > { %813 = vrot.lane.b32.xlu0 %v617_v47, %s5265_s23 }
  0x68   : > { %819 = vrot.lane.b32.xlu1 %v620_v48, %s5265_s23  ;;  %v5656_v48 = vld [vmem:[#allocation2 + $0xd2] sm:$0xff] }
  0x69   : > { %817 = vrot.lane.b32.xlu0 %v619_v49, %s5265_s23 }
  0x6c   : > { %823 = vrot.lane.b32.xlu1 %v622_v50, %s5265_s23  ;;  %v5664_v50 = vld [vmem:[#allocation2 + $0xf2] sm:$0xff] }
  0x6d   : > { %821 = vrot.lane.b32.xlu0 %v621_v51, %s5265_s23  ;;  %7520 = vst [vmem:[#allocation3_spill] sm:$0xff] %v5664_v50 }
  0x70   : > { %827 = vrot.lane.b32.xlu1 %v624_v52, %s5265_s23  ;;  %v5668_v52 = vld [vmem:[#allocation2 + $0xea] sm:$0xff] }
  0x71   : > { %825 = vrot.lane.b32.xlu0 %v623_v53, %s5265_s23  ;;  %7521 = vst [vmem:[#allocation4_spill] sm:$0xff] %v5668_v52 }
  0x74   : > { %831 = vrot.lane.b32.xlu1 %v626_v54, %s5265_s23  ;;  %v5676_v54 = vld [vmem:[#allocation2 + $0x10a] sm:$0xff] }
  0x75   : > { %829 = vrot.lane.b32.xlu0 %v625_v55, %s5265_s23  ;;  %7522 = vst [vmem:[#allocation5_spill] sm:$0xff] %v5676_v54 }
  0x78   : > { %835 = vrot.lane.b32.xlu1 %v628_v56, %s5265_s23  ;;  %v5680_v56 = vld [vmem:[#allocation2 + $0x102] sm:$0xff] }
  0x79   : > { %833 = vrot.lane.b32.xlu0 %v627_v57, %s5265_s23  ;;  %7523 = vst [vmem:[#allocation6_spill] sm:$0xff] %v5680_v56 }
  0x7c   : > { %839 = vrot.lane.b32.xlu1 %v630_v58, %s5265_s23  ;;  %v5688_v58 = vld [vmem:[#allocation2 + $0x122] sm:$0xff] }
  0x7d   : > { %837 = vrot.lane.b32.xlu0 %v629_v59, %s5265_s23  ;;  %7524 = vst [vmem:[#allocation7_spill] sm:$0xff] %v5688_v58 }
  0x80   : > { %843 = vrot.lane.b32.xlu1 %v632_v63, %s5265_s23  ;;  %v5700_v63 = vld [vmem:[#allocation2 + $0x132] sm:$0xff] }
  0x81   : > { %841 = vrot.lane.b32.xlu0 %v631_v1, %s5265_s23  ;;  %7526 = vst [vmem:[#allocation9_spill] sm:$0xff] %v5700_v63 }
  0x84   : > { %847 = vrot.lane.b32.xlu1 %v634_v2, %s5265_s23  ;;  %v5704_v2 = vld [vmem:[#allocation2 + $0x12a] sm:$0xff] }
  0x85   : > { %845 = vrot.lane.b32.xlu0 %v633_v3, %s5265_s23  ;;  %7527 = vst [vmem:[#allocation10_spill] sm:$0xff] %v5704_v2 }
  0x88   : > { %851 = vrot.lane.b32.xlu1 %v636_v4, %s5265_s23  ;;  %v5712_v4 = vld [vmem:[#allocation2 + $0x14a] sm:$0xff] }
  0x89   : > { %849 = vrot.lane.b32.xlu0 %v635_v5, %s5265_s23  ;;  %7528 = vst [vmem:[#allocation11_spill] sm:$0xff] %v5712_v4 }
  0x8c   : > { %963 = vrot.lane.b32.xlu1 %v638_v6, %s5267_s28  ;;  %v5716_v6 = vld [vmem:[#allocation2 + $0x142] sm:$0xff] }
  0x8d   : > { %961 = vrot.lane.b32.xlu0 %v637_v7, %s5267_s28  ;;  %7529 = vst [vmem:[#allocation12_spill] sm:$0xff] %v5716_v6 }
  0x90   : > { %967 = vrot.lane.b32.xlu1 %v5551_v8, %s5267_s28 }
  0x91   : > { %965 = vrot.lane.b32.xlu0 %v639_v9, %s5267_s28  ;;  %v5724_v9 = vld [vmem:[#allocation2 + $0x162] sm:$0xff] }
  0x92   : > { %v5558_v11 = vpop.permute.xlu1 %749  ;;  %7530 = vst [vmem:[#allocation13_spill] sm:$0xff] %v5724_v9 }
  0x93   : > { %v5562_v13 = vpop.permute.xlu0 %745 }
  0x94   : > { %971 = vrot.lane.b32.xlu1 %v5556_v10, %s5267_s28 }
  0x95   : > { %969 = vrot.lane.b32.xlu0 %v5560_v12, %s5267_s28 }
  0x96   : > { %v5570_v15 = vpop.permute.xlu1 %751 }
  0x97   : > { %v5574_v17 = vpop.permute.xlu0 %747 }
  0x98   : > { %975 = vrot.lane.b32.xlu1 %v5568_v14, %s5267_s28 }
  0x99   : > { %973 = vrot.lane.b32.xlu0 %v5572_v16, %s5267_s28 }
  0x9a   : > { %v5582_v19 = vpop.permute.xlu1 %755 }
  0x9b   : > { %v5586_v21 = vpop.permute.xlu0 %753 }
  0x9c   : > { %979 = vrot.lane.b32.xlu1 %v5580_v18, %s5267_s28 }
  0x9d   : > { %977 = vrot.lane.b32.xlu0 %v5584_v20, %s5267_s28 }
  0x9e   : > { %v5594_v23 = vpop.permute.xlu1 %759 }
  0x9f   : > { %v5598_v25 = vpop.permute.xlu0 %757 }
  0xa0   : > { %983 = vrot.lane.b32.xlu1 %v5592_v22, %s5267_s28 }
  0xa1   : > { %981 = vrot.lane.b32.xlu0 %v5596_v24, %s5267_s28 }
  0xa2   : > { %v5606_v27 = vpop.permute.xlu1 %763 }
  0xa3   : > { %v5610_v30 = vpop.permute.xlu0 %761 }
  0xa4   : > { %987 = vrot.lane.b32.xlu1 %v5604_v26, %s5267_s28 }
  0xa5   : > { %985 = vrot.lane.b32.xlu0 %v5608_v29, %s5267_s28 }
  0xa6   : > { %v5618_v32 = vpop.permute.xlu1 %767 }
  0xa7   : > { %v5622_v36 = vpop.permute.xlu0 %765 }
  0xa8   : > { %991 = vrot.lane.b32.xlu1 %v5616_v31, %s5267_s28 }
  0xa9   : > { %989 = vrot.lane.b32.xlu0 %v5620_v34, %s5267_s28 }
  0xaa   : > { %v5630_v38 = vpop.permute.xlu1 %771 }
  0xab   : > { %v5634_v40 = vpop.permute.xlu0 %769 }
  0xac   : > { %995 = vrot.lane.b32.xlu1 %v5628_v37, %s5267_s28 }
  0xad   : > { %993 = vrot.lane.b32.xlu0 %v5632_v39, %s5267_s28 }
  0xae   : > { %v5642_v43 = vpop.permute.xlu1 %775 }
  0xaf   : > { %v5646_v45 = vpop.permute.xlu0 %773 }
  0xb0   : > { %999 = vrot.lane.b32.xlu1 %v5640_v41, %s5267_s28 }
  0xb1   : > { %997 = vrot.lane.b32.xlu0 %v5644_v44, %s5267_s28 }
  0xb2   : > { %v5654_v47 = vpop.permute.xlu1 %779 }
  0xb3   : > { %v5658_v49 = vpop.permute.xlu0 %777 }
  0xb4   : > { %1003 = vrot.lane.b32.xlu1 %v5652_v46, %s5267_s28 }
  0xb5   : > { %1001 = vrot.lane.b32.xlu0 %v5656_v48, %s5267_s28 }
  0xb6   : > { %v5666_v51 = vpop.permute.xlu1 %783 }
  0xb7   : > { %v5670_v53 = vpop.permute.xlu0 %781 }
  0xb8   : > { %1007 = vrot.lane.b32.xlu1 %v5664_v50, %s5267_s28  ;;  %v679_v50 = vld [vmem:[#allocation2 + $0x1c2] sm:$0xff] }
  0xb9   : > { %1005 = vrot.lane.b32.xlu0 %v5668_v52, %s5267_s28 }
  0xba   : > { %v5678_v55 = vpop.permute.xlu1 %787 }
  0xbb   : > { %v5682_v57 = vpop.permute.xlu0 %785 }
  0xbc   : > { %1011 = vrot.lane.b32.xlu1 %v5676_v54, %s5267_s28  ;;  %v5740_v54 = vld [vmem:[#allocation2 + $0x16a] sm:$0xff] }
  0xbd   : > { %1009 = vrot.lane.b32.xlu0 %v5680_v56, %s5267_s28  ;;  %7536 = vst [vmem:[#allocation19_spill] sm:$0xff] %v5740_v54  ;;  %v677_v56 = vld [vmem:[#allocation2 + $0x1aa] sm:$0xff] }
  0xbe   : > { %v5690_v59 = vpop.permute.xlu1 %791 }
  0xbf   : > { %v5694_v61 = vpop.permute.xlu0 %789 }
  0xc0   : > { %1015 = vrot.lane.b32.xlu1 %v5688_v58, %s5267_s28  ;;  %v5728_v58 = vld [vmem:[#allocation2 + $0x152] sm:$0xff] }
  0xc1   : > { %1013 = vrot.lane.b32.xlu0 %v5692_v60, %s5267_s28  ;;  %7532 = vst [vmem:[#allocation15_spill] sm:$0xff] %v5728_v58  ;;  %v5736_v60 = vld [vmem:[#allocation2 + $0x172] sm:$0xff] }
  0xc2   : > { %v5702_v1 = vpop.permute.xlu1 %795  ;;  %7534 = vst [vmem:[#allocation17_spill] sm:$0xff] %v5736_v60 }
  0xc3   : > { %v5706_v3 = vpop.permute.xlu0 %793 }
  0xc4   : > { %1019 = vrot.lane.b32.xlu1 %v5700_v63, %s5267_s28 }
  0xc5   : > { %1017 = vrot.lane.b32.xlu0 %v5704_v2, %s5267_s28 }
  0xc6   : > { %v5714_v5 = vpop.permute.xlu1 %799 }
  0xc7   : > { %v5718_v7 = vpop.permute.xlu0 %797 }
  0xc8   : > { %1023 = vrot.lane.b32.xlu1 %v5712_v4, %s5267_s28 }
  0xc9   : > { %1021 = vrot.lane.b32.xlu0 %v5716_v6, %s5267_s28 }
  0xca   : > { %v5726_v63 = vpop.permute.xlu1 %803 }
  0xcb   : > { %7531 = vst [vmem:[#allocation14_spill] sm:$0xff] %v5726_v63  ;;  %v5730_v2 = vpop.permute.xlu0 %801  ;;  %v5748_v63 = vld [vmem:[#allocation2 + $0x18a] sm:$0xff] }
  0xcc   : > { %7533 = vst [vmem:[#allocation16_spill] sm:$0xff] %v5730_v2  ;;  %1027 = vrot.lane.b32.xlu1 %v5724_v9, %s5267_s28  ;;  %7538 = vst [vmem:[#allocation21_spill] sm:$0xff] %v5748_v63  ;;  %v5752_v9 = vld [vmem:[#allocation2 + $0x182] sm:$0xff] }
  0xcd   : > { %1025 = vrot.lane.b32.xlu0 %v5728_v58, %s5267_s28  ;;  %7540 = vst [vmem:[#allocation23_spill] sm:$0xff] %v5752_v9 }
  0xce   : > { %v5738_v4 = vpop.permute.xlu1 %807 }
  0xcf   : > { %7535 = vst [vmem:[#allocation18_spill] sm:$0xff] %v5738_v4  ;;  %v5742_v6 = vpop.permute.xlu0 %805  ;;  %v676_v4 = vld [vmem:[#allocation2 + $0x1a2] sm:$0xff] }
  0xd0   : > { %7537 = vst [vmem:[#allocation20_spill] sm:$0xff] %v5742_v6  ;;  %1031 = vrot.lane.b32.xlu1 %v5736_v60, %s5267_s28  ;;  %v5762_v60 = vld [vmem:[#allocation2 + $0x192] sm:$0xff] }
  0xd1   : > { %1029 = vrot.lane.b32.xlu0 %v5740_v54, %s5267_s28  ;;  %7543 = vst [vmem:[#allocation26_spill] sm:$0xff] %v5762_v60 }
  0xd2   : > { %v5750_v2 = vpop.permute.xlu1 %811 }
  0xd3   : > { %7539 = vst [vmem:[#allocation22_spill] sm:$0xff] %v5750_v2  ;;  %v5754_v58 = vpop.permute.xlu0 %809  ;;  %v678_v2 = vld [vmem:[#allocation2 + $0x1b2] sm:$0xff] }
  0xd4   : > { %7541 = vst [vmem:[#allocation24_spill] sm:$0xff] %v5754_v58  ;;  %1035 = vrot.lane.b32.xlu1 %v5748_v63, %s5267_s28 }
  0xd5   : > { %1033 = vrot.lane.b32.xlu0 %v5752_v9, %s5267_s28 }
  0xd6   : > { %v5760_v6 = vpop.permute.xlu1 %815 }
  0xd7   : > { %7542 = vst [vmem:[#allocation25_spill] sm:$0xff] %v5760_v6  ;;  %v5764_v54 = vpop.permute.xlu0 %813  ;;  %v680_v6 = vld [vmem:[#allocation2 + $0x1ca] sm:$0xff] }
  0xd8   : > { %7544 = vst [vmem:[#allocation27_spill] sm:$0xff] %v5764_v54  ;;  %1039 = vrot.lane.b32.xlu1 %v676_v4, %s5267_s28  ;;  %v682_v4 = vld [vmem:[#allocation2 + $0x1e2] sm:$0xff] }
  0xd9   : > { %1037 = vrot.lane.b32.xlu0 %v5762_v60, %s5267_s28 }
  0xda   : > { %v5769_v58 = vpop.permute.xlu1 %819 }
  0xdb   : > { %7545 = vst [vmem:[#allocation28_spill] sm:$0xff] %v5769_v58  ;;  %v5771_v63 = vpop.permute.xlu0 %817  ;;  %v681_v58 = vld [vmem:[#allocation2 + $0x1d2] sm:$0xff] }
  0xdc   : > { %7546 = vst [vmem:[#allocation29_spill] sm:$0xff] %v5771_v63  ;;  %1043 = vrot.lane.b32.xlu1 %v678_v2, %s5267_s28 }
  0xdd   : > { %1041 = vrot.lane.b32.xlu0 %v677_v56, %s5267_s28  ;;  %v684_v56 = vld [vmem:[#allocation2 + $0x1f2] sm:$0xff] }
  0xde   : > { %v5775_v9 = vpop.permute.xlu1 %823 }
  0xdf   : > { %7547 = vst [vmem:[#allocation30_spill] sm:$0xff] %v5775_v9  ;;  %v5777_v54 = vpop.permute.xlu0 %821  ;;  %v683_v9 = vld [vmem:[#allocation2 + $0x1ea] sm:$0xff] }
  0xe0   : > { %7548 = vst [vmem:[#allocation31_spill] sm:$0xff] %v5777_v54  ;;  %1047 = vrot.lane.b32.xlu1 %v680_v6, %s5267_s28  ;;  %v6406_v54 = vld [vmem:[#allocation2 + $0x100] sm:$0xff] }
  0xe1   : > { %1045 = vrot.lane.b32.xlu0 %v679_v50, %s5267_s28  ;;  %v686_v50 = vld [vmem:[#allocation2 + $0x20a] sm:$0xff] }
  0xe2   : > { %v5781_v60 = vpop.permute.xlu1 %827 }
  0xe3   : > { %7549 = vst [vmem:[#allocation32_spill] sm:$0xff] %v5781_v60  ;;  %v5783_v52 = vpop.permute.xlu0 %825  ;;  %v685_v60 = vld [vmem:[#allocation2 + $0x202] sm:$0xff] }
  0xe4   : > { %7550 = vst [vmem:[#allocation33_spill] sm:$0xff] %v5783_v52  ;;  %1051 = vrot.lane.b32.xlu1 %v682_v4, %s5267_s28  ;;  %v4485_v4 = vld [vmem:[%s7485_s2 + $0x10] sm:$0xff] }
  0xe5   : > { %1049 = vrot.lane.b32.xlu0 %v681_v58, %s5267_s28  ;;  %v4486_v58 = vld [vmem:[%s7485_s2 + $0x18] sm:$0xf] }
  0xe6   : > { %v5787_v2 = vpop.permute.xlu1 %831  ;;  %v5082_v52 = vpack.c.bf16 %v4486_v58, %v4485_v4 }
  0xe7   : > { %7551 = vst [vmem:[#allocation34_spill] sm:$0xff] %v5787_v2  ;;  %v5789_v63 = vpop.permute.xlu0 %829 }
  0xe8   : > { %7552 = vst [vmem:[#allocation35_spill] sm:$0xff] %v5789_v63  ;;  %1055 = vrot.lane.b32.xlu1 %v684_v56, %s5267_s28  ;;  %5084 = vmatprep.subr.msk.bf16.mxu1 %vm5533_vm4, %v5082_v52 }
  0xe9   : > { %1053 = vrot.lane.b32.xlu0 %v683_v9, %s5267_s28  ;;  %v688_v9 = vld [vmem:[#allocation2 + $0x222] sm:$0xff]  ;;  %5087 = vmatpush3.bf16.msk.msra.mxu1 %vm5533_vm4, %v5082_v52 }
  0xea   : > { %v5793_v6 = vpop.permute.xlu1 %835  ;;  %5100 = vmatprep.subr.msk.bf16.mxu1 %vm5533_vm4, %v5530_v62 }
  0xeb   : > { %7553 = vst [vmem:[#allocation36_spill] sm:$0xff] %v5793_v6  ;;  %v5801_v2 = vpop.permute.xlu0 %833  ;;  %v687_v6 = vld [vmem:[#allocation2 + $0x212] sm:$0xff] }
  0xec   : > { %7554 = vst [vmem:[#allocation37_spill] sm:$0xff] %v5801_v2  ;;  %1059 = vrot.lane.b32.xlu1 %v686_v50, %s5267_s28  ;;  %v689_v50 = vld [vmem:[#allocation2 + $0x22a] sm:$0xff]  ;;  %v3060_v2 = vld [vmem:[#allocation2 + $0xa2] sm:$0xff] }
  0xed   : > { %1057 = vrot.lane.b32.xlu0 %v685_v60, %s5267_s28 }
  0xee   : > { %v5807_v56 = vpop.permute.xlu1 %839 }
  0xef   : > { %7555 = vst [vmem:[#allocation38_spill] sm:$0xff] %v5807_v56  ;;  %v5811_v63 = vpop.permute.xlu0 %837  ;;  %v6261_v56 = vld [vmem:[#allocation2 + $0x80] sm:$0xff] }
  0xf0   : > { %7556 = vst [vmem:[#allocation39_spill] sm:$0xff] %v5811_v63  ;;  %1063 = vrot.lane.b32.xlu1 %v688_v9, %s5267_s28  ;;  %v530_v9 = vld [vmem:[#allocation2 + $0x8] sm:$0xff] }
  0xf1   : > { %1061 = vrot.lane.b32.xlu0 %v687_v6, %s5267_s28  ;;  %v3058_v63 = vld [vmem:[#allocation2 + $0x8a] sm:$0xff] }
  0xf2   : > { %v5818_v60 = vpop.permute.xlu1 %843 }
  0xf3   : > { %7557 = vst [vmem:[#allocation40_spill] sm:$0xff] %v5818_v60  ;;  %v5820_v4 = vpop.permute.xlu0 %841 }
  0xf4   : > { %7558 = vst [vmem:[#allocation41_spill] sm:$0xff] %v5820_v4  ;;  %1451 = vrot.lane.b32.xlu1 %v5375_v28, %s5265_s23  ;;  %v529_v4 = vld [vmem:[#allocation2] sm:$0xff]  ;;  %v1124_v28 = vsel %vm438_vm0, %v530_v9, %v5574_v17 }
  0xf5   : > { %1065 = vrot.lane.b32.xlu0 %v689_v50, %s5267_s28  ;;  %v5845_v50 = vld [vmem:[#allocation2 + $0x20] sm:$0xff] }
  0xf6   : > { %v5825_v52 = vpop.permute.xlu1 %847 }
  0xf7   : > { %7559 = vst [vmem:[#allocation42_spill] sm:$0xff] %v5825_v52  ;;  %v5827_v58 = vpop.permute.xlu0 %845  ;;  %v531_v52 = vld [vmem:[#allocation2 + $0x10] sm:$0xff] }
  0xf8   : > { %7560 = vst [vmem:[#allocation43_spill] sm:$0xff] %v5827_v58  ;;  %1667 = vrot.lane.b32.xlu1 %v5551_v8, %s5267_s28 }
  0xf9   : > { %1453 = vrot.lane.b32.xlu0 %v5389_v35, %s5265_s23  ;;  %v1123_v35 = vsel %vm438_vm0, %v529_v4, %v5562_v13  ;;  %v1126_v13 = vsel %vm438_vm0, %v5845_v50, %v5570_v15  ;;  %v1125_v4 = vsel %vm438_vm0, %v531_v52, %v5558_v11  ;;  %v5874_v52 = vld [vmem:[#allocation2 + $0x51] sm:$0xff] }
  0xfa   : > { %v5833_v6 = vpop.permute.xlu1 %851 }
  0xfb   : > { %7561 = vst [vmem:[#allocation44_spill] sm:$0xff] %v5833_v6  ;;  %v5835_v60 = vpop.permute.xlu0 %849 }
  0xfc   : > { %7562 = vst [vmem:[#allocation45_spill] sm:$0xff] %v5835_v60  ;;  %1455 = vrot.lane.b32.xlu1 %v5385_v33, %s5265_s23 }
  0xfd   : > { %1669 = vrot.lane.b32.xlu0 %v5560_v12, %s5267_s28  ;;  %v5854_v12 = vld [vmem:[#allocation2 + $0x49] sm:$0xff] }
  0xfe   : > { %v964_v8 = vpop.permute.xlu1 %963 }
  0xff   : > { %v1179_v6 = vsel %vm1177_vm5, %v1124_v28, %v964_v8  ;;  %v962_v60 = vpop.permute.xlu0 %961  ;;  %v5863_v28 = vld [vmem:[#allocation2 + $0x28] sm:$0xff] }
 0x100   : > { %1671 = vrot.lane.b32.xlu1 %v5556_v10, %s5267_s28  ;;  %v1178_v33 = vsel %vm1177_vm5, %v1123_v35, %v962_v60  ;;  %v534_v10 = vld [vmem:[#allocation2 + $0x30] sm:$0xff]  ;;  %v536_v8 = vld [vmem:[#allocation2 + $0x48] sm:$0xff] }
 0x101   : > { %1457 = vrot.lane.b32.xlu0 %v5403_v42, %s5265_s23  ;;  %4916 = vmatprep.mubr.msk.f32.mxu0 %vm1940_vm6, %v1178_v33  ;;  %v1128_v15 = vsel %vm438_vm0, %v534_v10, %v5582_v19  ;;  %v5886_v19 = vld [vmem:[#allocation2 + $0x61] sm:$0xff] }
 0x102   : > { %4917 = vmatmul.mubr.msk.f32.vlgmr.msra.gmra.mrb[0].mxu0 %vm1940_vm6, %v1179_v6  ;;  %v968_v17 = vpop.permute.xlu1 %967  ;;  %v1127_v6 = vsel %vm438_vm0, %v5863_v28, %v5586_v21  ;;  %v1130_v21 = vsel %vm438_vm0, %v536_v8, %v5594_v23  ;;  %v540_v8 = vld [vmem:[#allocation2 + $0x70] sm:$0xff] }
 0x103   : > { %v1181_v60 = vsel %vm1177_vm5, %v1126_v13, %v968_v17  ;;  %v966_v9 = vpop.permute.xlu0 %965  ;;  %v535_v13 = vld [vmem:[#allocation2 + $0x40] sm:$0xff] }
 0x104   : > { %v1180_v42 = vsel %vm1177_vm5, %v1125_v4, %v966_v9  ;;  %1459 = vrot.lane.b32.xlu1 %v5854_v12, %s5265_s23  ;;  %v1129_v10 = vsel %vm438_vm0, %v535_v13, %v5598_v25  ;;  %v539_v13 = vld [vmem:[#allocation2 + $0x68] sm:$0xff] }
 0x105   : > { %1673 = vrot.lane.b32.xlu0 %v5572_v16, %s5267_s28  ;;  %4919 = vmatprep.mubr.msk.f32.mxu0 %vm1940_vm6, %v1180_v42  ;;  %v537_v42 = vld [vmem:[#allocation2 + $0x50] sm:$0xff] }
 0x106   : > { %4920 = vmatmul.mubr.msk.f32.gmra.mrb[2].mxu0 %vm1940_vm6, %v1181_v60  ;;  %v972_v11 = vpop.permute.xlu1 %971  ;;  %v538_v60 = vld [vmem:[#allocation2 + $0x60] sm:$0xff] }
 0x107   : > { %v1183_v35 = vsel %vm1177_vm5, %v1128_v15, %v972_v11  ;;  %v970_v33 = vpop.permute.xlu0 %969  ;;  %v1132_v23 = vsel %vm438_vm0, %v538_v60, %v5606_v27  ;;  %v5903_v11 = vld [vmem:[#allocation2 + $0x69] sm:$0xff]  ;;  %v5914_v27 = vld [vmem:[#allocation2 + $0x71] sm:$0xff]  ;;  %v541_v60 = vld [vmem:[#allocation2 + $0x80] sm:$0xff] }
 0x108   : > { %v1182_v17 = vsel %vm1177_vm5, %v1127_v6, %v970_v33  ;;  %1675 = vrot.lane.b32.xlu1 %v5568_v14, %s5267_s28  ;;  %v1131_v6 = vsel %vm438_vm0, %v537_v42, %v5610_v30  ;;  %v1134_v30 = vsel %vm438_vm0, %v540_v8, %v5618_v32  ;;  %v1135_v42 = vsel %vm438_vm0, %v541_v60, %v5634_v40  ;;  %v547_v60 = vld [vmem:[#allocation2 + $0xc0] sm:$0xff] }
 0x109   : > { %1461 = vrot.lane.b32.xlu0 %v5874_v52, %s5265_s23  ;;  %4922 = vmatprep.mubr.msk.f32.mxu0 %vm1940_vm6, %v1182_v17 }
 0x10a   : > { %4923 = vmatmul.mubr.msk.f32.gmra.mrb[4].mxu0 %vm1940_vm6, %v1183_v35  ;;  %v976_v4 = vpop.permute.xlu1 %975 }
 0x10b   : > { %v1185_v9 = vsel %vm1177_vm5, %v1130_v21, %v976_v4  ;;  %v974_v14 = vpop.permute.xlu0 %973  ;;  %v1133_v21 = vsel %vm438_vm0, %v539_v13, %v5622_v36  ;;  %v542_v4 = vld [vmem:[#allocation2 + $0x88] sm:$0xff] }
 0x10c   : > { %v1184_v15 = vsel %vm1177_vm5, %v1129_v10, %v974_v14  ;;  %1463 = vrot.lane.b32.xlu1 %v5886_v19, %s5265_s23  ;;  %v1136_v32 = vsel %vm438_vm0, %v542_v4, %v5630_v38  ;;  %v5931_v14 = vld [vmem:[#allocation2 + $0x81] sm:$0xff]  ;;  %v5942_v38 = vld [vmem:[#allocation2 + $0x89] sm:$0xff] }
 0x10d   : > { %1677 = vrot.lane.b32.xlu0 %v5584_v20, %s5267_s28  ;;  %4925 = vmatprep.mubr.msk.f32.mxu0 %vm1940_vm6, %v1184_v15  ;;  %v544_v15 = vld [vmem:[#allocation2 + $0xa0] sm:$0xff]  ;;  %v548_v4 = vld [vmem:[#allocation2 + $0xc8] sm:$0xff] }
 0x10e   : > { %4926 = vmatmul.mubr.msk.f32.gmra.mrb[6].mxu0 %vm1940_vm6, %v1185_v9  ;;  %v980_v25 = vpop.permute.xlu1 %979  ;;  %v1138_v40 = vsel %vm438_vm0, %v544_v15, %v5642_v43  ;;  %v549_v15 = vld [vmem:[#allocation2 + $0xd0] sm:$0xff] }
 0x10f   : > { %v1187_v35 = vsel %vm1177_vm5, %v1132_v23, %v980_v25  ;;  %v978_v33 = vpop.permute.xlu0 %977 }
 0x110   : > { %v1186_v20 = vsel %vm1177_vm5, %v1131_v6, %v978_v33  ;;  %1679 = vrot.lane.b32.xlu1 %v5580_v18, %s5267_s28  ;;  %v543_v6 = vld [vmem:[#allocation2 + $0x90] sm:$0xff] }
 0x111   : > { %1465 = vrot.lane.b32.xlu0 %v5903_v11, %s5265_s23  ;;  %4928 = vmatprep.mubr.msk.f32.mxu0 %vm1940_vm6, %v1186_v20  ;;  %v546_v33 = vld [vmem:[#allocation2 + $0xb0] sm:$0xff]  ;;  %v545_v20 = vld [vmem:[#allocation2 + $0xa8] sm:$0xff] }
 0x112   : > { %4929 = vmatmul.mubr.msk.f32.gmra.mrb[8].mxu0 %vm1940_vm6, %v1187_v35  ;;  %v984_v17 = vpop.permute.xlu1 %983  ;;  %v1137_v35 = vsel %vm438_vm0, %v543_v6, %v5646_v45  ;;  %v1140_v43 = vsel %vm438_vm0, %v546_v33, %v5654_v47  ;;  %v5970_v47 = vld [vmem:[#allocation2 + $0xa1] sm:$0xff]  ;;  %v1143_v6 = vsel %vm438_vm0, %v549_v15, %v5682_v57 }
 0x113   : > { %v1189_v10 = vsel %vm1177_vm5, %v1134_v30, %v984_v17  ;;  %v982_v18 = vpop.permute.xlu0 %981  ;;  %v5959_v17 = vld [vmem:[#allocation2 + $0x91] sm:$0xff] }
 0x114   : > { %v1188_v9 = vsel %vm1177_vm5, %v1133_v21, %v982_v18  ;;  %1467 = vrot.lane.b32.xlu1 %v5914_v27, %s5265_s23  ;;  %v1139_v21 = vsel %vm438_vm0, %v545_v20, %v5658_v49  ;;  %v1142_v49 = vsel %vm438_vm0, %v548_v4, %v5666_v51  ;;  %v556_v4 = vld [vmem:[#allocation2 + $0x120] sm:$0xff] }
 0x115   : > { %1681 = vrot.lane.b32.xlu0 %v5596_v24, %s5267_s28  ;;  %4931 = vmatprep.mubr.msk.f32.mxu0 %vm1940_vm6, %v1188_v9 }
 0x116   : > { %4932 = vmatmul.mubr.msk.f32.gmra.mrb[10].mxu0 %vm1940_vm6, %v1189_v10  ;;  %v988_v36 = vpop.permute.xlu1 %987 }
 0x117   : > { %v1191_v23 = vsel %vm1177_vm5, %v1136_v32, %v988_v36  ;;  %v986_v25 = vpop.permute.xlu0 %985  ;;  %v1141_v32 = vsel %vm438_vm0, %v547_v60, %v5670_v53  ;;  %v550_v36 = vld [vmem:[#allocation2 + $0xe0] sm:$0xff]  ;;  %v555_v60 = vld [vmem:[#allocation2 + $0x110] sm:$0xff] }
 0x118   : > { %v1190_v24 = vsel %vm1177_vm5, %v1135_v42, %v986_v25  ;;  %1683 = vrot.lane.b32.xlu1 %v5592_v22, %s5267_s28  ;;  %v1144_v51 = vsel %vm438_vm0, %v550_v36, %v5678_v55  ;;  %v5987_v25 = vld [vmem:[#allocation2 + $0xa9] sm:$0xff]  ;;  %v5998_v55 = vld [vmem:[#allocation2 + $0xb1] sm:$0xff] }
 0x119   : > { %1469 = vrot.lane.b32.xlu0 %v5931_v14, %s5265_s23  ;;  %4934 = vmatprep.mubr.msk.f32.mxu0 %vm1940_vm6, %v1190_v24  ;;  %v552_v24 = vld [vmem:[#allocation2 + $0xf0] sm:$0xff] }
 0x11a   : > { %4935 = vmatmul.mubr.msk.f32.gmra.mrb[12].mxu0 %vm1940_vm6, %v1191_v23  ;;  %v992_v8 = vpop.permute.xlu1 %991  ;;  %v1146_v57 = vsel %vm438_vm0, %v552_v24, %v5690_v59  ;;  %v6043_v36 = vld [vmem:[#allocation2 + $0xd1] sm:$0xff] }
 0x11b   : > { %v1193_v13 = vsel %vm1177_vm5, %v1138_v40, %v992_v8  ;;  %v990_v22 = vpop.permute.xlu0 %989 }
 0x11c   : > { %v1192_v30 = vsel %vm1177_vm5, %v1137_v35, %v990_v22  ;;  %1471 = vrot.lane.b32.xlu1 %v5942_v38, %s5265_s23  ;;  %v551_v35 = vld [vmem:[#allocation2 + $0xe8] sm:$0xff] }
 0x11d   : > { %1685 = vrot.lane.b32.xlu0 %v5608_v29, %s5267_s28  ;;  %4937 = vmatprep.mubr.msk.f32.mxu0 %vm1940_vm6, %v1192_v30  ;;  %v554_v22 = vld [vmem:[#allocation2 + $0x108] sm:$0xff]  ;;  %v553_v30 = vld [vmem:[#allocation2 + $0x100] sm:$0xff] }
 0x11e   : > { %4938 = vmatmul.mubr.msk.f32.gmra.mrb[14].mxu0 %vm1940_vm6, %v1193_v13  ;;  %v996_v45 = vpop.permute.xlu1 %995  ;;  %v1145_v13 = vsel %vm438_vm0, %v551_v35, %v5694_v61  ;;  %v1148_v59 = vsel %vm438_vm0, %v554_v22, %v5702_v1  ;;  %v6026_v1 = vld [vmem:[#allocation2 + $0xc9] sm:$0xff]  ;;  %v6103_v22 = vld [vmem:[#allocation2 + $0x111] sm:$0xff] }
 0x11f   : > { %v1195_v10 = vsel %vm1177_vm5, %v1140_v43, %v996_v45  ;;  %v994_v18 = vpop.permute.xlu0 %993  ;;  %v6015_v45 = vld [vmem:[#allocation2 + $0xc1] sm:$0xff]  ;;  %v6091_v35 = vld [vmem:[#allocation2 + $0x109] sm:$0xff] }
 0x120   : > { %v1194_v29 = vsel %vm1177_vm5, %v1139_v21, %v994_v18  ;;  %1687 = vrot.lane.b32.xlu1 %v5604_v26, %s5267_s28  ;;  %v1147_v21 = vsel %vm438_vm0, %v553_v30, %v5706_v3  ;;  %v1150_v3 = vsel %vm438_vm0, %v556_v4, %v5714_v5  ;;  %v6111_v30 = vld [vmem:[#allocation2 + $0x121] sm:$0xff]  ;;  %v6123_v4 = vld [vmem:[#allocation2 + $0x129] sm:$0xff] }
 0x121   : > { %1473 = vrot.lane.b32.xlu0 %v5959_v17, %s5265_s23  ;;  %4940 = vmatprep.mubr.msk.f32.mxu0 %vm1940_vm6, %v1194_v29 }
 0x122   : > { %4941 = vmatmul.mubr.msk.f32.gmra.mrb[16].mxu0 %vm1940_vm6, %v1195_v10  ;;  %v1000_v9 = vpop.permute.xlu1 %999 }
 0x123   : > { %v1197_v42 = vsel %vm1177_vm5, %v1142_v49, %v1000_v9  ;;  %v998_v26 = vpop.permute.xlu0 %997  ;;  %v1149_v49 = vsel %vm438_vm0, %v555_v60, %v5718_v7  ;;  %v6131_v60 = vld [vmem:[#allocation2 + $0x131] sm:$0xff] }
 0x124   : > { %v1196_v23 = vsel %vm1177_vm5, %v1141_v32, %v998_v26  ;;  %1475 = vrot.lane.b32.xlu1 %v5970_v47, %s5265_s23 }
 0x125   : > { %1689 = vrot.lane.b32.xlu0 %v5620_v34, %s5267_s28  ;;  %4943 = vmatprep.mubr.msk.f32.mxu0 %vm1940_vm6, %v1196_v23  ;;  %v6063_v23 = vld [vmem:[#allocation2 + $0xe9] sm:$0xff] }
 0x126   : > { %4944 = vmatmul.mubr.msk.f32.gmra.mrb[18].mxu0 %vm1940_vm6, %v1197_v42  ;;  %v1004_v53 = vpop.permute.xlu1 %1003  ;;  %v6051_v42 = vld [vmem:[#allocation2 + $0xe1] sm:$0xff] }
 0x127   : > { %v1199_v40 = vsel %vm1177_vm5, %v1144_v51, %v1004_v53  ;;  %v1002_v8 = vpop.permute.xlu0 %1001  ;;  %v6071_v51 = vld [vmem:[#allocation2 + $0xf1] sm:$0xff] }
 0x128   : > { %v1198_v34 = vsel %vm1177_vm5, %v1143_v6, %v1002_v8  ;;  %1691 = vrot.lane.b32.xlu1 %v5616_v31, %s5267_s28  ;;  %v7574_v8 = vld [vmem:[#allocation3_spill] sm:$0xff] }
 0x129   : > { %1477 = vrot.lane.b32.xlu0 %v5987_v25, %s5265_s23  ;;  %4946 = vmatprep.mubr.msk.f32.mxu0 %vm1940_vm6, %v1198_v34 }
 0x12a   : > { %4947 = vmatmul.mubr.msk.f32.gmra.mrb[20].mxu0 %vm1940_vm6, %v1199_v40  ;;  %v1008_v33 = vpop.permute.xlu1 %1007  ;;  %v6083_v40 = vld [vmem:[#allocation2 + $0x101] sm:$0xff] }
 0x12b   : > { %v1201_v20 = vsel %vm1177_vm5, %v1146_v57, %v1008_v33  ;;  %v1006_v31 = vpop.permute.xlu0 %1005  ;;  %v7577_v33 = vld [vmem:[#allocation6_spill] sm:$0xff] }
 0x12c   : > { %v1200_v43 = vsel %vm1177_vm5, %v1145_v13, %v1006_v31  ;;  %1479 = vrot.lane.b32.xlu1 %v5998_v55, %s5265_s23  ;;  %v7580_v31 = vld [vmem:[#allocation5_spill] sm:$0xff] }
 0x12d   : > { %1693 = vrot.lane.b32.xlu0 %v5632_v39, %s5267_s28  ;;  %4949 = vmatprep.mubr.msk.f32.mxu0 %vm1940_vm6, %v1200_v43 }
 0x12e   : > { %4950 = vmatmul.mubr.msk.f32.gmra.mrb[22].mxu0 %vm1940_vm6, %v1201_v20  ;;  %v1012_v61 = vpop.permute.xlu1 %1011 }
 0x12f   : > { %v1203_v10 = vsel %vm1177_vm5, %v1148_v59, %v1012_v61  ;;  %v1010_v18 = vpop.permute.xlu0 %1009  ;;  %v7583_v61 = vld [vmem:[#allocation8_spill] sm:$0xff] }
 0x130   : > { %v1202_v39 = vsel %vm1177_vm5, %v1147_v21, %v1010_v18  ;;  %1695 = vrot.lane.b32.xlu1 %v5628_v37, %s5267_s28  ;;  %v7586_v18 = vld [vmem:[#allocation7_spill] sm:$0xff] }
 0x131   : > { %1481 = vrot.lane.b32.xlu0 %v6015_v45, %s5265_s23  ;;  %4952 = vmatprep.mubr.msk.f32.mxu0 %vm1940_vm6, %v1202_v39 }
 0x132   : > { %4953 = vmatmul.mubr.msk.f32.gmra.mrb[24].mxu0 %vm1940_vm6, %v1203_v10  ;;  %v1016_v29 = vpop.permute.xlu1 %1015 }
 0x133   : > { %v1205_v9 = vsel %vm1177_vm5, %v1150_v3, %v1016_v29  ;;  %v1014_v32 = vpop.permute.xlu0 %1013  ;;  %v4597_v3 = vld [vmem:[%s7485_s2 + $0x20] sm:$0xff]  ;;  %v4598_v29 = vld [vmem:[%s7485_s2 + $0x28] sm:$0xf] }
 0x134   : > { %v1204_v37 = vsel %vm1177_vm5, %v1149_v49, %v1014_v32  ;;  %1483 = vrot.lane.b32.xlu1 %v6026_v1, %s5265_s23  ;;  %v7589_v32 = vld [vmem:[#allocation10_spill] sm:$0xff] }
 0x135   : > { %1697 = vrot.lane.b32.xlu0 %v5644_v44, %s5267_s28  ;;  %4955 = vmatprep.mubr.msk.f32.mxu0 %vm1940_vm6, %v1204_v37  ;;  %v6147_v37 = vld [vmem:[#allocation2 + $0x141] sm:$0xff] }
 0x136   : > { %4956 = vmatmul.mubr.msk.f32.gmra.mrb[26].mxu0 %vm1940_vm6, %v1205_v9  ;;  %v6041_v5 = vpop.permute.xlu1 %1019  ;;  %v5094_v9 = vpack.c.bf16 %v4598_v29, %v4597_v3 }
 0x137   : > { %7563 = vst [vmem:[#allocation46_spill] sm:$0xff] %v6041_v5  ;;  %v6045_v7 = vpop.permute.xlu0 %1017 }
 0x138   : > { %7564 = vst [vmem:[#allocation47_spill] sm:$0xff] %v6045_v7  ;;  %1699 = vrot.lane.b32.xlu1 %v5640_v41, %s5267_s28  ;;  %5096 = vmatprep.subr.msk.bf16.mxu0 %vm5533_vm4, %v5094_v9 }
 0x139   : > { %1485 = vrot.lane.b32.xlu0 %v6043_v36, %s5265_s23  ;;  %5099 = vmatpush3.bf16.msk.msra.mxu0 %vm5533_vm4, %v5094_v9  ;;  %v7596_v9 = vld [vmem:[#allocation12_spill] sm:$0xff] }
 0x13a   : > { %v6053_v26 = vpop.permute.xlu1 %1023 }
 0x13b   : > { %7565 = vst [vmem:[#allocation48_spill] sm:$0xff] %v6053_v26  ;;  %v6055_v44 = vpop.permute.xlu0 %1021  ;;  %v6452_v26 = vld [vmem:[#allocation2 + $0x128] sm:$0xff] }
 0x13c   : > { %7566 = vst [vmem:[#allocation49_spill] sm:$0xff] %v6055_v44  ;;  %1487 = vrot.lane.b32.xlu1 %v6051_v42, %s5265_s23 }
 0x13d   : > { %1701 = vrot.lane.b32.xlu0 %v5656_v48, %s5267_s28  ;;  %v7571_v48 = vld [vmem:[#allocation4_spill] sm:$0xff] }
 0x13e   : > { %v6061_v15 = vpop.permute.xlu1 %1027 }
 0x13f   : > { %7567 = vst [vmem:[#allocation50_spill] sm:$0xff] %v6061_v15  ;;  %v6065_v41 = vpop.permute.xlu0 %1025  ;;  %v3064_v15 = vld [vmem:[#allocation2 + $0xca] sm:$0xff] }
 0x140   : > { %7568 = vst [vmem:[#allocation51_spill] sm:$0xff] %v6065_v41  ;;  %1703 = vrot.lane.b32.xlu1 %v5652_v46, %s5267_s28 }
 0x141   : > { %1489 = vrot.lane.b32.xlu0 %v6063_v23, %s5265_s23 }
 0x142   : > { %v6073_v53 = vpop.permute.xlu1 %1031 }
 0x143   : > { %7569 = vst [vmem:[#allocation52_spill] sm:$0xff] %v6073_v53  ;;  %v6075_v6 = vpop.permute.xlu0 %1029  ;;  %v6429_v53 = vld [vmem:[#allocation2 + $0x110] sm:$0xff] }
 0x144   : > { %7570 = vst [vmem:[#allocation53_spill] sm:$0xff] %v6075_v6  ;;  %1491 = vrot.lane.b32.xlu1 %v6071_v51, %s5265_s23  ;;  %7605 = vst [vmem:[#allocation12_spill] sm:$0xff] %v6429_v53 }
 0x145   : > { %1705 = vrot.lane.b32.xlu0 %v7571_v48, %s5267_s28 }
 0x146   : > { %v6081_v24 = vpop.permute.xlu1 %1035 }
 0x147   : > { %7572 = vst [vmem:[#allocation4_spill] sm:$0xff] %v6081_v24  ;;  %v6085_v46 = vpop.permute.xlu0 %1033 }
 0x148   : > { %7573 = vst [vmem:[#allocation54_spill] sm:$0xff] %v6085_v46  ;;  %1707 = vrot.lane.b32.xlu1 %v7574_v8, %s5267_s28  ;;  %v2997_v8 = vld [vmem:[#allocation2 + $0x41] sm:$0xff] }
 0x149   : > { %1493 = vrot.lane.b32.xlu0 %v6083_v40, %s5265_s23 }
 0x14a   : > { %v6093_v34 = vpop.permute.xlu1 %1039 }
 0x14b   : > { %7575 = vst [vmem:[#allocation3_spill] sm:$0xff] %v6093_v34  ;;  %v6095_v57 = vpop.permute.xlu0 %1037 }
 0x14c   : > { %7576 = vst [vmem:[#allocation55_spill] sm:$0xff] %v6095_v57  ;;  %1495 = vrot.lane.b32.xlu1 %v6091_v35, %s5265_s23  ;;  %v3062_v57 = vld [vmem:[#allocation2 + $0xb2] sm:$0xff] }
 0x14d   : > { %1709 = vrot.lane.b32.xlu0 %v7577_v33, %s5267_s28 }
 0x14e   : > { %v6101_v13 = vpop.permute.xlu1 %1043 }
 0x14f   : > { %7578 = vst [vmem:[#allocation6_spill] sm:$0xff] %v6101_v13  ;;  %v6105_v20 = vpop.permute.xlu0 %1041 }
 0x150   : > { %7579 = vst [vmem:[#allocation56_spill] sm:$0xff] %v6105_v20  ;;  %1711 = vrot.lane.b32.xlu1 %v7580_v31, %s5267_s28  ;;  %v6383_v20 = vld [vmem:[#allocation2 + $0xe8] sm:$0xff] }
 0x151   : > { %1497 = vrot.lane.b32.xlu0 %v6103_v22, %s5265_s23 }
 0x152   : > { %v6113_v43 = vpop.permute.xlu1 %1047 }
 0x153   : > { %7581 = vst [vmem:[#allocation5_spill] sm:$0xff] %v6113_v43  ;;  %v6115_v59 = vpop.permute.xlu0 %1045 }
 0x154   : > { %7582 = vst [vmem:[#allocation57_spill] sm:$0xff] %v6115_v59  ;;  %1499 = vrot.lane.b32.xlu1 %v6111_v30, %s5265_s23 }
 0x155   : > { %1713 = vrot.lane.b32.xlu0 %v7583_v61, %s5267_s28 }
 0x156   : > { %v6121_v21 = vpop.permute.xlu1 %1051 }
 0x157   : > { %7584 = vst [vmem:[#allocation8_spill] sm:$0xff] %v6121_v21  ;;  %v6125_v10 = vpop.permute.xlu0 %1049 }
 0x158   : > { %7585 = vst [vmem:[#allocation58_spill] sm:$0xff] %v6125_v10  ;;  %1715 = vrot.lane.b32.xlu1 %v7586_v18, %s5267_s28  ;;  %v7594_v18 = vld [vmem:[#allocation9_spill] sm:$0xff]  ;;  %v6335_v10 = vld [vmem:[#allocation2 + $0xc0] sm:$0xff] }
 0x159   : > { %1501 = vrot.lane.b32.xlu0 %v6123_v4, %s5265_s23 }
 0x15a   : > { %v6133_v39 = vpop.permute.xlu1 %1055 }
 0x15b   : > { %7587 = vst [vmem:[#allocation7_spill] sm:$0xff] %v6133_v39  ;;  %v6141_v49 = vpop.permute.xlu0 %1053 }
 0x15c   : > { %7588 = vst [vmem:[#allocation59_spill] sm:$0xff] %v6141_v49  ;;  %1503 = vrot.lane.b32.xlu1 %v6131_v60, %s5265_s23 }
 0x15d   : > { %1717 = vrot.lane.b32.xlu0 %v7589_v32, %s5267_s28  ;;  %v6174_v32 = vld [vmem:[#allocation2 + $0x149] sm:$0xff] }
 0x15e   : > { %v6151_v48 = vpop.permute.xlu1 %1059 }
 0x15f   : > { %7590 = vst [vmem:[#allocation10_spill] sm:$0xff] %v6151_v48  ;;  %v6155_v33 = vpop.permute.xlu0 %1057 }
 0x160   : > { %7591 = vst [vmem:[#allocation60_spill] sm:$0xff] %v6155_v33  ;;  %1505 = vrot.lane.b32.xlu1 %v6147_v37, %s5265_s23  ;;  %v3056_v33 = vld [vmem:[#allocation2 + $0x72] sm:$0xff] }
 0x161   : > { %3159 = vrot.lane.b32.xlu0 %v2997_v8, %s5265_s23 }
 0x162   : > { %v6160_v31 = vpop.permute.xlu1 %1063 }
 0x163   : > { %7592 = vst [vmem:[#allocation61_spill] sm:$0xff] %v6160_v31  ;;  %v6162_v61 = vpop.permute.xlu0 %1061 }
 0x164   : > { %7593 = vst [vmem:[#allocation62_spill] sm:$0xff] %v6162_v61  ;;  %3161 = vrot.lane.b32.xlu1 %v5854_v12, %s5265_s23  ;;  %v3052_v61 = vld [vmem:[#allocation2 + $0x4a] sm:$0xff] }
 0x165   : > { %1719 = vrot.lane.b32.xlu0 %v7594_v18, %s5267_s28  ;;  %v6183_v18 = vld [vmem:[#allocation2 + $0x151] sm:$0xff] }
 0x166   : > { %v1452_v3 = vpop.permute.xlu1 %1451 }
 0x167   : > { %v6168_v29 = vpop.permute.xlu0 %1065  ;;  %v1829_v8 = vsel %vm438_vm0, %v5845_v50, %v1452_v3 }
 0x168   : > { %7595 = vst [vmem:[#allocation9_spill] sm:$0xff] %v6168_v29  ;;  %1721 = vrot.lane.b32.xlu1 %v7596_v9, %s5267_s28  ;;  %v1237_v29 = vld [vmem:[#allocation2 + $0x30] sm:$0xff] }
 0x169   : > { %3375 = vrot.lane.b32.xlu0 %v5572_v16, %s5267_s28 }
 0x16a   : > { %v1668_v31 = vpop.permute.xlu1 %1667 }
 0x16b   : > { %v1454_v12 = vpop.permute.xlu0 %1453  ;;  %v1883_v48 = vsel %vm1177_vm5, %v1829_v8, %v1668_v31  ;;  %v6198_v8 = vld [vmem:[#allocation2 + $0x40] sm:$0xff] }
 0x16c   : > { %1507 = vrot.lane.b32.xlu1 %v6174_v32, %s5265_s23  ;;  %4831 = vmatprep.mubr.msk.f32.mxu1 %vm1940_vm6, %v1883_v48  ;;  %v1830_v9 = vsel %vm438_vm0, %v5863_v28, %v1454_v12 }
 0x16d   : > { %3377 = vrot.lane.b32.xlu0 %v3052_v61, %s5267_s28 }
 0x16e   : > { %v1456_v16 = vpop.permute.xlu1 %1455 }
 0x16f   : > { %v1670_v50 = vpop.permute.xlu0 %1669  ;;  %v1831_v48 = vsel %vm438_vm0, %v1237_v29, %v1456_v16  ;;  %v3053_v29 = vld [vmem:[#allocation2 + $0x52] sm:$0xff] }
 0x170   : > { %v1884_v3 = vsel %vm1177_vm5, %v1830_v9, %v1670_v50  ;;  %1509 = vrot.lane.b32.xlu1 %v6183_v18, %s5265_s23  ;;  %v7598_v50 = vld [vmem:[#allocation15_spill] sm:$0xff] }
 0x171   : > { %3163 = vrot.lane.b32.xlu0 %v5874_v52, %s5265_s23  ;;  %4832 = vmatmul.mubr.msk.f32.vlgmr.msra.gmra.mrb[0].mxu1 %vm1940_vm6, %v1884_v3  ;;  %v7597_v52 = vld [vmem:[#allocation11_spill] sm:$0xff]  ;;  %7607 = vst [vmem:[#allocation15_spill] sm:$0xff] %v6452_v26 }
 0x172   : > { %v1672_v31 = vpop.permute.xlu1 %1671  ;;  %5101 = vmatpush3.bf16.msk.msra.mxu1 %vm5533_vm4, %v5530_v62 }
 0x173   : > { %v1885_v28 = vsel %vm1177_vm5, %v1831_v48, %v1672_v31  ;;  %v1458_v61 = vpop.permute.xlu0 %1457  ;;  %v3054_v31 = vld [vmem:[#allocation2 + $0x62] sm:$0xff] }
 0x174   : > { %3165 = vrot.lane.b32.xlu1 %v5886_v19, %s5265_s23  ;;  %4834 = vmatprep.mubr.msk.f32.mxu1 %vm1940_vm6, %v1885_v28  ;;  %v1832_v16 = vsel %vm438_vm0, %v6198_v8, %v1458_v61  ;;  %v6214_v19 = vld [vmem:[#allocation2 + $0x161] sm:$0xff] }
 0x175   : > { %1723 = vrot.lane.b32.xlu0 %v7597_v52, %s5267_s28  ;;  %v6219_v52 = vld [vmem:[#allocation2 + $0x50] sm:$0xff] }
 0x176   : > { %v1460_v12 = vpop.permute.xlu1 %1459 }
 0x177   : > { %v1674_v62 = vpop.permute.xlu0 %1673  ;;  %v1833_v3 = vsel %vm438_vm0, %v6207_v0, %v1460_v12 }
 0x178   : > { %v1886_v9 = vsel %vm1177_vm5, %v1832_v16, %v1674_v62  ;;  %1725 = vrot.lane.b32.xlu1 %v7598_v50, %s5267_s28  ;;  %v6229_v62 = vld [vmem:[#allocation2 + $0x60] sm:$0xff] }
 0x179   : > { %3379 = vrot.lane.b32.xlu0 %v3053_v29, %s5267_s28  ;;  %4835 = vmatmul.mubr.msk.f32.gmra.mrb[2].mxu1 %vm1940_vm6, %v1886_v9  ;;  %v6225_v29 = vld [vmem:[#allocation2 + $0x169] sm:$0xff] }
 0x17a   : > { %v1676_v48 = vpop.permute.xlu1 %1675 }
 0x17b   : > { %v1887_v28 = vsel %vm1177_vm5, %v1833_v3, %v1676_v48  ;;  %v1462_v61 = vpop.permute.xlu0 %1461 }
 0x17c   : > { %1511 = vrot.lane.b32.xlu1 %v6214_v19, %s5265_s23  ;;  %4837 = vmatprep.mubr.msk.f32.mxu1 %vm1940_vm6, %v1887_v28  ;;  %v1834_v12 = vsel %vm438_vm0, %v6219_v52, %v1462_v61  ;;  %v6240_v61 = vld [vmem:[#allocation2 + $0x68] sm:$0xff] }
 0x17d   : > { %3381 = vrot.lane.b32.xlu0 %v3054_v31, %s5267_s28 }
 0x17e   : > { %v1464_v16 = vpop.permute.xlu1 %1463 }
 0x17f   : > { %v1678_v9 = vpop.permute.xlu0 %1677  ;;  %v1835_v3 = vsel %vm438_vm0, %v6229_v62, %v1464_v16  ;;  %v6249_v16 = vld [vmem:[#allocation2 + $0x70] sm:$0xff] }
 0x180   : > { %v1888_v50 = vsel %vm1177_vm5, %v1834_v12, %v1678_v9  ;;  %1513 = vrot.lane.b32.xlu1 %v6225_v29, %s5265_s23  ;;  %v7599_v12 = vld [vmem:[#allocation13_spill] sm:$0xff] }
 0x181   : > { %3167 = vrot.lane.b32.xlu0 %v5903_v11, %s5265_s23  ;;  %4838 = vmatmul.mubr.msk.f32.gmra.mrb[4].mxu1 %vm1940_vm6, %v1888_v50  ;;  %v3055_v9 = vld [vmem:[#allocation2 + $0x6a] sm:$0xff] }
 0x182   : > { %v1680_v48 = vpop.permute.xlu1 %1679 }
 0x183   : > { %v1889_v31 = vsel %vm1177_vm5, %v1835_v3, %v1680_v48  ;;  %v1466_v28 = vpop.permute.xlu0 %1465  ;;  %v7600_v48 = vld [vmem:[#allocation19_spill] sm:$0xff] }
 0x184   : > { %3169 = vrot.lane.b32.xlu1 %v5914_v27, %s5265_s23  ;;  %4840 = vmatprep.mubr.msk.f32.mxu1 %vm1940_vm6, %v1889_v31  ;;  %v1836_v50 = vsel %vm438_vm0, %v6240_v61, %v1466_v28  ;;  %v6256_v27 = vld [vmem:[#allocation2 + $0x171] sm:$0xff] }
 0x185   : > { %1727 = vrot.lane.b32.xlu0 %v7599_v12, %s5267_s28 }
 0x186   : > { %v1468_v11 = vpop.permute.xlu1 %1467 }
 0x187   : > { %v1682_v58 = vpop.permute.xlu0 %1681  ;;  %v1837_v31 = vsel %vm438_vm0, %v6249_v16, %v1468_v11 }
 0x188   : > { %v1890_v3 = vsel %vm1177_vm5, %v1836_v50, %v1682_v58  ;;  %1729 = vrot.lane.b32.xlu1 %v7600_v48, %s5267_s28  ;;  %v6267_v58 = vld [vmem:[#allocation2 + $0x181] sm:$0xff] }
 0x189   : > { %3383 = vrot.lane.b32.xlu0 %v3055_v9, %s5267_s28  ;;  %4841 = vmatmul.mubr.msk.f32.gmra.mrb[6].mxu1 %vm1940_vm6, %v1890_v3  ;;  %v6271_v50 = vld [vmem:[#allocation2 + $0x88] sm:$0xff] }
 0x18a   : > { %v1684_v12 = vpop.permute.xlu1 %1683 }
 0x18b   : > { %v1891_v28 = vsel %vm1177_vm5, %v1837_v31, %v1684_v12  ;;  %v1470_v39 = vpop.permute.xlu0 %1469 }
 0x18c   : > { %1515 = vrot.lane.b32.xlu1 %v6256_v27, %s5265_s23  ;;  %4843 = vmatprep.mubr.msk.f32.mxu1 %vm1940_vm6, %v1891_v28  ;;  %v1838_v11 = vsel %vm438_vm0, %v6261_v56, %v1470_v39  ;;  %v6282_v28 = vld [vmem:[#allocation2 + $0x90] sm:$0xff] }
 0x18d   : > { %3385 = vrot.lane.b32.xlu0 %v3056_v33, %s5267_s28 }
 0x18e   : > { %v1472_v9 = vpop.permute.xlu1 %1471 }
 0x18f   : > { %v1686_v3 = vpop.permute.xlu0 %1685  ;;  %v1839_v33 = vsel %vm438_vm0, %v6271_v50, %v1472_v9 }
 0x190   : > { %v1892_v48 = vsel %vm1177_vm5, %v1838_v11, %v1686_v3  ;;  %1517 = vrot.lane.b32.xlu1 %v6267_v58, %s5265_s23  ;;  %v7601_v11 = vld [vmem:[#allocation17_spill] sm:$0xff]  ;;  %v3057_v3 = vld [vmem:[#allocation2 + $0x82] sm:$0xff] }
 0x191   : > { %3171 = vrot.lane.b32.xlu0 %v5931_v14, %s5265_s23  ;;  %4844 = vmatmul.mubr.msk.f32.gmra.mrb[8].mxu1 %vm1940_vm6, %v1892_v48  ;;  %v6293_v48 = vld [vmem:[#allocation2 + $0xa0] sm:$0xff] }
 0x192   : > { %v1688_v31 = vpop.permute.xlu1 %1687 }
 0x193   : > { %v1893_v39 = vsel %vm1177_vm5, %v1839_v33, %v1688_v31  ;;  %v1474_v12 = vpop.permute.xlu0 %1473  ;;  %v7602_v31 = vld [vmem:[#allocation23_spill] sm:$0xff] }
 0x194   : > { %3173 = vrot.lane.b32.xlu1 %v5942_v38, %s5265_s23  ;;  %4846 = vmatprep.mubr.msk.f32.mxu1 %vm1940_vm6, %v1893_v39  ;;  %v1840_v9 = vsel %vm438_vm0, %v6282_v28, %v1474_v12  ;;  %v512_v39 = vld [vmem:[%s6298_s14] sm:$0xff]  ;;  %v6306_v12 = vld [vmem:[#allocation2 + $0x189] sm:$0xff] }
 0x195   : > { %1731 = vrot.lane.b32.xlu0 %v7601_v11, %s5267_s28  ;;  %v513_v11 = vld [vmem:[%s6298_s14 + $0x8] sm:$0xff]  ;;  %521 = vst.msk [vmem:[#allocation2 + $0x240] sm:$0xff] %vm438_vm0, %v512_v39  ;;  %v6324_v39 = vld [vmem:[#allocation2 + $0xb0] sm:$0xff] }
 0x196   : > { %v1476_v14 = vpop.permute.xlu1 %1475  ;;  %522 = vst.msk [vmem:[#allocation2 + $0x248] sm:$0xff] %vm438_vm0, %v513_v11 }
 0x197   : > { %v1690_v33 = vpop.permute.xlu0 %1689  ;;  %v1841_v49 = vsel %vm438_vm0, %v6293_v48, %v1476_v14 }
 0x198   : > { %v1894_v38 = vsel %vm1177_vm5, %v1840_v9, %v1690_v33  ;;  %1733 = vrot.lane.b32.xlu1 %v7602_v31, %s5267_s28  ;;  %v6314_v31 = vld [vmem:[#allocation2 + $0xa8] sm:$0xff] }
 0x199   : > { %3387 = vrot.lane.b32.xlu0 %v3057_v3, %s5267_s28  ;;  %4847 = vmatmul.mubr.msk.f32.gmra.mrb[10].mxu1 %vm1940_vm6, %v1894_v38  ;;  %v6320_v3 = vld [vmem:[#allocation2 + $0x191] sm:$0xff] }
 0x19a   : > { %v1692_v21 = vpop.permute.xlu1 %1691 }
 0x19b   : > { %v1895_v9 = vsel %vm1177_vm5, %v1841_v49, %v1692_v21  ;;  %v1478_v33 = vpop.permute.xlu0 %1477 }
 0x19c   : > { %1519 = vrot.lane.b32.xlu1 %v6306_v12, %s5265_s23  ;;  %4849 = vmatprep.mubr.msk.f32.mxu1 %vm1940_vm6, %v1895_v9  ;;  %v1842_v38 = vsel %vm438_vm0, %v6314_v31, %v1478_v33 }
 0x19d   : > { %3389 = vrot.lane.b32.xlu0 %v3058_v63, %s5267_s28 }
 0x19e   : > { %v1480_v14 = vpop.permute.xlu1 %1479 }
 0x19f   : > { %v1694_v21 = vpop.permute.xlu0 %1693  ;;  %v1843_v63 = vsel %vm438_vm0, %v6324_v39, %v1480_v14  ;;  %v3059_v14 = vld [vmem:[#allocation2 + $0x92] sm:$0xff] }
 0x1a0   : > { %v1896_v49 = vsel %vm1177_vm5, %v1842_v38, %v1694_v21  ;;  %1521 = vrot.lane.b32.xlu1 %v6320_v3, %s5265_s23  ;;  %v514_v38 = vld [vmem:[%s6298_s14 + $0x10] sm:$0xff] }
 0x1a1   : > { %3175 = vrot.lane.b32.xlu0 %v5959_v17, %s5265_s23  ;;  %4850 = vmatmul.mubr.msk.f32.gmra.mrb[12].mxu1 %vm1940_vm6, %v1896_v49  ;;  %v7603_v17 = vld [vmem:[#allocation21_spill] sm:$0xff]  ;;  %523 = vst.msk [vmem:[#allocation2 + $0x250] sm:$0xff] %vm438_vm0, %v514_v38 }
 0x1a2   : > { %v1696_v11 = vpop.permute.xlu1 %1695 }
 0x1a3   : > { %v1897_v9 = vsel %vm1177_vm5, %v1843_v63, %v1696_v11  ;;  %v1482_v33 = vpop.permute.xlu0 %1481  ;;  %v6346_v63 = vld [vmem:[#allocation2 + $0xc8] sm:$0xff] }
 0x1a4   : > { %3177 = vrot.lane.b32.xlu1 %v5970_v47, %s5265_s23  ;;  %4852 = vmatprep.mubr.msk.f32.mxu1 %vm1940_vm6, %v1897_v9  ;;  %v1844_v49 = vsel %vm438_vm0, %v6335_v10, %v1482_v33  ;;  %v7604_v47 = vld [vmem:[#allocation26_spill] sm:$0xff] }
 0x1a5   : > { %1735 = vrot.lane.b32.xlu0 %v7603_v17, %s5267_s28  ;;  %v515_v9 = vld [vmem:[%s6298_s14 + $0x18] sm:$0x3]  ;;  %v6354_v17 = vld [vmem:[#allocation2 + $0x1a1] sm:$0xff] }
 0x1a6   : > { %v1484_v21 = vpop.permute.xlu1 %1483  ;;  %524 = vst.msk [vmem:[#allocation2 + $0x258] sm:$0x3] %vm442_vm1, %v515_v9 }
 0x1a7   : > { %v1698_v11 = vpop.permute.xlu0 %1697  ;;  %v1845_v33 = vsel %vm438_vm0, %v6346_v63, %v1484_v21 }
 0x1a8   : > { %v1898_v43 = vsel %vm1177_vm5, %v1844_v49, %v1698_v11  ;;  %1737 = vrot.lane.b32.xlu1 %v7604_v47, %s5267_s28  ;;  %v6360_v11 = vld [vmem:[#allocation2 + $0xd0] sm:$0xff]  ;;  %v6370_v47 = vld [vmem:[#allocation2 + $0xe0] sm:$0xff] }
 0x1a9   : > { %3391 = vrot.lane.b32.xlu0 %v3059_v14, %s5267_s28  ;;  %4853 = vmatmul.mubr.msk.f32.gmra.mrb[14].mxu1 %vm1940_vm6, %v1898_v43  ;;  %v6366_v43 = vld [vmem:[#allocation2 + $0x1a9] sm:$0xff] }
 0x1aa   : > { %v1700_v38 = vpop.permute.xlu1 %1699 }
 0x1ab   : > { %v1899_v59 = vsel %vm1177_vm5, %v1845_v33, %v1700_v38  ;;  %v1486_v49 = vpop.permute.xlu0 %1485  ;;  %v6380_v38 = vld [vmem:[#allocation2 + $0x1a2] sm:$0xff] }
 0x1ac   : > { %1523 = vrot.lane.b32.xlu1 %v6354_v17, %s5265_s23  ;;  %4855 = vmatprep.mubr.msk.f32.mxu1 %vm1940_vm6, %v1899_v59  ;;  %v1846_v21 = vsel %vm438_vm0, %v6360_v11, %v1486_v49 }
 0x1ad   : > { %3393 = vrot.lane.b32.xlu0 %v3060_v2, %s5267_s28 }
 0x1ae   : > { %v1488_v14 = vpop.permute.xlu1 %1487 }
 0x1af   : > { %v1702_v9 = vpop.permute.xlu0 %1701  ;;  %v1847_v2 = vsel %vm438_vm0, %v6370_v47, %v1488_v14  ;;  %v3061_v14 = vld [vmem:[#allocation2 + $0xaa] sm:$0xff] }
 0x1b0   : > { %v1900_v33 = vsel %vm1177_vm5, %v1846_v21, %v1702_v9  ;;  %1525 = vrot.lane.b32.xlu1 %v6366_v43, %s5265_s23 }
 0x1b1   : > { %3179 = vrot.lane.b32.xlu0 %v5987_v25, %s5265_s23  ;;  %4856 = vmatmul.mubr.msk.f32.gmra.mrb[16].mxu1 %vm1940_vm6, %v1900_v33  ;;  %v6390_v25 = vld [vmem:[#allocation2 + $0x1aa] sm:$0xff] }
 0x1b2   : > { %v1704_v59 = vpop.permute.xlu1 %1703  ;;  %v6394_v33 = vld [vmem:[#allocation2 + $0xf0] sm:$0xff] }
 0x1b3   : > { %v1901_v49 = vsel %vm1177_vm5, %v1847_v2, %v1704_v59  ;;  %v1490_v13 = vpop.permute.xlu0 %1489 }
 0x1b4   : > { %3181 = vrot.lane.b32.xlu1 %v5998_v55, %s5265_s23  ;;  %4858 = vmatprep.mubr.msk.f32.mxu1 %vm1940_vm6, %v1901_v49  ;;  %v1848_v9 = vsel %vm438_vm0, %v6383_v20, %v1490_v13  ;;  %v6401_v55 = vld [vmem:[#allocation2 + $0x1b1] sm:$0xff] }
 0x1b5   : > { %1739 = vrot.lane.b32.xlu0 %v6380_v38, %s5267_s28 }
 0x1b6   : > { %v1492_v21 = vpop.permute.xlu1 %1491 }
 0x1b7   : > { %v1706_v2 = vpop.permute.xlu0 %1705  ;;  %v1849_v49 = vsel %vm438_vm0, %v6394_v33, %v1492_v21 }
 0x1b8   : > { %v1902_v59 = vsel %vm1177_vm5, %v1848_v9, %v1706_v2  ;;  %1741 = vrot.lane.b32.xlu1 %v6390_v25, %s5267_s28  ;;  %v6416_v2 = vld [vmem:[#allocation2 + $0x108] sm:$0xff] }
 0x1b9   : > { %3395 = vrot.lane.b32.xlu0 %v3061_v14, %s5267_s28  ;;  %4859 = vmatmul.mubr.msk.f32.gmra.mrb[18].mxu1 %vm1940_vm6, %v1902_v59  ;;  %v6412_v14 = vld [vmem:[#allocation2 + $0x1c1] sm:$0xff] }
 0x1ba   : > { %v1708_v34 = vpop.permute.xlu1 %1707 }
 0x1bb   : > { %v1903_v13 = vsel %vm1177_vm5, %v1849_v49, %v1708_v34  ;;  %v1494_v24 = vpop.permute.xlu0 %1493 }
 0x1bc   : > { %1527 = vrot.lane.b32.xlu1 %v6401_v55, %s5265_s23  ;;  %4861 = vmatprep.mubr.msk.f32.mxu1 %vm1940_vm6, %v1903_v13  ;;  %v1850_v21 = vsel %vm438_vm0, %v6406_v54, %v1494_v24  ;;  %v6426_v13 = vld [vmem:[#allocation2 + $0x1b2] sm:$0xff] }
 0x1bd   : > { %3397 = vrot.lane.b32.xlu0 %v3062_v57, %s5267_s28 }
 0x1be   : > { %v1496_v9 = vpop.permute.xlu1 %1495 }
 0x1bf   : > { %v1710_v59 = vpop.permute.xlu0 %1709  ;;  %v1851_v57 = vsel %vm438_vm0, %v6416_v2, %v1496_v9  ;;  %v3063_v9 = vld [vmem:[#allocation2 + $0xc2] sm:$0xff] }
 0x1c0   : > { %v1904_v34 = vsel %vm1177_vm5, %v1850_v21, %v1710_v59  ;;  %1529 = vrot.lane.b32.xlu1 %v6412_v14, %s5265_s23 }
 0x1c1   : > { %3183 = vrot.lane.b32.xlu0 %v6015_v45, %s5265_s23  ;;  %4862 = vmatmul.mubr.msk.f32.gmra.mrb[20].mxu1 %vm1940_vm6, %v1904_v34  ;;  %v6436_v45 = vld [vmem:[#allocation2 + $0x1c2] sm:$0xff] }
 0x1c2   : > { %v1712_v49 = vpop.permute.xlu1 %1711  ;;  %v6440_v34 = vld [vmem:[#allocation2 + $0x120] sm:$0xff] }
 0x1c3   : > { %v1905_v24 = vsel %vm1177_vm5, %v1851_v57, %v1712_v49  ;;  %v1498_v46 = vpop.permute.xlu0 %1497  ;;  %7606 = vst [vmem:[#allocation11_spill] sm:$0xff] %v6440_v34 }
 0x1c4   : > { %3185 = vrot.lane.b32.xlu1 %v6026_v1, %s5265_s23  ;;  %4864 = vmatprep.mubr.msk.f32.mxu1 %vm1940_vm6, %v1905_v24  ;;  %v1852_v59 = vsel %vm438_vm0, %v6429_v53, %v1498_v46  ;;  %v6447_v1 = vld [vmem:[#allocation2 + $0x1c9] sm:$0xff] }
 0x1c5   : > { %1743 = vrot.lane.b32.xlu0 %v6426_v13, %s5267_s28 }
 0x1c6   : > { %v1500_v21 = vpop.permute.xlu1 %1499 }
 0x1c7   : > { %v1714_v57 = vpop.permute.xlu0 %1713  ;;  %v1853_v24 = vsel %vm438_vm0, %v6440_v34, %v1500_v21  ;;  %v3066_v34 = vld [vmem:[#allocation2 + $0xe2] sm:$0xff] }
 0x1c8   : > { %v1906_v49 = vsel %vm1177_vm5, %v1852_v59, %v1714_v57  ;;  %1745 = vrot.lane.b32.xlu1 %v6436_v45, %s5267_s28 }
 0x1c9   : > { %3399 = vrot.lane.b32.xlu0 %v3063_v9, %s5267_s28  ;;  %4865 = vmatmul.mubr.msk.f32.gmra.mrb[22].mxu1 %vm1940_vm6, %v1906_v49  ;;  %v6458_v9 = vld [vmem:[#allocation2 + $0x1d1] sm:$0xff] }
 0x1ca   : > { %v1716_v6 = vpop.permute.xlu1 %1715 }
 0x1cb   : > { %v1907_v46 = vsel %vm1177_vm5, %v1853_v24, %v1716_v6  ;;  %v1502_v41 = vpop.permute.xlu0 %1501  ;;  %v6468_v24 = vld [vmem:[#allocation2 + $0x1ca] sm:$0xff] }
 0x1cc   : > { %1531 = vrot.lane.b32.xlu1 %v6447_v1, %s5265_s23  ;;  %4867 = vmatprep.mubr.msk.f32.mxu1 %vm1940_vm6, %v1907_v46  ;;  %v1854_v21 = vsel %vm438_vm0, %v6452_v26, %v1502_v41  ;;  %v6470_v46 = vld [vmem:[#allocation2 + $0x130] sm:$0xff] }
 0x1cd   : > { %3401 = vrot.lane.b32.xlu0 %v3064_v15, %s5267_s28  ;;  %7608 = vst [vmem:[#allocation13_spill] sm:$0xff] %v6470_v46  ;;  %v6476_v41 = vld [vmem:[#allocation2 + $0x1d2] sm:$0xff] }
 0x1ce   : > { %v1504_v59 = vpop.permute.xlu1 %1503 }
 0x1cf   : > { %v1718_v57 = vpop.permute.xlu0 %1717 }
 0x1d0   : > { %v1908_v49 = vsel %vm1177_vm5, %v1854_v21, %v1718_v57  ;;  %1533 = vrot.lane.b32.xlu1 %v6458_v9, %s5265_s23  ;;  %v3065_v57 = vld [vmem:[#allocation2 + $0xd2] sm:$0xff] }
 0x1d1   : > { %3187 = vrot.lane.b32.xlu0 %v6043_v36, %s5265_s23  ;;  %4868 = vmatmul.mubr.msk.f32.gmra.mrb[24].mxu1 %vm1940_vm6, %v1908_v49  ;;  %v1855_v36 = vsel %vm438_vm0, %v6470_v46, %v1504_v59  ;;  %v1262_v49 = vld [vmem:[#allocation2 + $0x140] sm:$0xff] }
 0x1d2   : > { %v1506_v6 = vpop.permute.xlu1 %1505 }
 0x1d3   : > { %v3160_v15 = vpop.permute.xlu0 %3159  ;;  %v1856_v7 = vsel %vm438_vm0, %v1262_v49, %v1506_v6 }
 0x1d4   : > { %3189 = vrot.lane.b32.xlu1 %v6051_v42, %s5265_s23  ;;  %v6485_v42 = vld [vmem:[#allocation2 + $0x1e1] sm:$0xff]  ;;  %v3537_v59 = vsel %vm438_vm0, %v6198_v8, %v3160_v15 }
 0x1d5   : > { %1747 = vrot.lane.b32.xlu0 %v6468_v24, %s5267_s28 }
 0x1d6   : > { %v3162_v21 = vpop.permute.xlu1 %3161 }
 0x1d7   : > { %v1720_v44 = vpop.permute.xlu0 %1719  ;;  %v3538_v8 = vsel %vm438_vm0, %v6207_v0, %v3162_v21  ;;  %v6515_v0 = vld [vmem:[#allocation2 + $0x1ea] sm:$0xff] }
 0x1d8   : > { %v1909_v5 = vsel %vm1177_vm5, %v1855_v36, %v1720_v44  ;;  %1749 = vrot.lane.b32.xlu1 %v6476_v41, %s5267_s28  ;;  %v1264_v36 = vld [vmem:[#allocation2 + $0x150] sm:$0xff] }
 0x1d9   : > { %3403 = vrot.lane.b32.xlu0 %v3065_v57, %s5267_s28  ;;  %4870 = vmatprep.mubr.msk.f32.mxu1 %vm1940_vm6, %v1909_v5  ;;  %v6497_v5 = vld [vmem:[#allocation2 + $0x1e9] sm:$0xff] }
 0x1da   : > { %v1722_v26 = vpop.permute.xlu1 %1721  ;;  %v3067_v57 = vld [vmem:[#allocation2 + $0xea] sm:$0xff] }
 0x1db   : > { %v1910_v46 = vsel %vm1177_vm5, %v1856_v7, %v1722_v26  ;;  %v3376_v53 = vpop.permute.xlu0 %3375 }
 0x1dc   : > { %v3591_v44 = vsel %vm1177_vm5, %v3537_v59, %v3376_v53  ;;  %1535 = vrot.lane.b32.xlu1 %v6485_v42, %s5265_s23  ;;  %4871 = vmatmul.mubr.msk.f32.gmra.mrb[26].mxu1 %vm1940_vm6, %v1910_v46  ;;  %v6507_v53 = vld [vmem:[#allocation2 + $0x1e2] sm:$0xff] }
 0x1dd   : > { %3405 = vrot.lane.b32.xlu0 %v3066_v34, %s5267_s28  ;;  %5001 = vmatprep.mubr.msk.f32.mxu0 %vm1940_vm6, %v3591_v44  ;;  %v6509_v46 = vld [vmem:[#allocation2 + $0x148] sm:$0xff] }
 0x1de   : > { %v1508_v6 = vpop.permute.xlu1 %1507  ;;  %7609 = vst [vmem:[#allocation19_spill] sm:$0xff] %v6509_v46 }
 0x1df   : > { %v3378_v15 = vpop.permute.xlu0 %3377 }
 0x1e0   : > { %v3592_v7 = vsel %vm1177_vm5, %v3538_v8, %v3378_v15  ;;  %1537 = vrot.lane.b32.xlu1 %v6497_v5, %s5265_s23  ;;  %v3068_v15 = vld [vmem:[#allocation2 + $0xf2] sm:$0xff] }
 0x1e1   : > { %3191 = vrot.lane.b32.xlu0 %v6063_v23, %s5265_s23  ;;  %5002 = vmatmul.mubr.msk.f32.vlgmr.msra.gmra.mrb[0].mxu0 %vm1940_vm6, %v3592_v7  ;;  %v1857_v23 = vsel %vm438_vm0, %v6509_v46, %v1508_v6 }
 0x1e2   : > { %v1510_v26 = vpop.permute.xlu1 %1509 }
 0x1e3   : > { %v3164_v34 = vpop.permute.xlu0 %3163  ;;  %v1858_v44 = vsel %vm438_vm0, %v1264_v36, %v1510_v26  ;;  %v6536_v26 = vld [vmem:[#allocation2 + $0x201] sm:$0xff] }
 0x1e4   : > { %3193 = vrot.lane.b32.xlu1 %v6071_v51, %s5265_s23  ;;  %v6524_v51 = vld [vmem:[#allocation2 + $0x1f1] sm:$0xff]  ;;  %v3539_v6 = vsel %vm438_vm0, %v6219_v52, %v3164_v34 }
 0x1e5   : > { %1751 = vrot.lane.b32.xlu0 %v6507_v53, %s5267_s28 }
 0x1e6   : > { %v3166_v21 = vpop.permute.xlu1 %3165 }
 0x1e7   : > { %v1724_v49 = vpop.permute.xlu0 %1723  ;;  %v3540_v52 = vsel %vm438_vm0, %v6229_v62, %v3166_v21  ;;  %v6554_v62 = vld [vmem:[#allocation2 + $0x202] sm:$0xff] }
 0x1e8   : > { %v1911_v59 = vsel %vm1177_vm5, %v1857_v23, %v1724_v49  ;;  %1753 = vrot.lane.b32.xlu1 %v6515_v0, %s5267_s28  ;;  %v6546_v49 = vld [vmem:[#allocation2 + $0x1f2] sm:$0xff] }
 0x1e9   : > { %3407 = vrot.lane.b32.xlu0 %v3067_v57, %s5267_s28  ;;  %4873 = vmatprep.mubr.msk.f32.mxu1 %vm1940_vm6, %v1911_v59 }
 0x1ea   : > { %v1726_v8 = vpop.permute.xlu1 %1725 }
 0x1eb   : > { %v1912_v7 = vsel %vm1177_vm5, %v1858_v44, %v1726_v8  ;;  %v3380_v46 = vpop.permute.xlu0 %3379  ;;  %v6548_v44 = vld [vmem:[#allocation2 + $0x160] sm:$0xff] }
 0x1ec   : > { %v3593_v23 = vsel %vm1177_vm5, %v3539_v6, %v3380_v46  ;;  %1539 = vrot.lane.b32.xlu1 %v6524_v51, %s5265_s23  ;;  %4874 = vmatmul.mubr.msk.f32.gmra.mrb[28].mxu1 %vm1940_vm6, %v1912_v7  ;;  %7610 = vst [vmem:[#allocation17_spill] sm:$0xff] %v6548_v44  ;;  %v3069_v8 = vld [vmem:[#allocation2 + $0x102] sm:$0xff] }
 0x1ed   : > { %3409 = vrot.lane.b32.xlu0 %v3068_v15, %s5267_s28  ;;  %5004 = vmatprep.mubr.msk.f32.mxu0 %vm1940_vm6, %v3593_v23  ;;  %v6558_v15 = vld [vmem:[#allocation2 + $0x168] sm:$0xff] }
 0x1ee   : > { %v1512_v57 = vpop.permute.xlu1 %1511  ;;  %7611 = vst [vmem:[#allocation23_spill] sm:$0xff] %v6558_v15 }
 0x1ef   : > { %v3382_v34 = vpop.permute.xlu0 %3381 }
 0x1f0   : > { %v3594_v36 = vsel %vm1177_vm5, %v3540_v52, %v3382_v34  ;;  %1541 = vrot.lane.b32.xlu1 %v6536_v26, %s5265_s23  ;;  %v3070_v34 = vld [vmem:[#allocation2 + $0x10a] sm:$0xff] }
 0x1f1   : > { %3195 = vrot.lane.b32.xlu0 %v6083_v40, %s5265_s23  ;;  %5005 = vmatmul.mubr.msk.f32.gmra.mrb[2].mxu0 %vm1940_vm6, %v3594_v36  ;;  %v1859_v40 = vsel %vm438_vm0, %v6548_v44, %v1512_v57 }
 0x1f2   : > { %v1514_v46 = vpop.permute.xlu1 %1513 }
 0x1f3   : > { %v3168_v59 = vpop.permute.xlu0 %3167  ;;  %v1860_v23 = vsel %vm438_vm0, %v6558_v15, %v1514_v46  ;;  %v6578_v46 = vld [vmem:[#allocation2 + $0x211] sm:$0xff] }
 0x1f4   : > { %3197 = vrot.lane.b32.xlu1 %v6091_v35, %s5265_s23  ;;  %v6565_v35 = vld [vmem:[#allocation2 + $0x209] sm:$0xff]  ;;  %v3541_v57 = vsel %vm438_vm0, %v6240_v61, %v3168_v59 }
 0x1f5   : > { %1755 = vrot.lane.b32.xlu0 %v6546_v49, %s5267_s28 }
 0x1f6   : > { %v3170_v21 = vpop.permute.xlu1 %3169 }
 0x1f7   : > { %v1728_v6 = vpop.permute.xlu0 %1727  ;;  %v3542_v61 = vsel %vm438_vm0, %v6249_v16, %v3170_v21  ;;  %v6596_v16 = vld [vmem:[#allocation2 + $0x212] sm:$0xff] }
 0x1f8   : > { %v1913_v7 = vsel %vm1177_vm5, %v1859_v40, %v1728_v6  ;;  %1757 = vrot.lane.b32.xlu1 %v6554_v62, %s5267_s28 }
 0x1f9   : > { %3411 = vrot.lane.b32.xlu0 %v3069_v8, %s5267_s28  ;;  %4876 = vmatprep.mubr.msk.f32.mxu1 %vm1940_vm6, %v1913_v7 }
 0x1fa   : > { %v1730_v52 = vpop.permute.xlu1 %1729 }
 0x1fb   : > { %v1914_v36 = vsel %vm1177_vm5, %v1860_v23, %v1730_v52  ;;  %v3384_v40 = vpop.permute.xlu0 %3383  ;;  %v6588_v52 = vld [vmem:[#allocation2 + $0x20a] sm:$0xff] }
 0x1fc   : > { %v3595_v6 = vsel %vm1177_vm5, %v3541_v57, %v3384_v40  ;;  %1543 = vrot.lane.b32.xlu1 %v6565_v35, %s5265_s23  ;;  %4877 = vmatmul.mubr.msk.f32.gmra.mrb[30].mxu1 %vm1940_vm6, %v1914_v36  ;;  %v6590_v57 = vld [vmem:[#allocation2 + $0x170] sm:$0xff]  ;;  %v6600_v40 = vld [vmem:[#allocation2 + $0x180] sm:$0xff] }
 0x1fd   : > { %3413 = vrot.lane.b32.xlu0 %v3070_v34, %s5267_s28  ;;  %5007 = vmatprep.mubr.msk.f32.mxu0 %vm1940_vm6, %v3595_v6  ;;  %7612 = vst [vmem:[#allocation21_spill] sm:$0xff] %v6590_v57  ;;  %v3071_v36 = vld [vmem:[#allocation2 + $0x112] sm:$0xff]  ;;  %7613 = vst [vmem:[#allocation26_spill] sm:$0xff] %v6600_v40 }
 0x1fe   : > { %v1516_v8 = vpop.permute.xlu1 %1515 }
 0x1ff   : > { %v3386_v59 = vpop.permute.xlu0 %3385 }
 0x200   : > { %v3596_v7 = vsel %vm1177_vm5, %v3542_v61, %v3386_v59  ;;  %1545 = vrot.lane.b32.xlu1 %v6578_v46, %s5265_s23 }
 0x201   : > { %3199 = vrot.lane.b32.xlu0 %v6103_v22, %s5265_s23  ;;  %5008 = vmatmul.mubr.msk.f32.gmra.mrb[4].mxu0 %vm1940_vm6, %v3596_v7  ;;  %v1861_v22 = vsel %vm438_vm0, %v6590_v57, %v1516_v8  ;;  %v3072_v8 = vld [vmem:[#allocation2 + $0x122] sm:$0xff] }
 0x202   : > { %v1518_v23 = vpop.permute.xlu1 %1517 }
 0x203   : > { %v3172_v34 = vpop.permute.xlu0 %3171  ;;  %v1862_v59 = vsel %vm438_vm0, %v6600_v40, %v1518_v23  ;;  %v6620_v23 = vld [vmem:[#allocation2 + $0x229] sm:$0xff] }
 0x204   : > { %3201 = vrot.lane.b32.xlu1 %v6111_v30, %s5265_s23  ;;  %v6607_v30 = vld [vmem:[#allocation2 + $0x221] sm:$0xff]  ;;  %v3543_v57 = vsel %vm438_vm0, %v6261_v56, %v3172_v34 }
 0x205   : > { %1759 = vrot.lane.b32.xlu0 %v6588_v52, %s5267_s28 }
 0x206   : > { %v3174_v21 = vpop.permute.xlu1 %3173 }
 0x207   : > { %v1732_v6 = vpop.permute.xlu0 %1731  ;;  %v3544_v56 = vsel %vm438_vm0, %v6271_v50, %v3174_v21  ;;  %v6634_v50 = vld [vmem:[#allocation2 + $0x222] sm:$0xff] }
 0x208   : > { %v1915_v61 = vsel %vm1177_vm5, %v1861_v22, %v1732_v6  ;;  %1761 = vrot.lane.b32.xlu1 %v6596_v16, %s5267_s28 }
 0x209   : > { %3415 = vrot.lane.b32.xlu0 %v3071_v36, %s5267_s28  ;;  %4879 = vmatprep.mubr.msk.f32.mxu1 %vm1940_vm6, %v1915_v61 }
 0x20a   : > { %v1734_v7 = vpop.permute.xlu1 %1733 }
 0x20b   : > { %v1916_v22 = vsel %vm1177_vm5, %v1862_v59, %v1734_v7  ;;  %v3388_v6 = vpop.permute.xlu0 %3387  ;;  %v517_v59 = vld [vmem:[%s6298_s14 + $0x28] sm:$0xff] }
 0x20c   : > { %v3597_v15 = vsel %vm1177_vm5, %v3543_v57, %v3388_v6  ;;  %1547 = vrot.lane.b32.xlu1 %v6607_v30, %s5265_s23  ;;  %4880 = vmatmul.mubr.msk.f32.gmra.mrb[32].mxu1 %vm1940_vm6, %v1916_v22  ;;  %v516_v57 = vld [vmem:[%s6298_s14 + $0x20] sm:$0xff]  ;;  %526 = vst.msk [vmem:[#allocation2 + $0x268] sm:$0xff] %vm438_vm0, %v517_v59  ;;  %v6636_v7 = vld [vmem:[#allocation2 + $0x188] sm:$0xff]  ;;  %v6656_v59 = vld [vmem:[#allocation2 + $0x231] sm:$0xff] }
 0x20d   : > { %3417 = vrot.lane.b32.xlu0 %v3072_v8, %s5267_s28  ;;  %5010 = vmatprep.mubr.msk.f32.mxu0 %vm1940_vm6, %v3597_v15  ;;  %525 = vst.msk [vmem:[#allocation2 + $0x260] sm:$0xff] %vm438_vm0, %v516_v57  ;;  %7614 = vst [vmem:[#allocation63_spill] sm:$0xff] %v6636_v7  ;;  %v518_v8 = vld [vmem:[%s6298_s14 + $0x30] sm:$0xff] }
 0x20e   : > { %v1520_v36 = vpop.permute.xlu1 %1519  ;;  %527 = vst.msk [vmem:[#allocation2 + $0x270] sm:$0xff] %vm438_vm0, %v518_v8  ;;  %v3073_v6 = vld [vmem:[#allocation2 + $0x12a] sm:$0xff] }
 0x20f   : > { %v3390_v34 = vpop.permute.xlu0 %3389 }
 0x210   : > { %v3598_v61 = vsel %vm1177_vm5, %v3544_v56, %v3390_v34  ;;  %1549 = vrot.lane.b32.xlu1 %v6620_v23, %s5265_s23  ;;  %v1863_v56 = vsel %vm438_vm0, %v6636_v7, %v1520_v36  ;;  %v6648_v34 = vld [vmem:[#allocation2 + $0x190] sm:$0xff] }
 0x211   : > { %3203 = vrot.lane.b32.xlu0 %v6123_v4, %s5265_s23  ;;  %5011 = vmatmul.mubr.msk.f32.gmra.mrb[6].mxu0 %vm1940_vm6, %v3598_v61  ;;  %v6643_v4 = vld [vmem:[#allocation2 + $0x22a] sm:$0xff]  ;;  %v3074_v7 = vld [vmem:[#allocation2 + $0x132] sm:$0xff] }
 0x212   : > { %v1522_v15 = vpop.permute.xlu1 %1521 }
 0x213   : > { %v3176_v21 = vpop.permute.xlu0 %3175  ;;  %v1864_v36 = vsel %vm438_vm0, %v6648_v34, %v1522_v15  ;;  %v6670_v15 = vld [vmem:[#allocation2 + $0x241] sm:$0xff] }
 0x214   : > { %3205 = vrot.lane.b32.xlu1 %v6131_v60, %s5265_s23  ;;  %v519_v60 = vld [vmem:[%s6298_s14 + $0x38] sm:$0x3] }
 0x215   : > { %1763 = vrot.lane.b32.xlu0 %v6634_v50, %s5267_s28  ;;  %528 = vst.msk [vmem:[#allocation2 + $0x278] sm:$0x3] %vm442_vm1, %v519_v60  ;;  %v6682_v60 = vld [vmem:[#allocation2 + $0x1a0] sm:$0xff] }
 0x216   : > { %v3178_v22 = vpop.permute.xlu1 %3177  ;;  %7615 = vst [vmem:[#allocation64_spill] sm:$0xff] %v6682_v60 }
 0x217   : > { %v1736_v61 = vpop.permute.xlu0 %1735 }
 0x218   : > { %v1917_v57 = vsel %vm1177_vm5, %v1863_v56, %v1736_v61  ;;  %1765 = vrot.lane.b32.xlu1 %v6643_v4, %s5267_s28  ;;  %v3545_v56 = vsel %vm438_vm0, %v6282_v28, %v3176_v21  ;;  %v3546_v28 = vsel %vm438_vm0, %v6293_v48, %v3178_v22  ;;  %v6688_v48 = vld [vmem:[#allocation2 + $0x242] sm:$0xff] }
 0x219   : > { %3419 = vrot.lane.b32.xlu0 %v3073_v6, %s5267_s28  ;;  %4882 = vmatprep.mubr.msk.f32.mxu1 %vm1940_vm6, %v1917_v57 }
 0x21a   : > { %v1738_v8 = vpop.permute.xlu1 %1737 }
 0x21b   : > { %v1918_v61 = vsel %vm1177_vm5, %v1864_v36, %v1738_v8  ;;  %v3392_v40 = vpop.permute.xlu0 %3391  ;;  %v3075_v36 = vld [vmem:[#allocation2 + $0x142] sm:$0xff] }
 0x21c   : > { %v3599_v44 = vsel %vm1177_vm5, %v3545_v56, %v3392_v40  ;;  %1551 = vrot.lane.b32.xlu1 %v6656_v59, %s5265_s23  ;;  %4883 = vmatmul.mubr.msk.f32.gmra.mrb[34].mxu1 %vm1940_vm6, %v1918_v61  ;;  %v6692_v8 = vld [vmem:[#allocation2 + $0x1a8] sm:$0xff] }
 0x21d   : > { %3421 = vrot.lane.b32.xlu0 %v3074_v7, %s5267_s28  ;;  %5013 = vmatprep.mubr.msk.f32.mxu0 %vm1940_vm6, %v3599_v44  ;;  %v6680_v7 = vld [vmem:[#allocation2 + $0x232] sm:$0xff]  ;;  %7616 = vst [vmem:[#allocation65_spill] sm:$0xff] %v6692_v8 }
 0x21e   : > { %v1524_v6 = vpop.permute.xlu1 %1523 }
 0x21f   : > { %v3394_v21 = vpop.permute.xlu0 %3393 }
 0x220   : > { %v3600_v57 = vsel %vm1177_vm5, %v3546_v28, %v3394_v21  ;;  %1553 = vrot.lane.b32.xlu1 %v6670_v15, %s5265_s23 }
 0x221   : > { %3207 = vrot.lane.b32.xlu0 %v6147_v37, %s5265_s23  ;;  %5014 = vmatmul.mubr.msk.f32.gmra.mrb[8].mxu0 %vm1940_vm6, %v3600_v57  ;;  %v1865_v37 = vsel %vm438_vm0, %v6682_v60, %v1524_v6  ;;  %v3076_v57 = vld [vmem:[#allocation2 + $0x14a] sm:$0xff] }
 0x222   : > { %v1526_v40 = vpop.permute.xlu1 %1525 }
 0x223   : > { %v3180_v44 = vpop.permute.xlu0 %3179  ;;  %v1866_v28 = vsel %vm438_vm0, %v6692_v8, %v1526_v40  ;;  %v6712_v40 = vld [vmem:[#allocation2 + $0x251] sm:$0xff] }
 0x224   : > { %3209 = vrot.lane.b32.xlu1 %v6174_v32, %s5265_s23  ;;  %v6699_v32 = vld [vmem:[#allocation2 + $0x249] sm:$0xff]  ;;  %v3547_v6 = vsel %vm438_vm0, %v6314_v31, %v3180_v44 }
 0x225   : > { %1767 = vrot.lane.b32.xlu0 %v6680_v7, %s5267_s28 }
 0x226   : > { %v3182_v22 = vpop.permute.xlu1 %3181 }
 0x227   : > { %v1740_v56 = vpop.permute.xlu0 %1739  ;;  %v3548_v31 = vsel %vm438_vm0, %v6324_v39, %v3182_v22  ;;  %v6730_v39 = vld [vmem:[#allocation2 + $0x252] sm:$0xff] }
 0x228   : > { %v1919_v61 = vsel %vm1177_vm5, %v1865_v37, %v1740_v56  ;;  %1769 = vrot.lane.b32.xlu1 %v6688_v48, %s5267_s28 }
 0x229   : > { %3423 = vrot.lane.b32.xlu0 %v3075_v36, %s5267_s28  ;;  %4885 = vmatprep.mubr.msk.f32.mxu1 %vm1940_vm6, %v1919_v61 }
 0x22a   : > { %v1742_v21 = vpop.permute.xlu1 %1741 }
 0x22b   : > { %v1920_v60 = vsel %vm1177_vm5, %v1866_v28, %v1742_v21  ;;  %v3396_v37 = vpop.permute.xlu0 %3395  ;;  %v6722_v28 = vld [vmem:[#allocation2 + $0x24a] sm:$0xff] }
 0x22c   : > { %v3601_v56 = vsel %vm1177_vm5, %v3547_v6, %v3396_v37  ;;  %1555 = vrot.lane.b32.xlu1 %v6699_v32, %s5265_s23  ;;  %4886 = vmatmul.mubr.msk.f32.gmra.mrb[36].mxu1 %vm1940_vm6, %v1920_v60  ;;  %v3077_v6 = vld [vmem:[#allocation2 + $0x152] sm:$0xff]  ;;  %v6734_v37 = vld [vmem:[#allocation2 + $0x1c0] sm:$0xff] }
 0x22d   : > { %3425 = vrot.lane.b32.xlu0 %v3076_v57, %s5267_s28  ;;  %5016 = vmatprep.mubr.msk.f32.mxu0 %vm1940_vm6, %v3601_v56  ;;  %v6724_v57 = vld [vmem:[#allocation2 + $0x1b0] sm:$0xff] }
 0x22e   : > { %v1528_v36 = vpop.permute.xlu1 %1527  ;;  %7617 = vst [vmem:[#allocation66_spill] sm:$0xff] %v6724_v57 }
 0x22f   : > { %v3398_v44 = vpop.permute.xlu0 %3397 }
 0x230   : > { %v3602_v61 = vsel %vm1177_vm5, %v3548_v31, %v3398_v44  ;;  %1557 = vrot.lane.b32.xlu1 %v6712_v40, %s5265_s23 }
 0x231   : > { %3211 = vrot.lane.b32.xlu0 %v6183_v18, %s5265_s23  ;;  %5017 = vmatmul.mubr.msk.f32.gmra.mrb[10].mxu0 %vm1940_vm6, %v3602_v61  ;;  %v1867_v18 = vsel %vm438_vm0, %v6724_v57, %v1528_v36  ;;  %v3078_v61 = vld [vmem:[#allocation2 + $0x162] sm:$0xff] }
 0x232   : > { %v1530_v60 = vpop.permute.xlu1 %1529 }
 0x233   : > { %v3184_v21 = vpop.permute.xlu0 %3183 }
 0x234   : > { %3213 = vrot.lane.b32.xlu1 %v6214_v19, %s5265_s23  ;;  %v1868_v19 = vsel %vm438_vm0, %v6734_v37, %v1530_v60  ;;  %v3549_v36 = vsel %vm438_vm0, %v6335_v10, %v3184_v21  ;;  %v3079_v60 = vld [vmem:[#allocation2 + $0x16a] sm:$0xff] }
 0x235   : > { %1771 = vrot.lane.b32.xlu0 %v6722_v28, %s5267_s28 }
 0x236   : > { %v3186_v22 = vpop.permute.xlu1 %3185 }
 0x237   : > { %v1744_v56 = vpop.permute.xlu0 %1743 }
 0x238   : > { %v1921_v31 = vsel %vm1177_vm5, %v1867_v18, %v1744_v56  ;;  %1773 = vrot.lane.b32.xlu1 %v6730_v39, %s5267_s28  ;;  %v3550_v56 = vsel %vm438_vm0, %v6346_v63, %v3186_v22  ;;  %v3081_v22 = vld [vmem:[#allocation2 + $0x182] sm:$0xff] }
 0x239   : > { %3427 = vrot.lane.b32.xlu0 %v3077_v6, %s5267_s28  ;;  %4888 = vmatprep.mubr.msk.f32.mxu1 %vm1940_vm6, %v1921_v31  ;;  %v6759_v31 = vld [vmem:[#allocation2 + $0x1c8] sm:$0xff] }
 0x23a   : > { %v1746_v44 = vpop.permute.xlu1 %1745 }
 0x23b   : > { %v1922_v57 = vsel %vm1177_vm5, %v1868_v19, %v1746_v44  ;;  %v3400_v8 = vpop.permute.xlu0 %3399 }
 0x23c   : > { %v3603_v18 = vsel %vm1177_vm5, %v3549_v36, %v3400_v8  ;;  %3215 = vrot.lane.b32.xlu1 %v6225_v29, %s5265_s23  ;;  %4889 = vmatmul.mubr.msk.f32.gmra.mrb[38].mxu1 %vm1940_vm6, %v1922_v57  ;;  %v3080_v8 = vld [vmem:[#allocation2 + $0x172] sm:$0xff] }
 0x23d   : > { %3429 = vrot.lane.b32.xlu0 %v3078_v61, %s5267_s28  ;;  %5019 = vmatprep.mubr.msk.f32.mxu0 %vm1940_vm6, %v3603_v18  ;;  %v6770_v61 = vld [vmem:[#allocation2 + $0x1d0] sm:$0xff] }
 0x23e   : > { %v1532_v6 = vpop.permute.xlu1 %1531 }
 0x23f   : > { %v3402_v10 = vpop.permute.xlu0 %3401 }
 0x240   : > { %v3604_v21 = vsel %vm1177_vm5, %v3550_v56, %v3402_v10  ;;  %3431 = vrot.lane.b32.xlu1 %v3079_v60, %s5267_s28  ;;  %v3082_v56 = vld [vmem:[#allocation2 + $0x18a] sm:$0xff] }
 0x241   : > { %3217 = vrot.lane.b32.xlu0 %v6256_v27, %s5265_s23  ;;  %5020 = vmatmul.mubr.msk.f32.gmra.mrb[12].mxu0 %vm1940_vm6, %v3604_v21  ;;  %v1869_v27 = vsel %vm438_vm0, %v6759_v31, %v1532_v6 }
 0x242   : > { %v1534_v29 = vpop.permute.xlu1 %1533 }
 0x243   : > { %v3188_v57 = vpop.permute.xlu0 %3187 }
 0x244   : > { %v6761_v19 = vpop.f32.mrb[0].mxu1  ;;  %3219 = vrot.lane.b32.xlu1 %v6267_v58, %s5265_s23  ;;  %v1870_v58 = vsel %vm438_vm0, %v6770_v61, %v1534_v29  ;;  %v3551_v6 = vsel %vm438_vm0, %v6360_v11, %v3188_v57  ;;  %v3083_v29 = vld [vmem:[#allocation2 + $0x192] sm:$0xff] }
 0x245   : > { %v6765_v63 = vpop.f32.mrb[1].mxu1  ;;  %3433 = vrot.lane.b32.xlu0 %v3080_v8, %s5267_s28 }
 0x246   : > { %v3190_v44 = vpop.permute.xlu1 %3189 }
 0x247   : > { %v1748_v36 = vpop.permute.xlu0 %1747  ;;  %v3552_v57 = vsel %vm438_vm0, %v6370_v47, %v3190_v44 }
 0x248   : > { %v1923_v18 = vsel %vm1177_vm5, %v1869_v27, %v1748_v36  ;;  %3435 = vrot.lane.b32.xlu1 %v3081_v22, %s5267_s28 }
 0x249   : > { %3221 = vrot.lane.b32.xlu0 %v6306_v12, %s5265_s23  ;;  %4891 = vmatprep.mubr.msk.f32.mxu1 %vm1940_vm6, %v1923_v18 }
 0x24a   : > { %v1750_v60 = vpop.permute.xlu1 %1749 }
 0x24b   : > { %v1924_v10 = vsel %vm1177_vm5, %v1870_v58, %v1750_v60  ;;  %v3404_v21 = vpop.permute.xlu0 %3403  ;;  %v6799_v58 = vld [vmem:[#allocation2 + $0x1e0] sm:$0xff] }
 0x24c   : > { %v3605_v8 = vsel %vm1177_vm5, %v3551_v6, %v3404_v21  ;;  %v6783_v27 = vpop.f32.mrb[2].mxu1  ;;  %3223 = vrot.lane.b32.xlu1 %v6320_v3, %s5265_s23  ;;  %4892 = vmatmul.mubr.msk.f32.gmra.mrb[40].mxu1 %vm1940_vm6, %v1924_v10 }
 0x24d   : > { %v6788_v12 = vpop.f32.mrb[3].mxu1  ;;  %3437 = vrot.lane.b32.xlu0 %v3082_v56, %s5267_s28  ;;  %5022 = vmatprep.mubr.msk.f32.mxu0 %vm1940_vm6, %v3605_v8  ;;  %v6811_v56 = vld [vmem:[#allocation2 + $0x1e8] sm:$0xff] }
 0x24e   : > { %v1536_v11 = vpop.permute.xlu1 %1535 }
 0x24f   : > { %v3406_v22 = vpop.permute.xlu0 %3405 }
 0x250   : > { %v3606_v36 = vsel %vm1177_vm5, %v3552_v57, %v3406_v22  ;;  %3439 = vrot.lane.b32.xlu1 %v3083_v29, %s5267_s28 }
 0x251   : > { %3225 = vrot.lane.b32.xlu0 %v6354_v17, %s5265_s23  ;;  %5023 = vmatmul.mubr.msk.f32.gmra.mrb[14].mxu0 %vm1940_vm6, %v3606_v36  ;;  %v1871_v17 = vsel %vm438_vm0, %v6799_v58, %v1536_v11 }
 0x252   : > { %v1538_v3 = vpop.permute.xlu1 %1537 }
 0x253   : > { %v3192_v18 = vpop.permute.xlu0 %3191 }
 0x254   : > { %v6801_v60 = vpop.f32.mrb[4].mxu1  ;;  %3227 = vrot.lane.b32.xlu1 %v6366_v43, %s5265_s23  ;;  %v1872_v43 = vsel %vm438_vm0, %v6811_v56, %v1538_v3  ;;  %v3553_v21 = vsel %vm438_vm0, %v6383_v20, %v3192_v18 }
 0x255   : > { %v6805_v47 = vpop.f32.mrb[5].mxu1  ;;  %3441 = vrot.lane.b32.xlu0 %v6380_v38, %s5267_s28 }
 0x256   : > { %v3194_v44 = vpop.permute.xlu1 %3193 }
 0x257   : > { %v1752_v6 = vpop.permute.xlu0 %1751 }
 0x258   : > { %v1925_v10 = vsel %vm1177_vm5, %v1871_v17, %v1752_v6  ;;  %3443 = vrot.lane.b32.xlu1 %v6390_v25, %s5267_s28 }
 0x259   : > { %3229 = vrot.lane.b32.xlu0 %v6401_v55, %s5265_s23  ;;  %4894 = vmatprep.mubr.msk.f32.mxu1 %vm1940_vm6, %v1925_v10  ;;  %v3554_v55 = vsel %vm438_vm0, %v6394_v33, %v3194_v44  ;;  %v6855_v44 = vld [vmem:[#allocation2 + $0x200] sm:$0xff] }
 0x25a   : > { %v1754_v38 = vpop.permute.xlu1 %1753 }
 0x25b   : > { %v1926_v8 = vsel %vm1177_vm5, %v1872_v43, %v1754_v38  ;;  %v3408_v29 = vpop.permute.xlu0 %3407 }
 0x25c   : > { %v3607_v11 = vsel %vm1177_vm5, %v3553_v21, %v3408_v29  ;;  %v6825_v57 = vpop.f32.mrb[6].mxu1  ;;  %3231 = vrot.lane.b32.xlu1 %v6412_v14, %s5265_s23  ;;  %4895 = vmatmul.mubr.msk.f32.gmra.mrb[42].mxu1 %vm1940_vm6, %v1926_v8 }
 0x25d   : > { %v6830_v25 = vpop.f32.mrb[7].mxu1  ;;  %3445 = vrot.lane.b32.xlu0 %v6426_v13, %s5267_s28  ;;  %5025 = vmatprep.mubr.msk.f32.mxu0 %vm1940_vm6, %v3607_v11  ;;  %v6843_v13 = vld [vmem:[#allocation2 + $0x1f0] sm:$0xff] }
 0x25e   : > { %v1540_v20 = vpop.permute.xlu1 %1539 }
 0x25f   : > { %v3410_v22 = vpop.permute.xlu0 %3409 }
 0x260   : > { %v3608_v36 = vsel %vm1177_vm5, %v3554_v55, %v3410_v22  ;;  %3447 = vrot.lane.b32.xlu1 %v6436_v45, %s5267_s28  ;;  %v6899_v22 = vld [vmem:[#allocation2 + $0x210] sm:$0xff] }
 0x261   : > { %3233 = vrot.lane.b32.xlu0 %v6447_v1, %s5265_s23  ;;  %5026 = vmatmul.mubr.msk.f32.gmra.mrb[16].mxu0 %vm1940_vm6, %v3608_v36  ;;  %v1873_v1 = vsel %vm438_vm0, %v6843_v13, %v1540_v20 }
 0x262   : > { %v1542_v14 = vpop.permute.xlu1 %1541 }
 0x263   : > { %v3196_v3 = vpop.permute.xlu0 %3195 }
 0x264   : > { %v6845_v18 = vpop.f32.mrb[8].mxu1  ;;  %3235 = vrot.lane.b32.xlu1 %v6458_v9, %s5265_s23  ;;  %v1874_v9 = vsel %vm438_vm0, %v6855_v44, %v1542_v14  ;;  %v3555_v10 = vsel %vm438_vm0, %v6406_v54, %v3196_v3  ;;  %v7618_v3 = vld [vmem:[#allocation12_spill] sm:$0xff] }
 0x265   : > { %v6849_v33 = vpop.f32.mrb[9].mxu1  ;;  %3449 = vrot.lane.b32.xlu0 %v6468_v24, %s5267_s28 }
 0x266   : > { %v3198_v45 = vpop.permute.xlu1 %3197 }
 0x267   : > { %v1756_v17 = vpop.permute.xlu0 %1755 }
 0x268   : > { %v1927_v6 = vsel %vm1177_vm5, %v1873_v1, %v1756_v17  ;;  %3451 = vrot.lane.b32.xlu1 %v6476_v41, %s5267_s28 }
 0x269   : > { %3237 = vrot.lane.b32.xlu0 %v6485_v42, %s5265_s23  ;;  %4897 = vmatprep.mubr.msk.f32.mxu1 %vm1940_vm6, %v1927_v6  ;;  %v3556_v42 = vsel %vm438_vm0, %v6416_v2, %v3198_v45 }
 0x26a   : > { %v1758_v24 = vpop.permute.xlu1 %1757 }
 0x26b   : > { %v1928_v43 = vsel %vm1177_vm5, %v1874_v9, %v1758_v24  ;;  %v3412_v38 = vpop.permute.xlu0 %3411  ;;  %v7619_v24 = vld [vmem:[#allocation11_spill] sm:$0xff] }
 0x26c   : > { %v3609_v21 = vsel %vm1177_vm5, %v3555_v10, %v3412_v38  ;;  %v6869_v8 = vpop.f32.mrb[10].mxu1  ;;  %3239 = vrot.lane.b32.xlu1 %v6497_v5, %s5265_s23  ;;  %4898 = vmatmul.mubr.msk.f32.gmra.mrb[44].mxu1 %vm1940_vm6, %v1928_v43 }
 0x26d   : > { %v6874_v41 = vpop.f32.mrb[11].mxu1  ;;  %3453 = vrot.lane.b32.xlu0 %v6507_v53, %s5267_s28  ;;  %5028 = vmatprep.mubr.msk.f32.mxu0 %vm1940_vm6, %v3609_v21  ;;  %v6887_v53 = vld [vmem:[#allocation2 + $0x208] sm:$0xff] }
 0x26e   : > { %v1544_v54 = vpop.permute.xlu1 %1543 }
 0x26f   : > { %v3414_v29 = vpop.permute.xlu0 %3413 }
 0x270   : > { %v3610_v11 = vsel %vm1177_vm5, %v3556_v42, %v3414_v29  ;;  %3455 = vrot.lane.b32.xlu1 %v6515_v0, %s5267_s28  ;;  %v6943_v29 = vld [vmem:[#allocation2 + $0x228] sm:$0xff] }
 0x271   : > { %3241 = vrot.lane.b32.xlu0 %v6524_v51, %s5265_s23  ;;  %5029 = vmatmul.mubr.msk.f32.gmra.mrb[18].mxu0 %vm1940_vm6, %v3610_v11  ;;  %v1875_v51 = vsel %vm438_vm0, %v6887_v53, %v1544_v54 }
 0x272   : > { %v1546_v5 = vpop.permute.xlu1 %1545 }
 0x273   : > { %v3200_v20 = vpop.permute.xlu0 %3199 }
 0x274   : > { %v6889_v55 = vpop.f32.mrb[12].mxu1  ;;  %3243 = vrot.lane.b32.xlu1 %v6536_v26, %s5265_s23  ;;  %v1876_v26 = vsel %vm438_vm0, %v6899_v22, %v1546_v5  ;;  %v3557_v45 = vsel %vm438_vm0, %v7618_v3, %v3200_v20  ;;  %v7620_v20 = vld [vmem:[#allocation15_spill] sm:$0xff] }
 0x275   : > { %v6893_v2 = vpop.f32.mrb[13].mxu1  ;;  %3457 = vrot.lane.b32.xlu0 %v6546_v49, %s5267_s28 }
 0x276   : > { %v3202_v0 = vpop.permute.xlu1 %3201 }
 0x277   : > { %v1760_v36 = vpop.permute.xlu0 %1759  ;;  %v3558_v10 = vsel %vm438_vm0, %v7619_v24, %v3202_v0 }
 0x278   : > { %v1929_v14 = vsel %vm1177_vm5, %v1875_v51, %v1760_v36  ;;  %3459 = vrot.lane.b32.xlu1 %v6554_v62, %s5267_s28 }
 0x279   : > { %3245 = vrot.lane.b32.xlu0 %v6565_v35, %s5265_s23  ;;  %4900 = vmatprep.mubr.msk.f32.mxu1 %vm1940_vm6, %v1929_v14 }
 0x27a   : > { %v1762_v49 = vpop.permute.xlu1 %1761 }
 0x27b   : > { %v1930_v1 = vsel %vm1177_vm5, %v1876_v26, %v1762_v49  ;;  %v3416_v17 = vpop.permute.xlu0 %3415  ;;  %v7621_v49 = vld [vmem:[#allocation13_spill] sm:$0xff] }
 0x27c   : > { %v3611_v6 = vsel %vm1177_vm5, %v3557_v45, %v3416_v17  ;;  %v6913_v9 = vpop.f32.mrb[14].mxu1  ;;  %3247 = vrot.lane.b32.xlu1 %v6578_v46, %s5265_s23  ;;  %4901 = vmatmul.mubr.msk.f32.gmra.mrb[46].mxu1 %vm1940_vm6, %v1930_v1 }
 0x27d   : > { %v6918_v62 = vpop.f32.mrb[15].mxu1  ;;  %3461 = vrot.lane.b32.xlu0 %v6588_v52, %s5267_s28  ;;  %5031 = vmatprep.mubr.msk.f32.mxu0 %vm1940_vm6, %v3611_v6  ;;  %v6931_v52 = vld [vmem:[#allocation2 + $0x220] sm:$0xff]  ;;  %v6975_v6 = vld [vmem:[#allocation2 + $0x230] sm:$0xff] }
 0x27e   : > { %v1548_v35 = vpop.permute.xlu1 %1547 }
 0x27f   : > { %v3418_v43 = vpop.permute.xlu0 %3417 }
 0x280   : > { %v3612_v38 = vsel %vm1177_vm5, %v3558_v10, %v3418_v43  ;;  %3463 = vrot.lane.b32.xlu1 %v6596_v16, %s5267_s28  ;;  %v3048_v10 = vld [vmem:[#allocation2 + $0x261] sm:$0xff] }
 0x281   : > { %3249 = vrot.lane.b32.xlu0 %v6607_v30, %s5265_s23  ;;  %5032 = vmatmul.mubr.msk.f32.gmra.mrb[20].mxu0 %vm1940_vm6, %v3612_v38  ;;  %v1877_v30 = vsel %vm438_vm0, %v6931_v52, %v1548_v35  ;;  %v6987_v43 = vld [vmem:[#allocation2 + $0x240] sm:$0xff] }
 0x282   : > { %v1550_v46 = vpop.permute.xlu1 %1549 }
 0x283   : > { %v3204_v21 = vpop.permute.xlu0 %3203 }
 0x284   : > { %v6933_v54 = vpop.f32.mrb[16].mxu1  ;;  %3251 = vrot.lane.b32.xlu1 %v6620_v23, %s5265_s23  ;;  %v1878_v23 = vsel %vm438_vm0, %v6943_v29, %v1550_v46  ;;  %v3559_v0 = vsel %vm438_vm0, %v7620_v20, %v3204_v21  ;;  %v2967_v46 = vld [vmem:[#allocation2 + $0x140] sm:$0xff] }
 0x285   : > { %v6937_v42 = vpop.f32.mrb[17].mxu1  ;;  %3465 = vrot.lane.b32.xlu0 %v6634_v50, %s5267_s28 }
 0x286   : > { %v3206_v16 = vpop.permute.xlu1 %3205 }
 0x287   : > { %v1764_v11 = vpop.permute.xlu0 %1763  ;;  %v3560_v3 = vsel %vm438_vm0, %v7621_v49, %v3206_v16 }
 0x288   : > { %v1931_v5 = vsel %vm1177_vm5, %v1877_v30, %v1764_v11  ;;  %3467 = vrot.lane.b32.xlu1 %v6643_v4, %s5267_s28  ;;  %v3102_v30 = vld [vmem:[#allocation2 + $0x262] sm:$0xff] }
 0x289   : > { %3253 = vrot.lane.b32.xlu0 %v6656_v59, %s5265_s23  ;;  %4903 = vmatprep.mubr.msk.f32.mxu1 %vm1940_vm6, %v1931_v5 }
 0x28a   : > { %v1766_v50 = vpop.permute.xlu1 %1765 }
 0x28b   : > { %v1932_v51 = vsel %vm1177_vm5, %v1878_v23, %v1766_v50  ;;  %v3420_v36 = vpop.permute.xlu0 %3419 }
 0x28c   : > { %v3613_v14 = vsel %vm1177_vm5, %v3559_v0, %v3420_v36  ;;  %v6957_v26 = vpop.f32.mrb[18].mxu1  ;;  %3255 = vrot.lane.b32.xlu1 %v6670_v15, %s5265_s23  ;;  %4904 = vmatmul.mubr.msk.f32.gmra.mrb[48].mxu1 %vm1940_vm6, %v1932_v51  ;;  %v3103_v0 = vld [vmem:[#allocation2 + $0x26a] sm:$0xff] }
 0x28d   : > { %v6962_v4 = vpop.f32.mrb[19].mxu1  ;;  %3469 = vrot.lane.b32.xlu0 %v6680_v7, %s5267_s28  ;;  %5034 = vmatprep.mubr.msk.f32.mxu0 %vm1940_vm6, %v3613_v14  ;;  %v3050_v36 = vld [vmem:[#allocation2 + $0x271] sm:$0xff]  ;;  %v7622_v14 = vld [vmem:[#allocation19_spill] sm:$0xff] }
 0x28e   : > { %v1552_v59 = vpop.permute.xlu1 %1551 }
 0x28f   : > { %v3422_v45 = vpop.permute.xlu0 %3421 }
 0x290   : > { %v3614_v1 = vsel %vm1177_vm5, %v3560_v3, %v3422_v45  ;;  %3471 = vrot.lane.b32.xlu1 %v6688_v48, %s5267_s28  ;;  %v3104_v45 = vld [vmem:[#allocation2 + $0x272] sm:$0xff] }
 0x291   : > { %3257 = vrot.lane.b32.xlu0 %v6699_v32, %s5265_s23  ;;  %5035 = vmatmul.mubr.msk.f32.gmra.mrb[22].mxu0 %vm1940_vm6, %v3614_v1  ;;  %v1879_v32 = vsel %vm438_vm0, %v6975_v6, %v1552_v59 }
 0x292   : > { %v1554_v15 = vpop.permute.xlu1 %1553 }
 0x293   : > { %v3208_v17 = vpop.permute.xlu0 %3207 }
 0x294   : > { %v6977_v35 = vpop.f32.mrb[20].mxu1  ;;  %3259 = vrot.lane.b32.xlu1 %v6712_v40, %s5265_s23  ;;  %v3049_v40 = vld [vmem:[#allocation2 + $0x269] sm:$0xff]  ;;  %v3561_v11 = vsel %vm438_vm0, %v2967_v46, %v3208_v17 }
 0x295   : > { %v6981_v24 = vpop.f32.mrb[21].mxu1  ;;  %3473 = vrot.lane.b32.xlu0 %v6722_v28, %s5267_s28  ;;  %v1880_v28 = vsel %vm438_vm0, %v6987_v43, %v1554_v15  ;;  %v7013_v17 = vld [vmem:[#allocation2 + $0x248] sm:$0xff]  ;;  %v7024_v46 = vld [vmem:[#allocation2 + $0x250] sm:$0xff] }
 0x296   : > { %v3210_v48 = vpop.permute.xlu1 %3209 }
 0x297   : > { %v1768_v38 = vpop.permute.xlu0 %1767  ;;  %v3562_v59 = vsel %vm438_vm0, %v7622_v14, %v3210_v48  ;;  %v7624_v14 = vld [vmem:[#allocation47_spill] sm:$0xff] }
 0x298   : > { %v1933_v21 = vsel %vm1177_vm5, %v1879_v32, %v1768_v38  ;;  %3475 = vrot.lane.b32.xlu1 %v6730_v39, %s5267_s28 }
 0x299   : > { %3261 = vrot.lane.b32.xlu0 %v3048_v10, %s5265_s23  ;;  %4906 = vmatprep.mubr.msk.f32.mxu1 %vm1940_vm6, %v1933_v21 }
 0x29a   : > { %v1770_v16 = vpop.permute.xlu1 %1769 }
 0x29b   : > { %v1934_v5 = vsel %vm1177_vm5, %v1880_v28, %v1770_v16  ;;  %v3424_v23 = vpop.permute.xlu0 %3423  ;;  %v2969_v28 = vld [vmem:[#allocation2 + $0x150] sm:$0xff] }
 0x29c   : > { %v3615_v50 = vsel %vm1177_vm5, %v3561_v11, %v3424_v23  ;;  %v6999_v20 = vpop.f32.mrb[22].mxu1  ;;  %3263 = vrot.lane.b32.xlu1 %v3049_v40, %s5265_s23  ;;  %4907 = vmatmul.mubr.msk.f32.gmra.mrb[50].mxu1 %vm1940_vm6, %v1934_v5  ;;  %v557_v40 = vld [vmem:[#allocation2 + $0x128] sm:$0xff]  ;;  %v558_v5 = vld [vmem:[#allocation2 + $0x130] sm:$0xff] }
 0x29d   : > { %v7003_v39 = vpop.f32.mrb[23].mxu1  ;;  %3477 = vrot.lane.b32.xlu0 %v3102_v30, %s5267_s28  ;;  %5037 = vmatprep.mubr.msk.f32.mxu0 %vm1940_vm6, %v3615_v50  ;;  %v7623_v23 = vld [vmem:[#allocation16_spill] sm:$0xff] }
 0x29e   : > { %v1556_v51 = vpop.permute.xlu1 %1555 }
 0x29f   : > { %v3426_v49 = vpop.permute.xlu0 %3425  ;;  %v1881_v38 = vsel %vm438_vm0, %v7013_v17, %v1556_v51 }
 0x2a0   : > { %v3616_v3 = vsel %vm1177_vm5, %v3562_v59, %v3426_v49  ;;  %3479 = vrot.lane.b32.xlu1 %v3103_v0, %s5267_s28 }
 0x2a1   : > { %3265 = vrot.lane.b32.xlu0 %v3050_v36, %s5265_s23  ;;  %5038 = vmatmul.mubr.msk.f32.gmra.mrb[24].mxu0 %vm1940_vm6, %v3616_v3  ;;  %v559_v36 = vld [vmem:[#allocation2 + $0x140] sm:$0xff]  ;;  %v7625_v3 = vld [vmem:[#allocation14_spill] sm:$0xff]  ;;  %s7084_s23 = scalar_lea.vmem %s7487_s4, %s5212_s19 }
 0x2a2   : > { %v1558_v1 = vpop.permute.xlu1 %1557 }
 0x2a3   : > { %v3212_v15 = vpop.permute.xlu0 %3211  ;;  %v1882_v30 = vsel %vm438_vm0, %v7024_v46, %v1558_v1 }
 0x2a4   : > { %v7015_v10 = vpop.f32.mrb[24].mxu1  ;;  %3481 = vrot.lane.b32.xlu1 %v3104_v45, %s5267_s28  ;;  %v3563_v50 = vsel %vm438_vm0, %v2969_v28, %v3212_v15  ;;  %v1152_v45 = vsel %vm438_vm0, %v558_v5, %v7625_v3  ;;  %v560_v15 = vld [vmem:[#allocation2 + $0x148] sm:$0xff]  ;;  %v562_v3 = vld [vmem:[#allocation2 + $0x160] sm:$0xff] }
 0x2a5   : > { %v7018_v32 = vpop.f32.mrb[25].mxu1  ;;  %1067 = vrot.lane.b32.xlu0 %v6680_v7, %s5267_s28  ;;  %v1151_v7 = vsel %vm438_vm0, %v557_v40, %v7623_v23  ;;  %v7627_v40 = vld [vmem:[#allocation46_spill] sm:$0xff] }
 0x2a6   : > { %v3214_v48 = vpop.permute.xlu1 %3213  ;;  %v1206_v59 = vsel %vm1177_vm5, %v1151_v7, %v7624_v14  ;;  %v1207_v28 = vsel %vm1177_vm5, %v1152_v45, %v7627_v40  ;;  %v561_v7 = vld [vmem:[#allocation2 + $0x150] sm:$0xff]  ;;  %v7631_v14 = vld [vmem:[#allocation23_spill] sm:$0xff]  ;;  %v7632_v45 = vld [vmem:[#allocation24_spill] sm:$0xff] }
 0x2a7   : > { %v1772_v21 = vpop.permute.xlu0 %1771 }
 0x2a8   : > { %v1935_v16 = vsel %vm1177_vm5, %v1881_v38, %v1772_v21  ;;  %v7626_v38 = vld [vmem:[#allocation20_spill] sm:$0xff] }
 0x2a9   : > { %4909 = vmatprep.mubr.msk.f32.mxu1 %vm1940_vm6, %v1935_v16  ;;  %v1153_v21 = vsel %vm438_vm0, %v559_v36, %v7626_v38  ;;  %v7628_v16 = vld [vmem:[#allocation17_spill] sm:$0xff]  ;;  %v7630_v36 = vld [vmem:[#allocation18_spill] sm:$0xff]  ;;  %v1155_v38 = vsel %vm438_vm0, %v561_v7, %v7632_v45 }
 0x2aa   : > { %v1774_v11 = vpop.permute.xlu1 %1773  ;;  %v7637_v45 = vld [vmem:[#allocation50_spill] sm:$0xff] }
 0x2ab   : > { %v1936_v0 = vsel %vm1177_vm5, %v1882_v30, %v1774_v11  ;;  %v3428_v51 = vpop.permute.xlu0 %3427  ;;  %v3564_v30 = vsel %vm438_vm0, %v7628_v16, %v3214_v48  ;;  %v1154_v48 = vsel %vm438_vm0, %v560_v15, %v7630_v36 }
 0x2ac   : > { %v3617_v49 = vsel %vm1177_vm5, %v3563_v50, %v3428_v51  ;;  %4910 = vmatmul.mubr.msk.f32.gmra.mrb[52].mxu1 %vm1940_vm6, %v1936_v0  ;;  %v7629_v50 = vld [vmem:[#allocation49_spill] sm:$0xff] }
 0x2ad   : > { %5040 = vmatprep.mubr.msk.f32.mxu0 %vm1940_vm6, %v3617_v49  ;;  %4958 = vmatprep.mubr.msk.f32.mxu1 %vm1940_vm6, %v1206_v59  ;;  %v1208_v0 = vsel %vm1177_vm5, %v1153_v21, %v7629_v50  ;;  %v7633_v21 = vld [vmem:[#allocation48_spill] sm:$0xff] }
 0x2ae   : > { %v3216_v1 = vpop.permute.xlu1 %3215  ;;  %v1209_v40 = vsel %vm1177_vm5, %v1154_v48, %v7633_v21  ;;  %v7638_v21 = vld [vmem:[#allocation21_spill] sm:$0xff] }
 0x2af   : > { %v3430_v11 = vpop.permute.xlu0 %3429  ;;  %v7048_v23 = vpop.f32.mrb[26].mxu1  ;;  %v3565_v59 = vsel %vm438_vm0, %v7631_v14, %v3216_v1  ;;  %v7073_v1 = vld [vmem:[%s7486_s3] ss:$0 sm:$0xff] }
 0x2b0   : > { %v3618_v5 = vsel %vm1177_vm5, %v3564_v30, %v3430_v11  ;;  %v7053_v51 = vpop.f32.mrb[27].mxu1  ;;  %4959 = vmatmul.mubr.msk.f32.vlgmr.msra.gmra.mrb[28].mxu1 %vm1940_vm6, %v1207_v28  ;;  %v563_v30 = vld [vmem:[#allocation2 + $0x168] sm:$0xff]  ;;  %v7634_v11 = vld [vmem:[#allocation51_spill] sm:$0xff] }
 0x2b1   : > { %5041 = vmatmul.mubr.msk.f32.gmra.mrb[26].mxu0 %vm1940_vm6, %v3618_v5  ;;  %4961 = vmatprep.mubr.msk.f32.mxu1 %vm1940_vm6, %v1208_v0  ;;  %v1210_v50 = vsel %vm1177_vm5, %v1155_v38, %v7634_v11  ;;  %v7635_v5 = vld [vmem:[#allocation22_spill] sm:$0xff]  ;;  %v565_v11 = vld [vmem:[#allocation2 + $0x180] sm:$0xff] }
 0x2b2   : > { %v3432_v49 = vpop.permute.xlu1 %3431  ;;  %v1156_v36 = vsel %vm438_vm0, %v562_v3, %v7635_v5 }
 0x2b3   : > { %v3619_v28 = vsel %vm1177_vm5, %v3565_v59, %v3432_v49  ;;  %v3218_v16 = vpop.permute.xlu0 %3217  ;;  %v564_v59 = vld [vmem:[#allocation2 + $0x170] sm:$0xff]  ;;  %v7636_v49 = vld [vmem:[#allocation27_spill] sm:$0xff]  ;;  %v1211_v38 = vsel %vm1177_vm5, %v1156_v36, %v7637_v45  ;;  %v7643_v45 = vld [vmem:[#allocation52_spill] sm:$0xff] }
 0x2b4   : > { %v5003_v15 = vpop.f32.mrb[0].mxu0  ;;  %4962 = vmatmul.mubr.msk.f32.gmra.mrb[30].mxu1 %vm1940_vm6, %v1209_v40  ;;  %5043 = vmatprep.mubr.msk.f32.mxu0 %vm1940_vm6, %v3619_v28  ;;  %v3566_v3 = vsel %vm438_vm0, %v7638_v21, %v3218_v16  ;;  %v7640_v16 = vld [vmem:[#allocation25_spill] sm:$0xff] }
 0x2b5   : > { %v5102_v7 = vadd.f32 %v5003_v15, %v6761_v19  ;;  %v3879_v0 = vpop.f32.mrb[1].mxu0  ;;  %4964 = vmatprep.mubr.msk.f32.mxu1 %vm1940_vm6, %v1210_v50  ;;  %v1157_v19 = vsel %vm438_vm0, %v563_v30, %v7636_v49  ;;  %v7639_v50 = vld [vmem:[#allocation53_spill] sm:$0xff]  ;;  %v1158_v30 = vsel %vm438_vm0, %v564_v59, %v7640_v16  ;;  %v7647_v16 = vld [vmem:[#allocation4_spill] sm:$0xff] }
 0x2b6   : > { %v5103_v48 = vadd.f32 %v3879_v0, %v6765_v63  ;;  %v3220_v14 = vpop.permute.xlu1 %3219  ;;  %v1212_v15 = vsel %vm1177_vm5, %v1157_v19, %v7639_v50  ;;  %v7642_v49 = vld [vmem:[#allocation29_spill] sm:$0xff] }
 0x2b7   : > { %v4210_v40 = vadd.f32 %v5102_v7, %v7073_v1  ;;  %v3434_v28 = vpop.permute.xlu0 %3433  ;;  %v7641_v7 = vld [vmem:[#allocation26_spill] sm:$0xff]  ;;  %v1159_v19 = vsel %vm438_vm0, %v565_v11, %v7642_v49  ;;  %v569_v49 = vld [vmem:[#allocation2 + $0x1a8] sm:$0xff] }
 0x2b8   : > { %v4209_v63 = vadd.f32 %v5103_v48, %v7073_v1  ;;  %v3620_v0 = vsel %vm1177_vm5, %v3566_v3, %v3434_v28  ;;  %4965 = vmatmul.mubr.msk.f32.gmra.mrb[32].mxu1 %vm1940_vm6, %v1211_v38  ;;  %v3567_v5 = vsel %vm438_vm0, %v7641_v7, %v3220_v14  ;;  %v566_v48 = vld [vmem:[#allocation2 + $0x188] sm:$0xff]  ;;  %v1213_v38 = vsel %vm1177_vm5, %v1158_v30, %v7643_v45  ;;  %v7644_v28 = vld [vmem:[#allocation54_spill] sm:$0xff]  ;;  %v7648_v7 = vld [vmem:[#allocation63_spill] sm:$0xff] }
 0x2b9   : > { %4265 = vst.msk [vmem:[%s7084_s23 + $0x8] sm:$0xff] %vm4263_vm7, %v4210_v40  ;;  %5044 = vmatmul.mubr.msk.f32.gmra.mrb[28].mxu0 %vm1940_vm6, %v3620_v0  ;;  %4967 = vmatprep.mubr.msk.f32.mxu1 %vm1940_vm6, %v1212_v15  ;;  %v567_v40 = vld [vmem:[#allocation2 + $0x190] sm:$0xff]  ;;  %v1214_v59 = vsel %vm1177_vm5, %v1159_v19, %v7644_v28  ;;  %v7645_v14 = vld [vmem:[#allocation28_spill] sm:$0xff]  ;;  %v568_v15 = vld [vmem:[#allocation2 + $0x1a0] sm:$0xff] }
 0x2ba   : > { %4264 = vst.msk [vmem:[%s7084_s23] sm:$0xff] %vm4263_vm7, %v4209_v63  ;;  %v3436_v36 = vpop.permute.xlu1 %3435  ;;  %v1160_v50 = vsel %vm438_vm0, %v566_v48, %v7645_v14  ;;  %v7646_v63 = vld [vmem:[#allocation31_spill] sm:$0xff]  ;;  %v7650_v48 = vld [vmem:[#allocation30_spill] sm:$0xff]  ;;  %v570_v28 = vld [vmem:[#allocation2 + $0x1b0] sm:$0xff] }
 0x2bb   : > { %v3621_v21 = vsel %vm1177_vm5, %v3567_v5, %v3436_v36  ;;  %v3222_v3 = vpop.permute.xlu0 %3221  ;;  %v1161_v0 = vsel %vm438_vm0, %v567_v40, %v7646_v63  ;;  %v1215_v30 = vsel %vm1177_vm5, %v1160_v50, %v7647_v16  ;;  %v7649_v19 = vld [vmem:[#allocation55_spill] sm:$0xff] }
 0x2bc   : > { %4968 = vmatmul.mubr.msk.f32.gmra.mrb[34].mxu1 %vm1940_vm6, %v1213_v38  ;;  %5046 = vmatprep.mubr.msk.f32.mxu0 %vm1940_vm6, %v3621_v21  ;;  %v3568_v5 = vsel %vm438_vm0, %v7648_v7, %v3222_v3  ;;  %v1216_v45 = vsel %vm1177_vm5, %v1161_v0, %v7649_v19  ;;  %v1162_v21 = vsel %vm438_vm0, %v568_v15, %v7650_v48  ;;  %v7652_v50 = vld [vmem:[#allocation3_spill] sm:$0xff]  ;;  %v7653_v7 = vld [vmem:[#allocation56_spill] sm:$0xff] }
 0x2bd   : > { %4970 = vmatprep.mubr.msk.f32.mxu1 %vm1940_vm6, %v1214_v59  ;;  %v7651_v59 = vld [vmem:[#allocation33_spill] sm:$0xff]  ;;  %v1217_v63 = vsel %vm1177_vm5, %v1162_v21, %v7652_v50  ;;  %v7654_v15 = vld [vmem:[#allocation32_spill] sm:$0xff]  ;;  %v7655_v48 = vld [vmem:[#allocation35_spill] sm:$0xff] }
 0x2be   : > { %v3224_v11 = vpop.permute.xlu1 %3223  ;;  %v1163_v14 = vsel %vm438_vm0, %v569_v49, %v7651_v59  ;;  %v1164_v49 = vsel %vm438_vm0, %v570_v28, %v7654_v15  ;;  %v7657_v59 = vld [vmem:[#allocation64_spill] sm:$0xff]  ;;  %v7661_v15 = vld [vmem:[#allocation37_spill] sm:$0xff] }
 0x2bf   : > { %v3438_v36 = vpop.permute.xlu0 %3437  ;;  %v3569_v40 = vsel %vm438_vm0, %v6648_v34, %v3224_v11 }
 0x2c0   : > { %v3622_v38 = vsel %vm1177_vm5, %v3568_v5, %v3438_v36  ;;  %4971 = vmatmul.mubr.msk.f32.gmra.mrb[36].mxu1 %vm1940_vm6, %v1215_v30  ;;  %v571_v30 = vld [vmem:[#allocation2 + $0x1c0] sm:$0xff]  ;;  %v1218_v5 = vsel %vm1177_vm5, %v1163_v14, %v7653_v7 }
 0x2c1   : > { %5047 = vmatmul.mubr.msk.f32.gmra.mrb[30].mxu0 %vm1940_vm6, %v3622_v38  ;;  %4973 = vmatprep.mubr.msk.f32.mxu1 %vm1940_vm6, %v1216_v45  ;;  %v572_v38 = vld [vmem:[#allocation2 + $0x1c8] sm:$0xff]  ;;  %v1165_v21 = vsel %vm438_vm0, %v571_v30, %v7655_v48 }
 0x2c2   : > { %v3440_v3 = vpop.permute.xlu1 %3439 }
 0x2c3   : > { %v3623_v0 = vsel %vm1177_vm5, %v3569_v40, %v3440_v3  ;;  %v3226_v16 = vpop.permute.xlu0 %3225  ;;  %v7656_v40 = vld [vmem:[#allocation6_spill] sm:$0xff] }
 0x2c4   : > { %v5006_v36 = vpop.f32.mrb[2].mxu0  ;;  %4974 = vmatmul.mubr.msk.f32.gmra.mrb[38].mxu1 %vm1940_vm6, %v1217_v63  ;;  %5049 = vmatprep.mubr.msk.f32.mxu0 %vm1940_vm6, %v3623_v0  ;;  %v1219_v3 = vsel %vm1177_vm5, %v1164_v49, %v7656_v40  ;;  %v573_v63 = vld [vmem:[#allocation2 + $0x1d0] sm:$0xff] }
 0x2c5   : > { %v5104_v34 = vadd.f32 %v5006_v36, %v6783_v27  ;;  %v3889_v11 = vpop.f32.mrb[3].mxu0  ;;  %4976 = vmatprep.mubr.msk.f32.mxu1 %vm1940_vm6, %v1218_v5  ;;  %v3570_v27 = vsel %vm438_vm0, %v7657_v59, %v3226_v16  ;;  %v7658_v0 = vld [vmem:[#allocation57_spill] sm:$0xff]  ;;  %v7659_v16 = vld [vmem:[#allocation34_spill] sm:$0xff]  ;;  %v1167_v49 = vsel %vm438_vm0, %v573_v63, %v7661_v15  ;;  %v7665_v63 = vld [vmem:[#allocation39_spill] sm:$0xff] }
 0x2c6   : > { %v5105_v19 = vadd.f32 %v3889_v11, %v6788_v12  ;;  %v3228_v45 = vpop.permute.xlu1 %3227  ;;  %v1220_v28 = vsel %vm1177_vm5, %v1165_v21, %v7658_v0  ;;  %v1166_v30 = vsel %vm438_vm0, %v572_v38, %v7659_v16  ;;  %v7660_v5 = vld [vmem:[#allocation65_spill] sm:$0xff]  ;;  %v574_v11 = vld [vmem:[#allocation2 + $0x1e0] sm:$0xff]  ;;  %v7663_v59 = vld [vmem:[#allocation58_spill] sm:$0xff] }
 0x2c7   : > { %v4212_v14 = vadd.f32 %v5104_v34, %v7073_v1  ;;  %v3442_v50 = vpop.permute.xlu0 %3441  ;;  %v3571_v36 = vsel %vm438_vm0, %v7660_v5, %v3228_v45  ;;  %v1222_v38 = vsel %vm1177_vm5, %v1167_v49, %v7663_v59  ;;  %v7664_v45 = vld [vmem:[#allocation36_spill] sm:$0xff]  ;;  %v577_v5 = vld [vmem:[#allocation2 + $0x200] sm:$0xff] }
 0x2c8   : > { %v4211_v12 = vadd.f32 %v5105_v19, %v7073_v1  ;;  %v3624_v7 = vsel %vm1177_vm5, %v3570_v27, %v3442_v50  ;;  %4977 = vmatmul.mubr.msk.f32.gmra.mrb[40].mxu1 %vm1940_vm6, %v1219_v3  ;;  %v7662_v19 = vld [vmem:[#allocation5_spill] sm:$0xff]  ;;  %v575_v3 = vld [vmem:[#allocation2 + $0x1e8] sm:$0xff]  ;;  %v1168_v27 = vsel %vm438_vm0, %v574_v11, %v7664_v45  ;;  %v7669_v11 = vld [vmem:[#allocation38_spill] sm:$0xff] }
 0x2c9   : > { %4267 = vst.msk [vmem:[%s7084_s23 + $0x18] sm:$0xff] %vm4263_vm7, %v4212_v14  ;;  %5050 = vmatmul.mubr.msk.f32.gmra.mrb[32].mxu0 %vm1940_vm6, %v3624_v7  ;;  %4979 = vmatprep.mubr.msk.f32.mxu1 %vm1940_vm6, %v1220_v28  ;;  %v1221_v48 = vsel %vm1177_vm5, %v1166_v30, %v7662_v19  ;;  %v576_v50 = vld [vmem:[#allocation2 + $0x1f0] sm:$0xff]  ;;  %v1169_v0 = vsel %vm438_vm0, %v575_v3, %v7665_v63  ;;  %v7666_v28 = vld [vmem:[#allocation8_spill] sm:$0xff]  ;;  %v7667_v7 = vld [vmem:[#allocation66_spill] sm:$0xff] }
 0x2ca   : > { %4266 = vst.msk [vmem:[%s7084_s23 + $0x10] sm:$0xff] %vm4263_vm7, %v4211_v12  ;;  %v3444_v34 = vpop.permute.xlu1 %3443  ;;  %v1223_v12 = vsel %vm1177_vm5, %v1168_v27, %v7666_v28  ;;  %v1170_v49 = vsel %vm438_vm0, %v576_v50, %v7669_v11  ;;  %v7671_v59 = vld [vmem:[#allocation7_spill] sm:$0xff]  ;;  %v579_v63 = vld [vmem:[#allocation2 + $0x210] sm:$0xff]  ;;  %v7673_v50 = vld [vmem:[#allocation40_spill] sm:$0xff] }
 0x2cb   : > { %v3625_v21 = vsel %vm1177_vm5, %v3571_v36, %v3444_v34  ;;  %v3230_v40 = vpop.permute.xlu0 %3229  ;;  %v7668_v36 = vld [vmem:[#allocation59_spill] sm:$0xff] }
 0x2cc   : > { %4980 = vmatmul.mubr.msk.f32.gmra.mrb[42].mxu1 %vm1940_vm6, %v1221_v48  ;;  %5052 = vmatprep.mubr.msk.f32.mxu0 %vm1940_vm6, %v3625_v21  ;;  %v3572_v16 = vsel %vm438_vm0, %v7667_v7, %v3230_v40  ;;  %v1224_v34 = vsel %vm1177_vm5, %v1169_v0, %v7668_v36  ;;  %v578_v21 = vld [vmem:[#allocation2 + $0x208] sm:$0xff]  ;;  %v7670_v40 = vld [vmem:[#allocation41_spill] sm:$0xff]  ;;  %v7674_v36 = vld [vmem:[#allocation43_spill] sm:$0xff] }
 0x2cd   : > { %4982 = vmatprep.mubr.msk.f32.mxu1 %vm1940_vm6, %v1222_v38  ;;  %v1171_v3 = vsel %vm438_vm0, %v577_v5, %v7670_v40  ;;  %v1225_v38 = vsel %vm1177_vm5, %v1170_v49, %v7671_v59  ;;  %v7672_v0 = vld [vmem:[#allocation60_spill] sm:$0xff]  ;;  %v1172_v7 = vsel %vm438_vm0, %v578_v21, %v7673_v50  ;;  %v580_v5 = vld [vmem:[#allocation2 + $0x220] sm:$0xff]  ;;  %v7676_v40 = vld [vmem:[#allocation62_spill] sm:$0xff] }
 0x2ce   : > { %v3232_v14 = vpop.permute.xlu1 %3231  ;;  %v1226_v28 = vsel %vm1177_vm5, %v1171_v3, %v7672_v0  ;;  %v7679_v0 = vld [vmem:[#allocation61_spill] sm:$0xff] }
 0x2cf   : > { %v3446_v30 = vpop.permute.xlu0 %3445  ;;  %v3573_v19 = vsel %vm438_vm0, %v6734_v37, %v3232_v14 }
 0x2d0   : > { %v3626_v15 = vsel %vm1177_vm5, %v3572_v16, %v3446_v30  ;;  %4983 = vmatmul.mubr.msk.f32.gmra.mrb[44].mxu1 %vm1940_vm6, %v1223_v12 }
 0x2d1   : > { %5053 = vmatmul.mubr.msk.f32.gmra.mrb[34].mxu0 %vm1940_vm6, %v3626_v15  ;;  %4985 = vmatprep.mubr.msk.f32.mxu1 %vm1940_vm6, %v1224_v34  ;;  %v1173_v34 = vsel %vm438_vm0, %v579_v63, %v7674_v36  ;;  %v7675_v15 = vld [vmem:[#allocation10_spill] sm:$0xff] }
 0x2d2   : > { %v3448_v48 = vpop.permute.xlu1 %3447  ;;  %v1227_v11 = vsel %vm1177_vm5, %v1172_v7, %v7675_v15  ;;  %v1228_v21 = vsel %vm1177_vm5, %v1173_v34, %v7676_v40 }
 0x2d3   : > { %v3627_v45 = vsel %vm1177_vm5, %v3573_v19, %v3448_v48  ;;  %v3234_v27 = vpop.permute.xlu0 %3233  ;;  %v581_v48 = vld [vmem:[#allocation2 + $0x228] sm:$0xff] }
 0x2d4   : > { %v5009_v12 = vpop.f32.mrb[4].mxu0  ;;  %4986 = vmatmul.mubr.msk.f32.gmra.mrb[46].mxu1 %vm1940_vm6, %v1225_v38  ;;  %5055 = vmatprep.mubr.msk.f32.mxu0 %vm1940_vm6, %v3627_v45 }
 0x2d5   : > { %v5106_v37 = vadd.f32 %v5009_v12, %v6801_v60  ;;  %v3899_v14 = vpop.f32.mrb[5].mxu0  ;;  %4988 = vmatprep.mubr.msk.f32.mxu1 %vm1940_vm6, %v1226_v28  ;;  %v3574_v60 = vsel %vm438_vm0, %v6759_v31, %v3234_v27  ;;  %v7677_v31 = vld [vmem:[#allocation42_spill] sm:$0xff]  ;;  %v7678_v27 = vld [vmem:[#allocation45_spill] sm:$0xff] }
 0x2d6   : > { %v5107_v16 = vadd.f32 %v3899_v14, %v6805_v47  ;;  %v3236_v30 = vpop.permute.xlu1 %3235  ;;  %v1174_v59 = vsel %vm438_vm0, %v580_v5, %v7677_v31  ;;  %v1175_v63 = vsel %vm438_vm0, %v581_v48, %v7678_v27  ;;  %v7680_v14 = vld [vmem:[#allocation9_spill] sm:$0xff] }
 0x2d7   : > { %v4214_v49 = vadd.f32 %v5106_v37, %v7073_v1  ;;  %v3450_v19 = vpop.permute.xlu0 %3449  ;;  %v3575_v38 = vsel %vm438_vm0, %v6770_v61, %v3236_v30  ;;  %v1229_v28 = vsel %vm1177_vm5, %v1174_v59, %v7679_v0  ;;  %v1230_v50 = vsel %vm1177_vm5, %v1175_v63, %v7680_v14 }
 0x2d8   : > { %v4213_v47 = vadd.f32 %v5107_v16, %v7073_v1  ;;  %v3628_v3 = vsel %vm1177_vm5, %v3574_v60, %v3450_v19  ;;  %4989 = vmatmul.mubr.msk.f32.gmra.mrb[48].mxu1 %vm1940_vm6, %v1227_v11 }
 0x2d9   : > { %4269 = vst.msk [vmem:[%s7084_s23 + $0x28] sm:$0xff] %vm4263_vm7, %v4214_v49  ;;  %5056 = vmatmul.mubr.msk.f32.gmra.mrb[36].mxu0 %vm1940_vm6, %v3628_v3  ;;  %4991 = vmatprep.mubr.msk.f32.mxu1 %vm1940_vm6, %v1228_v21 }
 0x2da   : > { %4268 = vst.msk [vmem:[%s7084_s23 + $0x20] sm:$0xff] %vm4263_vm7, %v4213_v47  ;;  %v3452_v45 = vpop.permute.xlu1 %3451 }
 0x2db   : > { %v3629_v12 = vsel %vm1177_vm5, %v3575_v38, %v3452_v45  ;;  %v3238_v37 = vpop.permute.xlu0 %3237 }
 0x2dc   : > { %4992 = vmatmul.mubr.msk.f32.gmra.mrb[50].mxu1 %vm1940_vm6, %v1229_v28  ;;  %5058 = vmatprep.mubr.msk.f32.mxu0 %vm1940_vm6, %v3629_v12  ;;  %v3576_v7 = vsel %vm438_vm0, %v6799_v58, %v3238_v37 }
 0x2dd   : > { %4994 = vmatprep.mubr.msk.f32.mxu1 %vm1940_vm6, %v1230_v50 }
 0x2de   : > { %v3240_v61 = vpop.permute.xlu1 %3239 }
 0x2df   : > { %v3454_v16 = vpop.permute.xlu0 %3453  ;;  %v3577_v5 = vsel %vm438_vm0, %v6811_v56, %v3240_v61 }
 0x2e0   : > { %v3630_v30 = vsel %vm1177_vm5, %v3576_v7, %v3454_v16 }
 0x2e1   : > { %5059 = vmatmul.mubr.msk.f32.gmra.mrb[38].mxu0 %vm1940_vm6, %v3630_v30 }
 0x2e2   : > { %v3456_v36 = vpop.permute.xlu1 %3455 }
 0x2e3   : > { %v3631_v34 = vsel %vm1177_vm5, %v3577_v5, %v3456_v36  ;;  %v3242_v15 = vpop.permute.xlu0 %3241 }
 0x2e4   : > { %v5012_v11 = vpop.f32.mrb[6].mxu0  ;;  %5061 = vmatprep.mubr.msk.f32.mxu0 %vm1940_vm6, %v3631_v34  ;;  %v3578_v48 = vsel %vm438_vm0, %v6843_v13, %v3242_v15 }
 0x2e5   : > { %v5108_v60 = vadd.f32 %v5012_v11, %v6825_v57  ;;  %v3909_v58 = vpop.f32.mrb[7].mxu0 }
 0x2e6   : > { %v5109_v49 = vadd.f32 %v3909_v58, %v6830_v25  ;;  %v3244_v19 = vpop.permute.xlu1 %3243 }
 0x2e7   : > { %v4216_v40 = vadd.f32 %v5108_v60, %v7073_v1  ;;  %v3458_v56 = vpop.permute.xlu0 %3457  ;;  %v3579_v57 = vsel %vm438_vm0, %v6855_v44, %v3244_v19 }
 0x2e8   : > { %v4215_v21 = vadd.f32 %v5109_v49, %v7073_v1  ;;  %v3632_v47 = vsel %vm1177_vm5, %v3578_v48, %v3458_v56 }
 0x2e9   : > { %4271 = vst.msk [vmem:[%s7084_s23 + $0x38] sm:$0xff] %vm4263_vm7, %v4216_v40  ;;  %5062 = vmatmul.mubr.msk.f32.gmra.mrb[40].mxu0 %vm1940_vm6, %v3632_v47 }
 0x2ea   : > { %4270 = vst.msk [vmem:[%s7084_s23 + $0x30] sm:$0xff] %vm4263_vm7, %v4215_v21  ;;  %v3460_v25 = vpop.permute.xlu1 %3459 }
 0x2eb   : > { %v3633_v3 = vsel %vm1177_vm5, %v3579_v57, %v3460_v25  ;;  %v3246_v13 = vpop.permute.xlu0 %3245 }
 0x2ec   : > { %5064 = vmatprep.mubr.msk.f32.mxu0 %vm1940_vm6, %v3633_v3  ;;  %v3580_v59 = vsel %vm438_vm0, %v6887_v53, %v3246_v13  ;;  %v2994_v3 = vld [vmem:[#allocation2 + $0x260] sm:$0xff] }
 0x2ee   : > { %v3248_v31 = vpop.permute.xlu1 %3247 }
 0x2ef   : > { %v3462_v38 = vpop.permute.xlu0 %3461  ;;  %v3581_v27 = vsel %vm438_vm0, %v6899_v22, %v3248_v31 }
 0x2f0   : > { %v3634_v45 = vsel %vm1177_vm5, %v3580_v59, %v3462_v38  ;;  %v2995_v59 = vld [vmem:[#allocation2 + $0x268] sm:$0xff] }
 0x2f1   : > { %5065 = vmatmul.mubr.msk.f32.gmra.mrb[42].mxu0 %vm1940_vm6, %v3634_v45 }
 0x2f2   : > { %v3464_v44 = vpop.permute.xlu1 %3463 }
 0x2f3   : > { %v3635_v63 = vsel %vm1177_vm5, %v3581_v27, %v3464_v44  ;;  %v3250_v0 = vpop.permute.xlu0 %3249 }
 0x2f4   : > { %v5015_v28 = vpop.f32.mrb[8].mxu0  ;;  %5067 = vmatprep.mubr.msk.f32.mxu0 %vm1940_vm6, %v3635_v63  ;;  %v3582_v50 = vsel %vm438_vm0, %v6931_v52, %v3250_v0  ;;  %v2996_v63 = vld [vmem:[#allocation2 + $0x270] sm:$0xff] }
 0x2f5   : > { %v5110_v12 = vadd.f32 %v5015_v28, %v6845_v18  ;;  %v3919_v53 = vpop.f32.mrb[9].mxu0  ;;  %v582_v28 = vld [vmem:[#allocation2 + $0x230] sm:$0xff] }
 0x2f6   : > { %v5111_v37 = vadd.f32 %v3919_v53, %v6849_v33  ;;  %v3252_v14 = vpop.permute.xlu1 %3251 }
 0x2f7   : > { %v4218_v61 = vadd.f32 %v5110_v12, %v7073_v1  ;;  %v3466_v22 = vpop.permute.xlu0 %3465  ;;  %v3583_v18 = vsel %vm438_vm0, %v6943_v29, %v3252_v14 }
 0x2f8   : > { %v4217_v7 = vadd.f32 %v5111_v37, %v7073_v1  ;;  %v3636_v16 = vsel %vm1177_vm5, %v3582_v50, %v3466_v22  ;;  %v7681_v22 = vld [vmem:[#allocation44_spill] sm:$0xff] }
 0x2f9   : > { %4273 = vst.msk [vmem:[%s7084_s23 + $0x48] sm:$0xff] %vm4263_vm7, %v4218_v61  ;;  %5068 = vmatmul.mubr.msk.f32.gmra.mrb[44].mxu0 %vm1940_vm6, %v3636_v16 }
 0x2fa   : > { %4272 = vst.msk [vmem:[%s7084_s23 + $0x40] sm:$0xff] %vm4263_vm7, %v4217_v7  ;;  %v3468_v33 = vpop.permute.xlu1 %3467  ;;  %v1176_v7 = vsel %vm438_vm0, %v582_v28, %v7681_v22 }
 0x2fb   : > { %v3637_v30 = vsel %vm1177_vm5, %v3583_v18, %v3468_v33  ;;  %v3254_v52 = vpop.permute.xlu0 %3253 }
 0x2fc   : > { %5070 = vmatprep.mubr.msk.f32.mxu0 %vm1940_vm6, %v3637_v30  ;;  %v3584_v36 = vsel %vm438_vm0, %v6975_v6, %v3254_v52 }
 0x2fe   : > { %v3256_v5 = vpop.permute.xlu1 %3255 }
 0x2ff   : > { %v3470_v34 = vpop.permute.xlu0 %3469  ;;  %v3585_v11 = vsel %vm438_vm0, %v6987_v43, %v3256_v5 }
 0x300   : > { %v3638_v15 = vsel %vm1177_vm5, %v3584_v36, %v3470_v34 }
 0x301   : > { %5071 = vmatmul.mubr.msk.f32.gmra.mrb[46].mxu0 %vm1940_vm6, %v3638_v15 }
 0x302   : > { %v3472_v29 = vpop.permute.xlu1 %3471 }
 0x303   : > { %v3639_v60 = vsel %vm1177_vm5, %v3585_v11, %v3472_v29  ;;  %v3258_v58 = vpop.permute.xlu0 %3257 }
 0x304   : > { %v5018_v49 = vpop.f32.mrb[10].mxu0  ;;  %5073 = vmatprep.mubr.msk.f32.mxu0 %vm1940_vm6, %v3639_v60  ;;  %v3586_v56 = vsel %vm438_vm0, %v7013_v17, %v3258_v58 }
 0x305   : > { %v5112_v19 = vadd.f32 %v5018_v49, %v6869_v8  ;;  %v3929_v6 = vpop.f32.mrb[11].mxu0 }
 0x306   : > { %v5113_v48 = vadd.f32 %v3929_v6, %v6874_v41  ;;  %v3260_v40 = vpop.permute.xlu1 %3259 }
 0x307   : > { %v4220_v21 = vadd.f32 %v5112_v19, %v7073_v1  ;;  %v3474_v43 = vpop.permute.xlu0 %3473  ;;  %v3587_v8 = vsel %vm438_vm0, %v7024_v46, %v3260_v40 }
 0x308   : > { %v4219_v47 = vadd.f32 %v5113_v48, %v7073_v1  ;;  %v3640_v57 = vsel %vm1177_vm5, %v3586_v56, %v3474_v43 }
 0x309   : > { %4275 = vst.msk [vmem:[%s7084_s23 + $0x58] sm:$0xff] %vm4263_vm7, %v4220_v21  ;;  %5074 = vmatmul.mubr.msk.f32.gmra.mrb[48].mxu0 %vm1940_vm6, %v3640_v57 }
 0x30a   : > { %4274 = vst.msk [vmem:[%s7084_s23 + $0x50] sm:$0xff] %vm4263_vm7, %v4219_v47  ;;  %v3476_v41 = vpop.permute.xlu1 %3475 }
 0x30b   : > { %v3641_v25 = vsel %vm1177_vm5, %v3587_v8, %v3476_v41  ;;  %v3262_v17 = vpop.permute.xlu0 %3261 }
 0x30c   : > { %5076 = vmatprep.mubr.msk.f32.mxu0 %vm1940_vm6, %v3641_v25  ;;  %v3588_v31 = vsel %vm438_vm0, %v2994_v3, %v3262_v17 }
 0x30e   : > { %v3264_v13 = vpop.permute.xlu1 %3263 }
 0x30f   : > { %v3478_v38 = vpop.permute.xlu0 %3477  ;;  %v3589_v27 = vsel %vm438_vm0, %v2995_v59, %v3264_v13 }
 0x310   : > { %v3642_v45 = vsel %vm1177_vm5, %v3588_v31, %v3478_v38 }
 0x311   : > { %5077 = vmatmul.mubr.msk.f32.gmra.mrb[50].mxu0 %vm1940_vm6, %v3642_v45 }
 0x312   : > { %v3480_v44 = vpop.permute.xlu1 %3479 }
 0x313   : > { %v3643_v46 = vsel %vm1177_vm5, %v3589_v27, %v3480_v44  ;;  %v3266_v0 = vpop.permute.xlu0 %3265 }
 0x314   : > { %v5021_v12 = vpop.f32.mrb[12].mxu0  ;;  %5079 = vmatprep.mubr.msk.f32.mxu0 %vm1940_vm6, %v3643_v46  ;;  %v3590_v14 = vsel %vm438_vm0, %v2996_v63, %v3266_v0 }
 0x315   : > { %v5114_v53 = vadd.f32 %v5021_v12, %v6889_v55  ;;  %v3939_v37 = vpop.f32.mrb[13].mxu0 }
 0x316   : > { %v5115_v50 = vadd.f32 %v3939_v37, %v6893_v2  ;;  %v3482_v61 = vpop.permute.xlu1 %3481 }
 0x317   : > { %v4222_v16 = vadd.f32 %v5114_v53, %v7073_v1  ;;  %v3644_v18 = vsel %vm1177_vm5, %v3590_v14, %v3482_v61  ;;  %v1068_v33 = vpop.permute.xlu0 %1067 }
 0x318   : > { %v4221_v30 = vadd.f32 %v5115_v50, %v7073_v1  ;;  %v1231_v55 = vsel %vm1177_vm5, %v1176_v7, %v1068_v33  ;;  %5080 = vmatmul.mubr.msk.f32.gmra.mrb[52].mxu0 %vm1940_vm6, %v3644_v18 }
 0x319   : > { %4277 = vst.msk [vmem:[%s7084_s23 + $0x68] sm:$0xff] %vm4263_vm7, %v4222_v16  ;;  %4995 = vmatmul.mubr.msk.f32.gmra.mrb[52].mxu1 %vm1940_vm6, %v1231_v55 }
 0x31a   : > { %4276 = vst.msk [vmem:[%s7084_s23 + $0x60] sm:$0xff] %vm4263_vm7, %v4221_v30 }
 0x324   : > { %v5024_v2 = vpop.f32.mrb[14].mxu0 }
 0x325   : > { %v5116_v52 = vadd.f32 %v5024_v2, %v6913_v9  ;;  %v3949_v5 = vpop.f32.mrb[15].mxu0 }
 0x326   : > { %v5117_v36 = vadd.f32 %v3949_v5, %v6918_v62 }
 0x327   : > { %v4224_v34 = vadd.f32 %v5116_v52, %v7073_v1 }
 0x328   : > { %v4223_v15 = vadd.f32 %v5117_v36, %v7073_v1 }
 0x329   : > { %4279 = vst.msk [vmem:[%s7084_s23 + $0x78] sm:$0xff] %vm4263_vm7, %v4224_v34 }
 0x32a   : > { %4278 = vst.msk [vmem:[%s7084_s23 + $0x70] sm:$0xff] %vm4263_vm7, %v4223_v15 }
 0x334   : > { %v5027_v11 = vpop.f32.mrb[16].mxu0 }
 0x335   : > { %v5118_v29 = vadd.f32 %v5027_v11, %v6933_v54  ;;  %v3959_v60 = vpop.f32.mrb[17].mxu0 }
 0x336   : > { %v5119_v58 = vadd.f32 %v3959_v60, %v6937_v42 }
 0x337   : > { %v4226_v9 = vadd.f32 %v5118_v29, %v7073_v1 }
 0x338   : > { %v4225_v62 = vadd.f32 %v5119_v58, %v7073_v1 }
 0x339   : > { %4281 = vst.msk [vmem:[%s7084_s23 + $0x88] sm:$0xff] %vm4263_vm7, %v4226_v9 }
 0x33a   : > { %4280 = vst.msk [vmem:[%s7084_s23 + $0x80] sm:$0xff] %vm4263_vm7, %v4225_v62 }
 0x344   : > { %v5030_v49 = vpop.f32.mrb[18].mxu0 }
 0x345   : > { %v5120_v19 = vadd.f32 %v5030_v49, %v6957_v26  ;;  %v3969_v6 = vpop.f32.mrb[19].mxu0 }
 0x346   : > { %v5121_v48 = vadd.f32 %v3969_v6, %v6962_v4 }
 0x347   : > { %v4228_v54 = vadd.f32 %v5120_v19, %v7073_v1 }
 0x348   : > { %v4227_v42 = vadd.f32 %v5121_v48, %v7073_v1 }
 0x349   : > { %4283 = vst.msk [vmem:[%s7084_s23 + $0x98] sm:$0xff] %vm4263_vm7, %v4228_v54 }
 0x34a   : > { %4282 = vst.msk [vmem:[%s7084_s23 + $0x90] sm:$0xff] %vm4263_vm7, %v4227_v42 }
 0x354   : > { %v5033_v40 = vpop.f32.mrb[20].mxu0 }
 0x355   : > { %v5122_v56 = vadd.f32 %v5033_v40, %v6977_v35  ;;  %v3979_v21 = vpop.f32.mrb[21].mxu0 }
 0x356   : > { %v5123_v43 = vadd.f32 %v3979_v21, %v6981_v24 }
 0x357   : > { %v4230_v26 = vadd.f32 %v5122_v56, %v7073_v1 }
 0x358   : > { %v4229_v4 = vadd.f32 %v5123_v43, %v7073_v1 }
 0x359   : > { %4285 = vst.msk [vmem:[%s7084_s23 + $0xa8] sm:$0xff] %vm4263_vm7, %v4230_v26 }
 0x35a   : > { %4284 = vst.msk [vmem:[%s7084_s23 + $0xa0] sm:$0xff] %vm4263_vm7, %v4229_v4 }
 0x364   : > { %v5036_v47 = vpop.f32.mrb[22].mxu0 }
 0x365   : > { %v5124_v57 = vadd.f32 %v5036_v47, %v6999_v20  ;;  %v3989_v8 = vpop.f32.mrb[23].mxu0 }
 0x366   : > { %v5125_v41 = vadd.f32 %v3989_v8, %v7003_v39 }
 0x367   : > { %v4232_v35 = vadd.f32 %v5124_v57, %v7073_v1 }
 0x368   : > { %v4231_v24 = vadd.f32 %v5125_v41, %v7073_v1 }
 0x369   : > { %4287 = vst.msk [vmem:[%s7084_s23 + $0xb8] sm:$0xff] %vm4263_vm7, %v4232_v35 }
 0x36a   : > { %4286 = vst.msk [vmem:[%s7084_s23 + $0xb0] sm:$0xff] %vm4263_vm7, %v4231_v24 }
 0x374   : > { %v5039_v25 = vpop.f32.mrb[24].mxu0 }
 0x375   : > { %v5126_v17 = vadd.f32 %v5039_v25, %v7015_v10  ;;  %v3999_v3 = vpop.f32.mrb[25].mxu0 }
 0x376   : > { %v5127_v13 = vadd.f32 %v3999_v3, %v7018_v32 }
 0x377   : > { %v4234_v20 = vadd.f32 %v5126_v17, %v7073_v1 }
 0x378   : > { %v4233_v39 = vadd.f32 %v5127_v13, %v7073_v1 }
 0x379   : > { %4289 = vst.msk [vmem:[%s7084_s23 + $0xc8] sm:$0xff] %vm4263_vm7, %v4234_v20 }
 0x37a   : > { %4288 = vst.msk [vmem:[%s7084_s23 + $0xc0] sm:$0xff] %vm4263_vm7, %v4233_v39 }
 0x383   : > { %v4960_v31 = vpop.f32.mrb[28].mxu1 }
 0x384   : > { %v5042_v59 = vpop.f32.mrb[26].mxu0  ;;  %v2813_v38 = vpop.f32.mrb[29].mxu1 }
 0x385   : > { %v5128_v45 = vadd.f32 %v5042_v59, %v7048_v23  ;;  %v4009_v27 = vpop.f32.mrb[27].mxu0 }
 0x386   : > { %v5129_v10 = vadd.f32 %v4009_v27, %v7053_v51 }
 0x387   : > { %v4236_v44 = vadd.f32 %v5128_v45, %v7073_v1  ;;  %v4963_v32 = vpop.f32.mrb[30].mxu1 }
 0x388   : > { %v4235_v46 = vadd.f32 %v5129_v10, %v7073_v1  ;;  %v2823_v63 = vpop.f32.mrb[31].mxu1 }
 0x389   : > { %4291 = vst.msk [vmem:[%s7084_s23 + $0xd8] sm:$0xff] %vm4263_vm7, %v4236_v44 }
 0x38a   : > { %4290 = vst.msk [vmem:[%s7084_s23 + $0xd0] sm:$0xff] %vm4263_vm7, %v4235_v46 }
 0x38b   : > { %v4966_v0 = vpop.f32.mrb[32].mxu1 }
 0x38c   : > { %v5045_v28 = vpop.f32.mrb[28].mxu0  ;;  %v2833_v12 = vpop.f32.mrb[33].mxu1 }
 0x38d   : > { %v5130_v53 = vadd.f32 %v5045_v28, %v4960_v31  ;;  %v4019_v23 = vpop.f32.mrb[29].mxu0 }
 0x38e   : > { %v5131_v37 = vadd.f32 %v4019_v23, %v2813_v38 }
 0x38f   : > { %v4238_v51 = vadd.f32 %v5130_v53, %v7073_v1  ;;  %v4969_v14 = vpop.f32.mrb[34].mxu1 }
 0x390   : > { %v4237_v50 = vadd.f32 %v5131_v37, %v7073_v1  ;;  %v2843_v61 = vpop.f32.mrb[35].mxu1 }
 0x391   : > { %4293 = vst.msk [vmem:[%s7084_s23 + $0xe8] sm:$0xff] %vm4263_vm7, %v4238_v51 }
 0x392   : > { %4292 = vst.msk [vmem:[%s7084_s23 + $0xe0] sm:$0xff] %vm4263_vm7, %v4237_v50 }
 0x393   : > { %v4972_v22 = vpop.f32.mrb[36].mxu1 }
 0x394   : > { %v5048_v7 = vpop.f32.mrb[30].mxu0  ;;  %v2853_v16 = vpop.f32.mrb[37].mxu1 }
 0x395   : > { %v5132_v18 = vadd.f32 %v5048_v7, %v4963_v32  ;;  %v4029_v33 = vpop.f32.mrb[31].mxu0 }
 0x396   : > { %v5133_v30 = vadd.f32 %v4029_v33, %v2823_v63 }
 0x397   : > { %v4240_v55 = vadd.f32 %v5132_v18, %v7073_v1  ;;  %v4975_v2 = vpop.f32.mrb[38].mxu1 }
 0x398   : > { %v4239_v52 = vadd.f32 %v5133_v30, %v7073_v1  ;;  %v2863_v5 = vpop.f32.mrb[39].mxu1 }
 0x399   : > { %4295 = vst.msk [vmem:[%s7084_s23 + $0xf8] sm:$0xff] %vm4263_vm7, %v4240_v55 }
 0x39a   : > { %4294 = vst.msk [vmem:[%s7084_s23 + $0xf0] sm:$0xff] %vm4263_vm7, %v4239_v52 }
 0x39b   : > { %v4978_v36 = vpop.f32.mrb[40].mxu1 }
 0x39c   : > { %v5051_v34 = vpop.f32.mrb[32].mxu0  ;;  %v2873_v15 = vpop.f32.mrb[41].mxu1 }
 0x39d   : > { %v5134_v11 = vadd.f32 %v5051_v34, %v4966_v0  ;;  %v4039_v29 = vpop.f32.mrb[33].mxu0 }
 0x39e   : > { %v5135_v60 = vadd.f32 %v4039_v29, %v2833_v12 }
 0x39f   : > { %v4242_v58 = vadd.f32 %v5134_v11, %v7073_v1  ;;  %v4981_v9 = vpop.f32.mrb[42].mxu1 }
 0x3a0   : > { %v4241_v62 = vadd.f32 %v5135_v60, %v7073_v1  ;;  %v2883_v49 = vpop.f32.mrb[43].mxu1 }
 0x3a1   : > { %4297 = vst.msk [vmem:[%s7084_s23 + $0x108] sm:$0xff] %vm4263_vm7, %v4242_v58 }
 0x3a2   : > { %4296 = vst.msk [vmem:[%s7084_s23 + $0x100] sm:$0xff] %vm4263_vm7, %v4241_v62 }
 0x3a3   : > { %v4984_v19 = vpop.f32.mrb[44].mxu1 }
 0x3a4   : > { %v5054_v6 = vpop.f32.mrb[34].mxu0  ;;  %v2893_v48 = vpop.f32.mrb[45].mxu1 }
 0x3a5   : > { %v5136_v54 = vadd.f32 %v5054_v6, %v4969_v14  ;;  %v4049_v42 = vpop.f32.mrb[35].mxu0 }
 0x3a6   : > { %v5137_v40 = vadd.f32 %v4049_v42, %v2843_v61 }
 0x3a7   : > { %v4244_v56 = vadd.f32 %v5136_v54, %v7073_v1  ;;  %v4987_v21 = vpop.f32.mrb[46].mxu1 }
 0x3a8   : > { %v4243_v43 = vadd.f32 %v5137_v40, %v7073_v1  ;;  %v2903_v26 = vpop.f32.mrb[47].mxu1 }
 0x3a9   : > { %4299 = vst.msk [vmem:[%s7084_s23 + $0x118] sm:$0xff] %vm4263_vm7, %v4244_v56 }
 0x3aa   : > { %4298 = vst.msk [vmem:[%s7084_s23 + $0x110] sm:$0xff] %vm4263_vm7, %v4243_v43 }
 0x3ab   : > { %v4990_v4 = vpop.f32.mrb[48].mxu1 }
 0x3ac   : > { %v5057_v47 = vpop.f32.mrb[36].mxu0  ;;  %v2913_v57 = vpop.f32.mrb[49].mxu1 }
 0x3ad   : > { %v5138_v8 = vadd.f32 %v5057_v47, %v4972_v22  ;;  %v4059_v41 = vpop.f32.mrb[37].mxu0 }
 0x3ae   : > { %v5139_v35 = vadd.f32 %v4059_v41, %v2853_v16 }
 0x3af   : > { %v4246_v24 = vadd.f32 %v5138_v8, %v7073_v1  ;;  %v4993_v25 = vpop.f32.mrb[50].mxu1 }
 0x3b0   : > { %v4245_v17 = vadd.f32 %v5139_v35, %v7073_v1  ;;  %v2923_v3 = vpop.f32.mrb[51].mxu1 }
 0x3b1   : > { %4301 = vst.msk [vmem:[%s7084_s23 + $0x128] sm:$0xff] %vm4263_vm7, %v4246_v24 }
 0x3b2   : > { %4300 = vst.msk [vmem:[%s7084_s23 + $0x120] sm:$0xff] %vm4263_vm7, %v4245_v17 }
 0x3b4   : > { %v5060_v13 = vpop.f32.mrb[38].mxu0 }
 0x3b5   : > { %v5140_v20 = vadd.f32 %v5060_v13, %v4975_v2  ;;  %v4069_v39 = vpop.f32.mrb[39].mxu0 }
 0x3b6   : > { %v5141_v31 = vadd.f32 %v4069_v39, %v2863_v5 }
 0x3b7   : > { %v4248_v59 = vadd.f32 %v5140_v20, %v7073_v1 }
 0x3b8   : > { %v4247_v38 = vadd.f32 %v5141_v31, %v7073_v1 }
 0x3b9   : > { %4303 = vst.msk [vmem:[%s7084_s23 + $0x138] sm:$0xff] %vm4263_vm7, %v4248_v59 }
 0x3ba   : > { %4302 = vst.msk [vmem:[%s7084_s23 + $0x130] sm:$0xff] %vm4263_vm7, %v4247_v38 }
 0x3bc   : > { %v5063_v45 = vpop.f32.mrb[40].mxu0 }
 0x3bd   : > { %v5142_v27 = vadd.f32 %v5063_v45, %v4978_v36  ;;  %v4079_v10 = vpop.f32.mrb[41].mxu0 }
 0x3be   : > { %v5143_v44 = vadd.f32 %v4079_v10, %v2873_v15 }
 0x3bf   : > { %v4250_v32 = vadd.f32 %v5142_v27, %v7073_v1 }
 0x3c0   : > { %v4249_v46 = vadd.f32 %v5143_v44, %v7073_v1 }
 0x3c1   : > { %4305 = vst.msk [vmem:[%s7084_s23 + $0x148] sm:$0xff] %vm4263_vm7, %v4250_v32 }
 0x3c2   : > { %4304 = vst.msk [vmem:[%s7084_s23 + $0x140] sm:$0xff] %vm4263_vm7, %v4249_v46 }
 0x3c4   : > { %v5066_v63 = vpop.f32.mrb[42].mxu0 }
 0x3c5   : > { %v5144_v0 = vadd.f32 %v5066_v63, %v4981_v9  ;;  %v4089_v28 = vpop.f32.mrb[43].mxu0 }
 0x3c6   : > { %v5145_v12 = vadd.f32 %v4089_v28, %v2883_v49 }
 0x3c7   : > { %v4252_v53 = vadd.f32 %v5144_v0, %v7073_v1 }
 0x3c8   : > { %v4251_v23 = vadd.f32 %v5145_v12, %v7073_v1 }
 0x3c9   : > { %4307 = vst.msk [vmem:[%s7084_s23 + $0x158] sm:$0xff] %vm4263_vm7, %v4252_v53 }
 0x3ca   : > { %4306 = vst.msk [vmem:[%s7084_s23 + $0x150] sm:$0xff] %vm4263_vm7, %v4251_v23 }
 0x3cc   : > { %v5069_v37 = vpop.f32.mrb[44].mxu0 }
 0x3cd   : > { %v5146_v51 = vadd.f32 %v5069_v37, %v4984_v19  ;;  %v4099_v14 = vpop.f32.mrb[45].mxu0 }
 0x3ce   : > { %v5147_v50 = vadd.f32 %v4099_v14, %v2893_v48 }
 0x3cf   : > { %v4254_v61 = vadd.f32 %v5146_v51, %v7073_v1 }
 0x3d0   : > { %v4253_v22 = vadd.f32 %v5147_v50, %v7073_v1 }
 0x3d1   : > { %4309 = vst.msk [vmem:[%s7084_s23 + $0x168] sm:$0xff] %vm4263_vm7, %v4254_v61 }
 0x3d2   : > { %4308 = vst.msk [vmem:[%s7084_s23 + $0x160] sm:$0xff] %vm4263_vm7, %v4253_v22 }
 0x3d4   : > { %v5072_v7 = vpop.f32.mrb[46].mxu0 }
 0x3d5   : > { %v5148_v16 = vadd.f32 %v5072_v7, %v4987_v21  ;;  %v4109_v18 = vpop.f32.mrb[47].mxu0 }
 0x3d6   : > { %v5149_v33 = vadd.f32 %v4109_v18, %v2903_v26 }
 0x3d7   : > { %v4256_v30 = vadd.f32 %v5148_v16, %v7073_v1 }
 0x3d8   : > { %v4255_v55 = vadd.f32 %v5149_v33, %v7073_v1 }
 0x3d9   : > { %4311 = vst.msk [vmem:[%s7084_s23 + $0x178] sm:$0xff] %vm4263_vm7, %v4256_v30 }
 0x3da   : > { %4310 = vst.msk [vmem:[%s7084_s23 + $0x170] sm:$0xff] %vm4263_vm7, %v4255_v55 }
 0x3dc   : > { %v5075_v2 = vpop.f32.mrb[48].mxu0 }
 0x3dd   : > { %v5150_v52 = vadd.f32 %v5075_v2, %v4990_v4  ;;  %v4119_v5 = vpop.f32.mrb[49].mxu0 }
 0x3de   : > { %v5151_v36 = vadd.f32 %v4119_v5, %v2913_v57 }
 0x3df   : > { %v4258_v34 = vadd.f32 %v5150_v52, %v7073_v1 }
 0x3e0   : > { %v4257_v15 = vadd.f32 %v5151_v36, %v7073_v1 }
 0x3e1   : > { %4313 = vst.msk [vmem:[%s7084_s23 + $0x188] sm:$0xff] %vm4263_vm7, %v4258_v34 }
 0x3e2   : > { %4312 = vst.msk [vmem:[%s7084_s23 + $0x180] sm:$0xff] %vm4263_vm7, %v4257_v15 }
 0x3e4   : > { %v5078_v11 = vpop.f32.mrb[50].mxu0 }
 0x3e5   : > { %v5152_v29 = vadd.f32 %v5078_v11, %v4993_v25  ;;  %v4129_v60 = vpop.f32.mrb[51].mxu0 }
 0x3e6   : > { %v5153_v58 = vadd.f32 %v4129_v60, %v2923_v3 }
 0x3e7   : > { %v4260_v9 = vadd.f32 %v5152_v29, %v7073_v1 }
 0x3e8   : > { %v4259_v62 = vadd.f32 %v5153_v58, %v7073_v1 }
 0x3e9   : > { %4315 = vst.msk [vmem:[%s7084_s23 + $0x198] sm:$0xff] %vm4263_vm7, %v4260_v9 }
 0x3ea   : > { %4314 = vst.msk [vmem:[%s7084_s23 + $0x190] sm:$0xff] %vm4263_vm7, %v4259_v62 }
 0x3eb   : > { %v5081_v49 = vpop.f32.mrb[52].mxu0 }
 0x3ec   : > { %v4996_v19 = vpop.f32.mrb[52].mxu1  ;;  %v4139_v6 = vpop.f32.mrb[53].mxu0 }
 0x3ed   : > { %v5154_v48 = vadd.f32 %v5081_v49, %v4996_v19  ;;  %v2933_v54 = vpop.f32.mrb[53].mxu1 }
 0x3ee   : > { %v5155_v42 = vadd.f32 %v4139_v6, %v2933_v54 }
 0x3ef   : > { %v4262_v40 = vadd.f32 %v5154_v48, %v7073_v1 }
 0x3f0   : > { %v4261_v56 = vadd.f32 %v5155_v42, %v7073_v1 }
 0x3f1   : > { %4317 = vst.msk [vmem:[%s7084_s23 + $0x1a8] sm:$0xff] %vm4263_vm7, %v4262_v40 }
 0x3f2   : > { %4316 = vst.msk [vmem:[%s7084_s23 + $0x1a0] sm:$0xff] %vm4263_vm7, %v4261_v56 }
 0x3f3 PF: > { %s14_s17 = sadd.s32 1, %s5263_s17   ;;  %s7682_s15 = smov %s5259_s16 }
 0x3f4   : > { %p11_p5 = scmp.ge.s32.totalorder %s14_s17, 4   ;;  %s7683_s16 = smov %s7685_s18 }
 0x3f6   :  { %13 = sbr.rel (!%p11_p5) target bundleno = 2 (0x2), region = 80 }

</bundles_post_ra>
